<compile_context>
chip_gen: v7x
topology: tpu7x:2x2x1
jax: 0.10.0
libtpu: 0.0.40
codegen_flags: <defaults>
</compile_context>

<pallas_src>
import functools

import jax
import jax.numpy as jnp
from jax import lax
from jax.experimental import pallas as pl
from jax.experimental.pallas import tpu as pltpu


def _round_up(n, m):
    return ((n + m - 1) // m) * m


def lstm_fc_kernel(x_ref, wih0_ref, whh0_ref, b0_ref,
                   w1cat_ref, b1_ref, wfc_ref, bfc_ref,
                   out_ref, gates0_ref, h1buf_ref,
                   *, seq_len, batch_p):
    """Full 2-layer LSTM recurrence + FC projection, fully VMEM-resident.

    x_ref:      (T*Bp, Dp)   time-major, batch-padded, lane-padded input
    wih0_ref:   (Dp, 4H)     layer-0 input->gates weights (transposed, lane-padded K)
    whh0_ref:   (H, 4H)      layer-0 hidden->gates weights (transposed)
    b0_ref:     (1, 4H)      layer-0 combined bias (b_ih + b_hh)
    w1cat_ref:  (2H, 4H)     layer-1 stacked [Wih1^T ; Whh1^T]
    b1_ref:     (1, 4H)      layer-1 combined bias
    wfc_ref:    (H, NOp)     FC weight (transposed, lane-padded to 128)
    bfc_ref:    (1, NOp)     FC bias (lane-padded)
    out_ref:    (T*Bp, NOp)  lane-dense output slab
    gates0_ref: (T*Bp, 4H)   scratch: precomputed layer-0 input gates
    h1buf_ref:  (T*Bp, H)    scratch: per-step layer-1 hidden states
    """
    H = whh0_ref.shape[0]
    w_dtype = whh0_ref.dtype  # compute dtype of MXU operands (f32 or bf16)

    # ---------- Phase 1: precompute layer-0 input projection (one big matmul) ----
    gx0 = jnp.dot(x_ref[...], wih0_ref[...], preferred_element_type=jnp.float32)
    gates0_ref[...] = gx0 + b0_ref[...]           # bias folded in, broadcast once

    # Hoist weight loads and the layer-1 bias broadcast out of the time loop
    # (JAX does not CSE broadcast_in_dim; do it once here).
    whh0 = whh0_ref[...]
    w1cat = w1cat_ref[...]
    b1 = jnp.broadcast_to(b1_ref[...], (batch_p, 4 * H))

    def act(gates, c_prev):
        # PyTorch gate order: i, f, g, o  (nonlinearities kept in f32 on the EUP)
        i = jax.nn.sigmoid(gates[:, 0 * H:1 * H])
        f = jax.nn.sigmoid(gates[:, 1 * H:2 * H])
        g = jnp.tanh(gates[:, 2 * H:3 * H])
        o = jax.nn.sigmoid(gates[:, 3 * H:4 * H])
        c = f * c_prev + i * g
        h = o * jnp.tanh(c)
        return h, c

    zeros = jnp.zeros((batch_p, H), jnp.float32)   # torch.zeros h_0 / c_0
    h0, c0, h1, c1 = zeros, zeros, zeros, zeros

    # ---------- Phase 2: recurrence, fully unrolled (static T) -------------------
    for t in range(seq_len):
        rows = pl.ds(t * batch_p, batch_p)         # static start -> aligned slice
        # Layer 0: only the hidden->gates matmul remains on the serial path.
        g0 = gates0_ref[rows, :] + jnp.dot(
            h0.astype(w_dtype), whh0, preferred_element_type=jnp.float32)
        h0, c0 = act(g0, c0)
        # Layer 1: one fused matmul over [h0 | h1_prev] @ [Wih1^T ; Whh1^T].
        xin1 = jnp.concatenate([h0, h1], axis=1).astype(w_dtype)   # (Bp, 2H)
        g1 = jnp.dot(xin1, w1cat, preferred_element_type=jnp.float32) + b1
        h1, c1 = act(g1, c1)
        h1buf_ref[rows, :] = h1                    # lane-dense, unmasked store

    # ---------- Phase 3: FC head, one matmul for the whole sequence --------------
    h1_all = h1buf_ref[...].astype(w_dtype)        # (T*Bp, H)
    y = jnp.dot(h1_all, wfc_ref[...], preferred_element_type=jnp.float32)
    out_ref[...] = (y + bfc_ref[...]).astype(out_ref.dtype)


def lstm_forward(x, params, *, cast_bf16=False):
    """x: (B, T, input_size) float32 -> (B, T, num_output) float32.

    cast_bf16=True casts MXU operands (x, all weights) to bf16 — recommended on
    v6e/v7x (bf16-native MXU); keeps state/nonlinearities and accumulation in f32.
    """
    B, T, D = x.shape
    H = params["whh0"].shape[1]
    NO = params["wfc"].shape[0]

    Bp = max(8, _round_up(B, 8))       # pad batch to the f32 (8,128) sublane tile
    Dp = _round_up(D, 128)             # lane-pad input features (zeros: math unchanged)
    NOp = _round_up(NO, 128)           # lane-dense output; sliced back below
    w_dtype = jnp.bfloat16 if cast_bf16 else jnp.float32

    # Time-major, batch-padded, flattened to (T*Bp, Dp) so the kernel needs no reshapes.
    x_tbd = jnp.transpose(x, (1, 0, 2))                               # (T, B, D)
    x_tbd = jnp.pad(x_tbd, ((0, 0), (0, Bp - B), (0, Dp - D)))        # (T, Bp, Dp)
    x_2d = x_tbd.reshape(T * Bp, Dp).astype(w_dtype)

    wih0 = jnp.pad(params["wih0"].T, ((0, Dp - D), (0, 0))).astype(w_dtype)  # (Dp, 4H)
    whh0 = params["whh0"].T.astype(w_dtype)                                  # (H, 4H)
    b0 = (params["bih0"] + params["bhh0"]).reshape(1, 4 * H)
    w1cat = jnp.concatenate(
        [params["wih1"].T, params["whh1"].T], axis=0).astype(w_dtype)        # (2H, 4H)
    b1 = (params["bih1"] + params["bhh1"]).reshape(1, 4 * H)
    wfc = jnp.pad(params["wfc"].T, ((0, 0), (0, NOp - NO))).astype(w_dtype)  # (H, NOp)
    bfc = jnp.pad(params["bfc"], (0, NOp - NO)).reshape(1, NOp)

    ins = (x_2d, wih0, whh0, b0, w1cat, b1, wfc, bfc)
    vmem = pl.BlockSpec(memory_space=pltpu.MemorySpace.VMEM)

    kernel = functools.partial(lstm_fc_kernel, seq_len=T, batch_p=Bp)
    out_2d = pl.pallas_call(
        kernel,
        out_shape=jax.ShapeDtypeStruct((T * Bp, NOp), jnp.float32),
        in_specs=[vmem] * len(ins),
        out_specs=vmem,
        scratch_shapes=[
            pltpu.VMEM((T * Bp, 4 * H), jnp.float32),   # precomputed layer-0 gates
            pltpu.VMEM((T * Bp, H), jnp.float32),       # per-step h1 buffer
        ],
    )(*ins)
    # TODO(synk): for the full spec (hidden_size=1024) / long T, tile the T axis
    # with a grid ("arbitrary", h/c state carried in VMEM scratch) and shard the
    # batch across TensorCores; not needed at these VMEM-resident test shapes.

    out = out_2d.reshape(T, Bp, NOp).transpose(1, 0, 2)               # (Bp, T, NOp)
    return out[:B, :, :NO].astype(x.dtype)


def init_params(key, input_size, hidden_size, num_output):
    """PyTorch-style uniform(-1/sqrt(H), 1/sqrt(H)) init, deterministic."""
    H = hidden_size
    k = 1.0 / float(jnp.sqrt(jnp.float32(H)))
    keys = jax.random.split(key, 10)
    u = lambda kk, shape: jax.random.uniform(kk, shape, jnp.float32, -k, k)
    return dict(
        wih0=u(keys[0], (4 * H, input_size)),
        whh0=u(keys[1], (4 * H, H)),
        bih0=u(keys[2], (4 * H,)),
        bhh0=u(keys[3], (4 * H,)),
        wih1=u(keys[4], (4 * H, H)),
        whh1=u(keys[5], (4 * H, H)),
        bih1=u(keys[6], (4 * H,)),
        bhh1=u(keys[7], (4 * H,)),
        wfc=u(keys[8], (num_output, H)),
        bfc=u(keys[9], (num_output,)),
    )


def lstm_ref(x, params):
    """Pure-JAX reference matching nn.LSTM(batch_first=True, num_layers=2) + nn.Linear."""
    B, T, D = x.shape
    H = params["whh0"].shape[1]

    def cell(x_t, h, c, wih, whh, bih, bhh):
        gates = x_t @ wih.T + h @ whh.T + bih + bhh
        i = jax.nn.sigmoid(gates[:, :H])
        f = jax.nn.sigmoid(gates[:, H:2 * H])
        g = jnp.tanh(gates[:, 2 * H:3 * H])
        o = jax.nn.sigmoid(gates[:, 3 * H:])
        c = f * c + i * g
        h = o * jnp.tanh(c)
        return h, c

    def step(carry, x_t):
        h0, c0, h1, c1 = carry
        h0, c0 = cell(x_t, h0, c0, params["wih0"], params["whh0"],
                      params["bih0"], params["bhh0"])
        h1, c1 = cell(h0, h1, c1, params["wih1"], params["whh1"],
                      params["bih1"], params["bhh1"])
        y = h1 @ params["wfc"].T + params["bfc"]
        return (h0, c0, h1, c1), y

    z = jnp.zeros((B, H), jnp.float32)
    _, ys = lax.scan(step, (z, z, z, z), jnp.transpose(x, (1, 0, 2)))
    return jnp.transpose(ys, (1, 0, 2))


if __name__ == "__main__":
    # Small shapes consistent with the module's forward (batch_first sequence input).
    B, T = 4, 8
    input_size, hidden_size, num_output = 96, 128, 64

    key = jax.random.PRNGKey(0)
    kx, kp = jax.random.split(key)
    x = jax.random.normal(kx, (B, T, input_size), jnp.float32)
    params = init_params(kp, input_size, hidden_size, num_output)

    out = lstm_forward(x, params)          # f32 MXU operands keeps the 2e-4 check tight
    jax.block_until_ready(out)

    ref = lstm_ref(x, params)
    assert out.shape == (B, T, num_output)
    assert jnp.allclose(out, ref, atol=2e-4, rtol=2e-4), "mismatch vs JAX reference"

    print("KERNEL_OK")
</pallas_src>

<mosaic_0001>
module attributes {stable_mosaic.version = 11 : i64} {
  func.func @lstm_fc_kernel(%arg0: memref<64x128xf32, #tpu.memory_space<vmem>>, %arg1: memref<128x512xf32, #tpu.memory_space<vmem>>, %arg2: memref<128x512xf32, #tpu.memory_space<vmem>>, %arg3: memref<1x512xf32, #tpu.memory_space<vmem>>, %arg4: memref<256x512xf32, #tpu.memory_space<vmem>>, %arg5: memref<1x512xf32, #tpu.memory_space<vmem>>, %arg6: memref<128x128xf32, #tpu.memory_space<vmem>>, %arg7: memref<1x128xf32, #tpu.memory_space<vmem>>, %arg8: memref<64x128xf32, #tpu.memory_space<vmem>>, %arg9: memref<64x512xf32, #tpu.memory_space<vmem>>, %arg10: memref<64x128xf32, #tpu.memory_space<vmem>>) attributes {dimension_semantics = [], scalar_prefetch = 0 : i64, scratch_operands = 2 : i64, tpu.core_type = #tpu.core_type<tc>} {
    %c0 = arith.constant 0 : index
    %c0_0 = arith.constant 0 : index
    %0 = vector.load %arg0[%c0, %c0_0] : memref<64x128xf32, #tpu.memory_space<vmem>>, vector<64x128xf32>
    %c0_1 = arith.constant 0 : index
    %c0_2 = arith.constant 0 : index
    %1 = vector.load %arg1[%c0_1, %c0_2] : memref<128x512xf32, #tpu.memory_space<vmem>>, vector<128x512xf32>
    %cst = arith.constant dense<0.000000e+00> : vector<64x512xf32>
    %2 = tpu.matmul %0, %1, %cst {dimension_numbers = #tpu.dot_dimension_numbers<[1], [0], [0], [1], [0, 0, 1, 1], [], []>} : vector<64x128xf32>, vector<128x512xf32>, vector<64x512xf32> -> vector<64x512xf32>
    %c0_3 = arith.constant 0 : index
    %c0_4 = arith.constant 0 : index
    %3 = vector.load %arg3[%c0_3, %c0_4] : memref<1x512xf32, #tpu.memory_space<vmem>>, vector<1x512xf32>
    %4 = vector.broadcast %3 : vector<1x512xf32> to vector<64x512xf32>
    %5 = arith.addf %2, %4 : vector<64x512xf32>
    %c0_5 = arith.constant 0 : index
    %c0_6 = arith.constant 0 : index
    %6 = vector.load %arg9[%c0_5, %c0_6] : memref<64x512xf32, #tpu.memory_space<vmem>>, vector<64x512xf32>
    tpu.vector_store %arg9[%c0_5, %c0_6], %5 {strides = array<i32>} : memref<64x512xf32, #tpu.memory_space<vmem>>, vector<64x512xf32>,
    %c0_7 = arith.constant 0 : index
    %c0_8 = arith.constant 0 : index
    %7 = vector.load %arg2[%c0_7, %c0_8] : memref<128x512xf32, #tpu.memory_space<vmem>>, vector<128x512xf32>
    %c0_9 = arith.constant 0 : index
    %c0_10 = arith.constant 0 : index
    %8 = vector.load %arg4[%c0_9, %c0_10] : memref<256x512xf32, #tpu.memory_space<vmem>>, vector<256x512xf32>
    %c0_11 = arith.constant 0 : index
    %c0_12 = arith.constant 0 : index
    %9 = vector.load %arg5[%c0_11, %c0_12] : memref<1x512xf32, #tpu.memory_space<vmem>>, vector<1x512xf32>
    %10 = vector.shape_cast %9 : vector<1x512xf32> to vector<1x512xf32>
    %11 = vector.broadcast %10 : vector<1x512xf32> to vector<8x512xf32>
    %cst_13 = arith.constant 0.000000e+00 : f32
    %12 = vector.broadcast %cst_13 : f32 to vector<8x128xf32>
    %c0_14 = arith.constant 0 : index
    %c0_15 = arith.constant 0 : index
    %13 = vector.load %arg9[%c0_14, %c0_15] : memref<64x512xf32, #tpu.memory_space<vmem>>, vector<8x512xf32>
    %cst_16 = arith.constant dense<0.000000e+00> : vector<8x512xf32>
    %14 = tpu.matmul %12, %7, %cst_16 {dimension_numbers = #tpu.dot_dimension_numbers<[1], [0], [0], [1], [0, 0, 1, 1], [], []>} : vector<8x128xf32>, vector<128x512xf32>, vector<8x512xf32> -> vector<8x512xf32>
    %15 = arith.addf %13, %14 : vector<8x512xf32>
    %16 = vector.extract_strided_slice %15 {offsets = [0, 0], sizes = [8, 128], strides = [1, 1]} : vector<8x512xf32> to vector<8x128xf32>
    %17 = arith.negf %16 : vector<8x128xf32>
    %18 = math.exp %17 : vector<8x128xf32>
    %cst_17 = arith.constant 1.000000e+00 : f32
    %19 = vector.broadcast %cst_17 : f32 to vector<8x128xf32>
    %20 = arith.addf %19, %18 : vector<8x128xf32>
    %21 = arith.divf %19, %20 : vector<8x128xf32>
    %22 = vector.extract_strided_slice %15 {offsets = [0, 128], sizes = [8, 128], strides = [1, 1]} : vector<8x512xf32> to vector<8x128xf32>
    %23 = arith.negf %22 : vector<8x128xf32>
    %24 = math.exp %23 : vector<8x128xf32>
    %cst_18 = arith.constant 1.000000e+00 : f32
    %25 = vector.broadcast %cst_18 : f32 to vector<8x128xf32>
    %26 = arith.addf %25, %24 : vector<8x128xf32>
    %27 = arith.divf %25, %26 : vector<8x128xf32>
    %28 = vector.extract_strided_slice %15 {offsets = [0, 256], sizes = [8, 128], strides = [1, 1]} : vector<8x512xf32> to vector<8x128xf32>
    %29 = math.tanh %28 : vector<8x128xf32>
    %30 = vector.extract_strided_slice %15 {offsets = [0, 384], sizes = [8, 128], strides = [1, 1]} : vector<8x512xf32> to vector<8x128xf32>
    %31 = arith.negf %30 : vector<8x128xf32>
    %32 = math.exp %31 : vector<8x128xf32>
    %cst_19 = arith.constant 1.000000e+00 : f32
    %33 = vector.broadcast %cst_19 : f32 to vector<8x128xf32>
    %34 = arith.addf %33, %32 : vector<8x128xf32>
    %35 = arith.divf %33, %34 : vector<8x128xf32>
    %36 = arith.mulf %27, %12 : vector<8x128xf32>
    %37 = arith.mulf %21, %29 : vector<8x128xf32>
    %38 = arith.addf %36, %37 : vector<8x128xf32>
    %39 = math.tanh %38 : vector<8x128xf32>
    %40 = arith.mulf %35, %39 : vector<8x128xf32>
    %41 = tpu.concatenate %40, %12 in 1 : vector<8x128xf32>, vector<8x128xf32> -> vector<8x256xf32>
    %cst_20 = arith.constant dense<0.000000e+00> : vector<8x512xf32>
    %42 = tpu.matmul %41, %8, %cst_20 {dimension_numbers = #tpu.dot_dimension_numbers<[1], [0], [0], [1], [0, 0, 1, 1], [], []>} : vector<8x256xf32>, vector<256x512xf32>, vector<8x512xf32> -> vector<8x512xf32>
    %43 = arith.addf %42, %11 : vector<8x512xf32>
    %44 = vector.extract_strided_slice %43 {offsets = [0, 0], sizes = [8, 128], strides = [1, 1]} : vector<8x512xf32> to vector<8x128xf32>
    %45 = arith.negf %44 : vector<8x128xf32>
    %46 = math.exp %45 : vector<8x128xf32>
    %cst_21 = arith.constant 1.000000e+00 : f32
    %47 = vector.broadcast %cst_21 : f32 to vector<8x128xf32>
    %48 = arith.addf %47, %46 : vector<8x128xf32>
    %49 = arith.divf %47, %48 : vector<8x128xf32>
    %50 = vector.extract_strided_slice %43 {offsets = [0, 128], sizes = [8, 128], strides = [1, 1]} : vector<8x512xf32> to vector<8x128xf32>
    %51 = arith.negf %50 : vector<8x128xf32>
    %52 = math.exp %51 : vector<8x128xf32>
    %cst_22 = arith.constant 1.000000e+00 : f32
    %53 = vector.broadcast %cst_22 : f32 to vector<8x128xf32>
    %54 = arith.addf %53, %52 : vector<8x128xf32>
    %55 = arith.divf %53, %54 : vector<8x128xf32>
    %56 = vector.extract_strided_slice %43 {offsets = [0, 256], sizes = [8, 128], strides = [1, 1]} : vector<8x512xf32> to vector<8x128xf32>
    %57 = math.tanh %56 : vector<8x128xf32>
    %58 = vector.extract_strided_slice %43 {offsets = [0, 384], sizes = [8, 128], strides = [1, 1]} : vector<8x512xf32> to vector<8x128xf32>
    %59 = arith.negf %58 : vector<8x128xf32>
    %60 = math.exp %59 : vector<8x128xf32>
    %cst_23 = arith.constant 1.000000e+00 : f32
    %61 = vector.broadcast %cst_23 : f32 to vector<8x128xf32>
    %62 = arith.addf %61, %60 : vector<8x128xf32>
    %63 = arith.divf %61, %62 : vector<8x128xf32>
    %64 = arith.mulf %55, %12 : vector<8x128xf32>
    %65 = arith.mulf %49, %57 : vector<8x128xf32>
    %66 = arith.addf %64, %65 : vector<8x128xf32>
    %67 = math.tanh %66 : vector<8x128xf32>
    %68 = arith.mulf %63, %67 : vector<8x128xf32>
    %c0_24 = arith.constant 0 : index
    %c0_25 = arith.constant 0 : index
    %69 = vector.load %arg10[%c0_24, %c0_25] : memref<64x128xf32, #tpu.memory_space<vmem>>, vector<8x128xf32>
    tpu.vector_store %arg10[%c0_24, %c0_25], %68 {strides = array<i32>} : memref<64x128xf32, #tpu.memory_space<vmem>>, vector<8x128xf32>,
    %c8 = arith.constant 8 : index
    %c0_26 = arith.constant 0 : index
    %70 = vector.load %arg9[%c8, %c0_26] : memref<64x512xf32, #tpu.memory_space<vmem>>, vector<8x512xf32>
    %cst_27 = arith.constant dense<0.000000e+00> : vector<8x512xf32>
    %71 = tpu.matmul %40, %7, %cst_27 {dimension_numbers = #tpu.dot_dimension_numbers<[1], [0], [0], [1], [0, 0, 1, 1], [], []>} : vector<8x128xf32>, vector<128x512xf32>, vector<8x512xf32> -> vector<8x512xf32>
    %72 = arith.addf %70, %71 : vector<8x512xf32>
    %73 = vector.extract_strided_slice %72 {offsets = [0, 0], sizes = [8, 128], strides = [1, 1]} : vector<8x512xf32> to vector<8x128xf32>
    %74 = arith.negf %73 : vector<8x128xf32>
    %75 = math.exp %74 : vector<8x128xf32>
    %cst_28 = arith.constant 1.000000e+00 : f32
    %76 = vector.broadcast %cst_28 : f32 to vector<8x128xf32>
    %77 = arith.addf %76, %75 : vector<8x128xf32>
    %78 = arith.divf %76, %77 : vector<8x128xf32>
    %79 = vector.extract_strided_slice %72 {offsets = [0, 128], sizes = [8, 128], strides = [1, 1]} : vector<8x512xf32> to vector<8x128xf32>
    %80 = arith.negf %79 : vector<8x128xf32>
    %81 = math.exp %80 : vector<8x128xf32>
    %cst_29 = arith.constant 1.000000e+00 : f32
    %82 = vector.broadcast %cst_29 : f32 to vector<8x128xf32>
    %83 = arith.addf %82, %81 : vector<8x128xf32>
    %84 = arith.divf %82, %83 : vector<8x128xf32>
    %85 = vector.extract_strided_slice %72 {offsets = [0, 256], sizes = [8, 128], strides = [1, 1]} : vector<8x512xf32> to vector<8x128xf32>
    %86 = math.tanh %85 : vector<8x128xf32>
    %87 = vector.extract_strided_slice %72 {offsets = [0, 384], sizes = [8, 128], strides = [1, 1]} : vector<8x512xf32> to vector<8x128xf32>
    %88 = arith.negf %87 : vector<8x128xf32>
    %89 = math.exp %88 : vector<8x128xf32>
    %cst_30 = arith.constant 1.000000e+00 : f32
    %90 = vector.broadcast %cst_30 : f32 to vector<8x128xf32>
    %91 = arith.addf %90, %89 : vector<8x128xf32>
    %92 = arith.divf %90, %91 : vector<8x128xf32>
    %93 = arith.mulf %84, %38 : vector<8x128xf32>
    %94 = arith.mulf %78, %86 : vector<8x128xf32>
    %95 = arith.addf %93, %94 : vector<8x128xf32>
    %96 = math.tanh %95 : vector<8x128xf32>
    %97 = arith.mulf %92, %96 : vector<8x128xf32>
    %98 = tpu.concatenate %97, %68 in 1 : vector<8x128xf32>, vector<8x128xf32> -> vector<8x256xf32>
    %cst_31 = arith.constant dense<0.000000e+00> : vector<8x512xf32>
    %99 = tpu.matmul %98, %8, %cst_31 {dimension_numbers = #tpu.dot_dimension_numbers<[1], [0], [0], [1], [0, 0, 1, 1], [], []>} : vector<8x256xf32>, vector<256x512xf32>, vector<8x512xf32> -> vector<8x512xf32>
    %100 = arith.addf %99, %11 : vector<8x512xf32>
    %101 = vector.extract_strided_slice %100 {offsets = [0, 0], sizes = [8, 128], strides = [1, 1]} : vector<8x512xf32> to vector<8x128xf32>
    %102 = arith.negf %101 : vector<8x128xf32>
    %103 = math.exp %102 : vector<8x128xf32>
    %cst_32 = arith.constant 1.000000e+00 : f32
    %104 = vector.broadcast %cst_32 : f32 to vector<8x128xf32>
    %105 = arith.addf %104, %103 : vector<8x128xf32>
    %106 = arith.divf %104, %105 : vector<8x128xf32>
    %107 = vector.extract_strided_slice %100 {offsets = [0, 128], sizes = [8, 128], strides = [1, 1]} : vector<8x512xf32> to vector<8x128xf32>
    %108 = arith.negf %107 : vector<8x128xf32>
    %109 = math.exp %108 : vector<8x128xf32>
    %cst_33 = arith.constant 1.000000e+00 : f32
    %110 = vector.broadcast %cst_33 : f32 to vector<8x128xf32>
    %111 = arith.addf %110, %109 : vector<8x128xf32>
    %112 = arith.divf %110, %111 : vector<8x128xf32>
    %113 = vector.extract_strided_slice %100 {offsets = [0, 256], sizes = [8, 128], strides = [1, 1]} : vector<8x512xf32> to vector<8x128xf32>
    %114 = math.tanh %113 : vector<8x128xf32>
    %115 = vector.extract_strided_slice %100 {offsets = [0, 384], sizes = [8, 128], strides = [1, 1]} : vector<8x512xf32> to vector<8x128xf32>
    %116 = arith.negf %115 : vector<8x128xf32>
    %117 = math.exp %116 : vector<8x128xf32>
    %cst_34 = arith.constant 1.000000e+00 : f32
    %118 = vector.broadcast %cst_34 : f32 to vector<8x128xf32>
    %119 = arith.addf %118, %117 : vector<8x128xf32>
    %120 = arith.divf %118, %119 : vector<8x128xf32>
    %121 = arith.mulf %112, %66 : vector<8x128xf32>
    %122 = arith.mulf %106, %114 : vector<8x128xf32>
    %123 = arith.addf %121, %122 : vector<8x128xf32>
    %124 = math.tanh %123 : vector<8x128xf32>
    %125 = arith.mulf %120, %124 : vector<8x128xf32>
    %c8_35 = arith.constant 8 : index
    %c0_36 = arith.constant 0 : index
    %126 = vector.load %arg10[%c8_35, %c0_36] : memref<64x128xf32, #tpu.memory_space<vmem>>, vector<8x128xf32>
    tpu.vector_store %arg10[%c8_35, %c0_36], %125 {strides = array<i32>} : memref<64x128xf32, #tpu.memory_space<vmem>>, vector<8x128xf32>,
    %c16 = arith.constant 16 : index
    %c0_37 = arith.constant 0 : index
    %127 = vector.load %arg9[%c16, %c0_37] : memref<64x512xf32, #tpu.memory_space<vmem>>, vector<8x512xf32>
    %cst_38 = arith.constant dense<0.000000e+00> : vector<8x512xf32>
    %128 = tpu.matmul %97, %7, %cst_38 {dimension_numbers = #tpu.dot_dimension_numbers<[1], [0], [0], [1], [0, 0, 1, 1], [], []>} : vector<8x128xf32>, vector<128x512xf32>, vector<8x512xf32> -> vector<8x512xf32>
    %129 = arith.addf %127, %128 : vector<8x512xf32>
    %130 = vector.extract_strided_slice %129 {offsets = [0, 0], sizes = [8, 128], strides = [1, 1]} : vector<8x512xf32> to vector<8x128xf32>
    %131 = arith.negf %130 : vector<8x128xf32>
    %132 = math.exp %131 : vector<8x128xf32>
    %cst_39 = arith.constant 1.000000e+00 : f32
    %133 = vector.broadcast %cst_39 : f32 to vector<8x128xf32>
    %134 = arith.addf %133, %132 : vector<8x128xf32>
    %135 = arith.divf %133, %134 : vector<8x128xf32>
    %136 = vector.extract_strided_slice %129 {offsets = [0, 128], sizes = [8, 128], strides = [1, 1]} : vector<8x512xf32> to vector<8x128xf32>
    %137 = arith.negf %136 : vector<8x128xf32>
    %138 = math.exp %137 : vector<8x128xf32>
    %cst_40 = arith.constant 1.000000e+00 : f32
    %139 = vector.broadcast %cst_40 : f32 to vector<8x128xf32>
    %140 = arith.addf %139, %138 : vector<8x128xf32>
    %141 = arith.divf %139, %140 : vector<8x128xf32>
    %142 = vector.extract_strided_slice %129 {offsets = [0, 256], sizes = [8, 128], strides = [1, 1]} : vector<8x512xf32> to vector<8x128xf32>
    %143 = math.tanh %142 : vector<8x128xf32>
    %144 = vector.extract_strided_slice %129 {offsets = [0, 384], sizes = [8, 128], strides = [1, 1]} : vector<8x512xf32> to vector<8x128xf32>
    %145 = arith.negf %144 : vector<8x128xf32>
    %146 = math.exp %145 : vector<8x128xf32>
    %cst_41 = arith.constant 1.000000e+00 : f32
    %147 = vector.broadcast %cst_41 : f32 to vector<8x128xf32>
    %148 = arith.addf %147, %146 : vector<8x128xf32>
    %149 = arith.divf %147, %148 : vector<8x128xf32>
    %150 = arith.mulf %141, %95 : vector<8x128xf32>
    %151 = arith.mulf %135, %143 : vector<8x128xf32>
    %152 = arith.addf %150, %151 : vector<8x128xf32>
    %153 = math.tanh %152 : vector<8x128xf32>
    %154 = arith.mulf %149, %153 : vector<8x128xf32>
    %155 = tpu.concatenate %154, %125 in 1 : vector<8x128xf32>, vector<8x128xf32> -> vector<8x256xf32>
    %cst_42 = arith.constant dense<0.000000e+00> : vector<8x512xf32>
    %156 = tpu.matmul %155, %8, %cst_42 {dimension_numbers = #tpu.dot_dimension_numbers<[1], [0], [0], [1], [0, 0, 1, 1], [], []>} : vector<8x256xf32>, vector<256x512xf32>, vector<8x512xf32> -> vector<8x512xf32>
    %157 = arith.addf %156, %11 : vector<8x512xf32>
    %158 = vector.extract_strided_slice %157 {offsets = [0, 0], sizes = [8, 128], strides = [1, 1]} : vector<8x512xf32> to vector<8x128xf32>
    %159 = arith.negf %158 : vector<8x128xf32>
    %160 = math.exp %159 : vector<8x128xf32>
    %cst_43 = arith.constant 1.000000e+00 : f32
    %161 = vector.broadcast %cst_43 : f32 to vector<8x128xf32>
    %162 = arith.addf %161, %160 : vector<8x128xf32>
    %163 = arith.divf %161, %162 : vector<8x128xf32>
    %164 = vector.extract_strided_slice %157 {offsets = [0, 128], sizes = [8, 128], strides = [1, 1]} : vector<8x512xf32> to vector<8x128xf32>
    %165 = arith.negf %164 : vector<8x128xf32>
    %166 = math.exp %165 : vector<8x128xf32>
    %cst_44 = arith.constant 1.000000e+00 : f32
    %167 = vector.broadcast %cst_44 : f32 to vector<8x128xf32>
    %168 = arith.addf %167, %166 : vector<8x128xf32>
    %169 = arith.divf %167, %168 : vector<8x128xf32>
    %170 = vector.extract_strided_slice %157 {offsets = [0, 256], sizes = [8, 128], strides = [1, 1]} : vector<8x512xf32> to vector<8x128xf32>
    %171 = math.tanh %170 : vector<8x128xf32>
    %172 = vector.extract_strided_slice %157 {offsets = [0, 384], sizes = [8, 128], strides = [1, 1]} : vector<8x512xf32> to vector<8x128xf32>
    %173 = arith.negf %172 : vector<8x128xf32>
    %174 = math.exp %173 : vector<8x128xf32>
    %cst_45 = arith.constant 1.000000e+00 : f32
    %175 = vector.broadcast %cst_45 : f32 to vector<8x128xf32>
    %176 = arith.addf %175, %174 : vector<8x128xf32>
    %177 = arith.divf %175, %176 : vector<8x128xf32>
    %178 = arith.mulf %169, %123 : vector<8x128xf32>
    %179 = arith.mulf %163, %171 : vector<8x128xf32>
    %180 = arith.addf %178, %179 : vector<8x128xf32>
    %181 = math.tanh %180 : vector<8x128xf32>
    %182 = arith.mulf %177, %181 : vector<8x128xf32>
    %c16_46 = arith.constant 16 : index
    %c0_47 = arith.constant 0 : index
    %183 = vector.load %arg10[%c16_46, %c0_47] : memref<64x128xf32, #tpu.memory_space<vmem>>, vector<8x128xf32>
    tpu.vector_store %arg10[%c16_46, %c0_47], %182 {strides = array<i32>} : memref<64x128xf32, #tpu.memory_space<vmem>>, vector<8x128xf32>,
    %c24 = arith.constant 24 : index
    %c0_48 = arith.constant 0 : index
    %184 = vector.load %arg9[%c24, %c0_48] : memref<64x512xf32, #tpu.memory_space<vmem>>, vector<8x512xf32>
    %cst_49 = arith.constant dense<0.000000e+00> : vector<8x512xf32>
    %185 = tpu.matmul %154, %7, %cst_49 {dimension_numbers = #tpu.dot_dimension_numbers<[1], [0], [0], [1], [0, 0, 1, 1], [], []>} : vector<8x128xf32>, vector<128x512xf32>, vector<8x512xf32> -> vector<8x512xf32>
    %186 = arith.addf %184, %185 : vector<8x512xf32>
    %187 = vector.extract_strided_slice %186 {offsets = [0, 0], sizes = [8, 128], strides = [1, 1]} : vector<8x512xf32> to vector<8x128xf32>
    %188 = arith.negf %187 : vector<8x128xf32>
    %189 = math.exp %188 : vector<8x128xf32>
    %cst_50 = arith.constant 1.000000e+00 : f32
    %190 = vector.broadcast %cst_50 : f32 to vector<8x128xf32>
    %191 = arith.addf %190, %189 : vector<8x128xf32>
    %192 = arith.divf %190, %191 : vector<8x128xf32>
    %193 = vector.extract_strided_slice %186 {offsets = [0, 128], sizes = [8, 128], strides = [1, 1]} : vector<8x512xf32> to vector<8x128xf32>
    %194 = arith.negf %193 : vector<8x128xf32>
    %195 = math.exp %194 : vector<8x128xf32>
    %cst_51 = arith.constant 1.000000e+00 : f32
    %196 = vector.broadcast %cst_51 : f32 to vector<8x128xf32>
    %197 = arith.addf %196, %195 : vector<8x128xf32>
    %198 = arith.divf %196, %197 : vector<8x128xf32>
    %199 = vector.extract_strided_slice %186 {offsets = [0, 256], sizes = [8, 128], strides = [1, 1]} : vector<8x512xf32> to vector<8x128xf32>
    %200 = math.tanh %199 : vector<8x128xf32>
    %201 = vector.extract_strided_slice %186 {offsets = [0, 384], sizes = [8, 128], strides = [1, 1]} : vector<8x512xf32> to vector<8x128xf32>
    %202 = arith.negf %201 : vector<8x128xf32>
    %203 = math.exp %202 : vector<8x128xf32>
    %cst_52 = arith.constant 1.000000e+00 : f32
    %204 = vector.broadcast %cst_52 : f32 to vector<8x128xf32>
    %205 = arith.addf %204, %203 : vector<8x128xf32>
    %206 = arith.divf %204, %205 : vector<8x128xf32>
    %207 = arith.mulf %198, %152 : vector<8x128xf32>
    %208 = arith.mulf %192, %200 : vector<8x128xf32>
    %209 = arith.addf %207, %208 : vector<8x128xf32>
    %210 = math.tanh %209 : vector<8x128xf32>
    %211 = arith.mulf %206, %210 : vector<8x128xf32>
    %212 = tpu.concatenate %211, %182 in 1 : vector<8x128xf32>, vector<8x128xf32> -> vector<8x256xf32>
    %cst_53 = arith.constant dense<0.000000e+00> : vector<8x512xf32>
    %213 = tpu.matmul %212, %8, %cst_53 {dimension_numbers = #tpu.dot_dimension_numbers<[1], [0], [0], [1], [0, 0, 1, 1], [], []>} : vector<8x256xf32>, vector<256x512xf32>, vector<8x512xf32> -> vector<8x512xf32>
    %214 = arith.addf %213, %11 : vector<8x512xf32>
    %215 = vector.extract_strided_slice %214 {offsets = [0, 0], sizes = [8, 128], strides = [1, 1]} : vector<8x512xf32> to vector<8x128xf32>
    %216 = arith.negf %215 : vector<8x128xf32>
    %217 = math.exp %216 : vector<8x128xf32>
    %cst_54 = arith.constant 1.000000e+00 : f32
    %218 = vector.broadcast %cst_54 : f32 to vector<8x128xf32>
    %219 = arith.addf %218, %217 : vector<8x128xf32>
    %220 = arith.divf %218, %219 : vector<8x128xf32>
    %221 = vector.extract_strided_slice %214 {offsets = [0, 128], sizes = [8, 128], strides = [1, 1]} : vector<8x512xf32> to vector<8x128xf32>
    %222 = arith.negf %221 : vector<8x128xf32>
    %223 = math.exp %222 : vector<8x128xf32>
    %cst_55 = arith.constant 1.000000e+00 : f32
    %224 = vector.broadcast %cst_55 : f32 to vector<8x128xf32>
    %225 = arith.addf %224, %223 : vector<8x128xf32>
    %226 = arith.divf %224, %225 : vector<8x128xf32>
    %227 = vector.extract_strided_slice %214 {offsets = [0, 256], sizes = [8, 128], strides = [1, 1]} : vector<8x512xf32> to vector<8x128xf32>
    %228 = math.tanh %227 : vector<8x128xf32>
    %229 = vector.extract_strided_slice %214 {offsets = [0, 384], sizes = [8, 128], strides = [1, 1]} : vector<8x512xf32> to vector<8x128xf32>
    %230 = arith.negf %229 : vector<8x128xf32>
    %231 = math.exp %230 : vector<8x128xf32>
    %cst_56 = arith.constant 1.000000e+00 : f32
    %232 = vector.broadcast %cst_56 : f32 to vector<8x128xf32>
    %233 = arith.addf %232, %231 : vector<8x128xf32>
    %234 = arith.divf %232, %233 : vector<8x128xf32>
    %235 = arith.mulf %226, %180 : vector<8x128xf32>
    %236 = arith.mulf %220, %228 : vector<8x128xf32>
    %237 = arith.addf %235, %236 : vector<8x128xf32>
    %238 = math.tanh %237 : vector<8x128xf32>
    %239 = arith.mulf %234, %238 : vector<8x128xf32>
    %c24_57 = arith.constant 24 : index
    %c0_58 = arith.constant 0 : index
    %240 = vector.load %arg10[%c24_57, %c0_58] : memref<64x128xf32, #tpu.memory_space<vmem>>, vector<8x128xf32>
    tpu.vector_store %arg10[%c24_57, %c0_58], %239 {strides = array<i32>} : memref<64x128xf32, #tpu.memory_space<vmem>>, vector<8x128xf32>,
    %c32 = arith.constant 32 : index
    %c0_59 = arith.constant 0 : index
    %241 = vector.load %arg9[%c32, %c0_59] : memref<64x512xf32, #tpu.memory_space<vmem>>, vector<8x512xf32>
    %cst_60 = arith.constant dense<0.000000e+00> : vector<8x512xf32>
    %242 = tpu.matmul %211, %7, %cst_60 {dimension_numbers = #tpu.dot_dimension_numbers<[1], [0], [0], [1], [0, 0, 1, 1], [], []>} : vector<8x128xf32>, vector<128x512xf32>, vector<8x512xf32> -> vector<8x512xf32>
    %243 = arith.addf %241, %242 : vector<8x512xf32>
    %244 = vector.extract_strided_slice %243 {offsets = [0, 0], sizes = [8, 128], strides = [1, 1]} : vector<8x512xf32> to vector<8x128xf32>
    %245 = arith.negf %244 : vector<8x128xf32>
    %246 = math.exp %245 : vector<8x128xf32>
    %cst_61 = arith.constant 1.000000e+00 : f32
    %247 = vector.broadcast %cst_61 : f32 to vector<8x128xf32>
    %248 = arith.addf %247, %246 : vector<8x128xf32>
    %249 = arith.divf %247, %248 : vector<8x128xf32>
    %250 = vector.extract_strided_slice %243 {offsets = [0, 128], sizes = [8, 128], strides = [1, 1]} : vector<8x512xf32> to vector<8x128xf32>
    %251 = arith.negf %250 : vector<8x128xf32>
    %252 = math.exp %251 : vector<8x128xf32>
    %cst_62 = arith.constant 1.000000e+00 : f32
    %253 = vector.broadcast %cst_62 : f32 to vector<8x128xf32>
    %254 = arith.addf %253, %252 : vector<8x128xf32>
    %255 = arith.divf %253, %254 : vector<8x128xf32>
    %256 = vector.extract_strided_slice %243 {offsets = [0, 256], sizes = [8, 128], strides = [1, 1]} : vector<8x512xf32> to vector<8x128xf32>
    %257 = math.tanh %256 : vector<8x128xf32>
    %258 = vector.extract_strided_slice %243 {offsets = [0, 384], sizes = [8, 128], strides = [1, 1]} : vector<8x512xf32> to vector<8x128xf32>
    %259 = arith.negf %258 : vector<8x128xf32>
    %260 = math.exp %259 : vector<8x128xf32>
    %cst_63 = arith.constant 1.000000e+00 : f32
    %261 = vector.broadcast %cst_63 : f32 to vector<8x128xf32>
    %262 = arith.addf %261, %260 : vector<8x128xf32>
    %263 = arith.divf %261, %262 : vector<8x128xf32>
    %264 = arith.mulf %255, %209 : vector<8x128xf32>
    %265 = arith.mulf %249, %257 : vector<8x128xf32>
    %266 = arith.addf %264, %265 : vector<8x128xf32>
    %267 = math.tanh %266 : vector<8x128xf32>
    %268 = arith.mulf %263, %267 : vector<8x128xf32>
    %269 = tpu.concatenate %268, %239 in 1 : vector<8x128xf32>, vector<8x128xf32> -> vector<8x256xf32>
    %cst_64 = arith.constant dense<0.000000e+00> : vector<8x512xf32>
    %270 = tpu.matmul %269, %8, %cst_64 {dimension_numbers = #tpu.dot_dimension_numbers<[1], [0], [0], [1], [0, 0, 1, 1], [], []>} : vector<8x256xf32>, vector<256x512xf32>, vector<8x512xf32> -> vector<8x512xf32>
    %271 = arith.addf %270, %11 : vector<8x512xf32>
    %272 = vector.extract_strided_slice %271 {offsets = [0, 0], sizes = [8, 128], strides = [1, 1]} : vector<8x512xf32> to vector<8x128xf32>
    %273 = arith.negf %272 : vector<8x128xf32>
    %274 = math.exp %273 : vector<8x128xf32>
    %cst_65 = arith.constant 1.000000e+00 : f32
    %275 = vector.broadcast %cst_65 : f32 to vector<8x128xf32>
    %276 = arith.addf %275, %274 : vector<8x128xf32>
    %277 = arith.divf %275, %276 : vector<8x128xf32>
    %278 = vector.extract_strided_slice %271 {offsets = [0, 128], sizes = [8, 128], strides = [1, 1]} : vector<8x512xf32> to vector<8x128xf32>
    %279 = arith.negf %278 : vector<8x128xf32>
    %280 = math.exp %279 : vector<8x128xf32>
    %cst_66 = arith.constant 1.000000e+00 : f32
    %281 = vector.broadcast %cst_66 : f32 to vector<8x128xf32>
    %282 = arith.addf %281, %280 : vector<8x128xf32>
    %283 = arith.divf %281, %282 : vector<8x128xf32>
    %284 = vector.extract_strided_slice %271 {offsets = [0, 256], sizes = [8, 128], strides = [1, 1]} : vector<8x512xf32> to vector<8x128xf32>
    %285 = math.tanh %284 : vector<8x128xf32>
    %286 = vector.extract_strided_slice %271 {offsets = [0, 384], sizes = [8, 128], strides = [1, 1]} : vector<8x512xf32> to vector<8x128xf32>
    %287 = arith.negf %286 : vector<8x128xf32>
    %288 = math.exp %287 : vector<8x128xf32>
    %cst_67 = arith.constant 1.000000e+00 : f32
    %289 = vector.broadcast %cst_67 : f32 to vector<8x128xf32>
    %290 = arith.addf %289, %288 : vector<8x128xf32>
    %291 = arith.divf %289, %290 : vector<8x128xf32>
    %292 = arith.mulf %283, %237 : vector<8x128xf32>
    %293 = arith.mulf %277, %285 : vector<8x128xf32>
    %294 = arith.addf %292, %293 : vector<8x128xf32>
    %295 = math.tanh %294 : vector<8x128xf32>
    %296 = arith.mulf %291, %295 : vector<8x128xf32>
    %c32_68 = arith.constant 32 : index
    %c0_69 = arith.constant 0 : index
    %297 = vector.load %arg10[%c32_68, %c0_69] : memref<64x128xf32, #tpu.memory_space<vmem>>, vector<8x128xf32>
    tpu.vector_store %arg10[%c32_68, %c0_69], %296 {strides = array<i32>} : memref<64x128xf32, #tpu.memory_space<vmem>>, vector<8x128xf32>,
    %c40 = arith.constant 40 : index
    %c0_70 = arith.constant 0 : index
    %298 = vector.load %arg9[%c40, %c0_70] : memref<64x512xf32, #tpu.memory_space<vmem>>, vector<8x512xf32>
    %cst_71 = arith.constant dense<0.000000e+00> : vector<8x512xf32>
    %299 = tpu.matmul %268, %7, %cst_71 {dimension_numbers = #tpu.dot_dimension_numbers<[1], [0], [0], [1], [0, 0, 1, 1], [], []>} : vector<8x128xf32>, vector<128x512xf32>, vector<8x512xf32> -> vector<8x512xf32>
    %300 = arith.addf %298, %299 : vector<8x512xf32>
    %301 = vector.extract_strided_slice %300 {offsets = [0, 0], sizes = [8, 128], strides = [1, 1]} : vector<8x512xf32> to vector<8x128xf32>
    %302 = arith.negf %301 : vector<8x128xf32>
    %303 = math.exp %302 : vector<8x128xf32>
    %cst_72 = arith.constant 1.000000e+00 : f32
    %304 = vector.broadcast %cst_72 : f32 to vector<8x128xf32>
    %305 = arith.addf %304, %303 : vector<8x128xf32>
    %306 = arith.divf %304, %305 : vector<8x128xf32>
    %307 = vector.extract_strided_slice %300 {offsets = [0, 128], sizes = [8, 128], strides = [1, 1]} : vector<8x512xf32> to vector<8x128xf32>
    %308 = arith.negf %307 : vector<8x128xf32>
    %309 = math.exp %308 : vector<8x128xf32>
    %cst_73 = arith.constant 1.000000e+00 : f32
    %310 = vector.broadcast %cst_73 : f32 to vector<8x128xf32>
    %311 = arith.addf %310, %309 : vector<8x128xf32>
    %312 = arith.divf %310, %311 : vector<8x128xf32>
    %313 = vector.extract_strided_slice %300 {offsets = [0, 256], sizes = [8, 128], strides = [1, 1]} : vector<8x512xf32> to vector<8x128xf32>
    %314 = math.tanh %313 : vector<8x128xf32>
    %315 = vector.extract_strided_slice %300 {offsets = [0, 384], sizes = [8, 128], strides = [1, 1]} : vector<8x512xf32> to vector<8x128xf32>
    %316 = arith.negf %315 : vector<8x128xf32>
    %317 = math.exp %316 : vector<8x128xf32>
    %cst_74 = arith.constant 1.000000e+00 : f32
    %318 = vector.broadcast %cst_74 : f32 to vector<8x128xf32>
    %319 = arith.addf %318, %317 : vector<8x128xf32>
    %320 = arith.divf %318, %319 : vector<8x128xf32>
    %321 = arith.mulf %312, %266 : vector<8x128xf32>
    %322 = arith.mulf %306, %314 : vector<8x128xf32>
    %323 = arith.addf %321, %322 : vector<8x128xf32>
    %324 = math.tanh %323 : vector<8x128xf32>
    %325 = arith.mulf %320, %324 : vector<8x128xf32>
    %326 = tpu.concatenate %325, %296 in 1 : vector<8x128xf32>, vector<8x128xf32> -> vector<8x256xf32>
    %cst_75 = arith.constant dense<0.000000e+00> : vector<8x512xf32>
    %327 = tpu.matmul %326, %8, %cst_75 {dimension_numbers = #tpu.dot_dimension_numbers<[1], [0], [0], [1], [0, 0, 1, 1], [], []>} : vector<8x256xf32>, vector<256x512xf32>, vector<8x512xf32> -> vector<8x512xf32>
    %328 = arith.addf %327, %11 : vector<8x512xf32>
    %329 = vector.extract_strided_slice %328 {offsets = [0, 0], sizes = [8, 128], strides = [1, 1]} : vector<8x512xf32> to vector<8x128xf32>
    %330 = arith.negf %329 : vector<8x128xf32>
    %331 = math.exp %330 : vector<8x128xf32>
    %cst_76 = arith.constant 1.000000e+00 : f32
    %332 = vector.broadcast %cst_76 : f32 to vector<8x128xf32>
    %333 = arith.addf %332, %331 : vector<8x128xf32>
    %334 = arith.divf %332, %333 : vector<8x128xf32>
    %335 = vector.extract_strided_slice %328 {offsets = [0, 128], sizes = [8, 128], strides = [1, 1]} : vector<8x512xf32> to vector<8x128xf32>
    %336 = arith.negf %335 : vector<8x128xf32>
    %337 = math.exp %336 : vector<8x128xf32>
    %cst_77 = arith.constant 1.000000e+00 : f32
    %338 = vector.broadcast %cst_77 : f32 to vector<8x128xf32>
    %339 = arith.addf %338, %337 : vector<8x128xf32>
    %340 = arith.divf %338, %339 : vector<8x128xf32>
    %341 = vector.extract_strided_slice %328 {offsets = [0, 256], sizes = [8, 128], strides = [1, 1]} : vector<8x512xf32> to vector<8x128xf32>
    %342 = math.tanh %341 : vector<8x128xf32>
    %343 = vector.extract_strided_slice %328 {offsets = [0, 384], sizes = [8, 128], strides = [1, 1]} : vector<8x512xf32> to vector<8x128xf32>
    %344 = arith.negf %343 : vector<8x128xf32>
    %345 = math.exp %344 : vector<8x128xf32>
    %cst_78 = arith.constant 1.000000e+00 : f32
    %346 = vector.broadcast %cst_78 : f32 to vector<8x128xf32>
    %347 = arith.addf %346, %345 : vector<8x128xf32>
    %348 = arith.divf %346, %347 : vector<8x128xf32>
    %349 = arith.mulf %340, %294 : vector<8x128xf32>
    %350 = arith.mulf %334, %342 : vector<8x128xf32>
    %351 = arith.addf %349, %350 : vector<8x128xf32>
    %352 = math.tanh %351 : vector<8x128xf32>
    %353 = arith.mulf %348, %352 : vector<8x128xf32>
    %c40_79 = arith.constant 40 : index
    %c0_80 = arith.constant 0 : index
    %354 = vector.load %arg10[%c40_79, %c0_80] : memref<64x128xf32, #tpu.memory_space<vmem>>, vector<8x128xf32>
    tpu.vector_store %arg10[%c40_79, %c0_80], %353 {strides = array<i32>} : memref<64x128xf32, #tpu.memory_space<vmem>>, vector<8x128xf32>,
    %c48 = arith.constant 48 : index
    %c0_81 = arith.constant 0 : index
    %355 = vector.load %arg9[%c48, %c0_81] : memref<64x512xf32, #tpu.memory_space<vmem>>, vector<8x512xf32>
    %cst_82 = arith.constant dense<0.000000e+00> : vector<8x512xf32>
    %356 = tpu.matmul %325, %7, %cst_82 {dimension_numbers = #tpu.dot_dimension_numbers<[1], [0], [0], [1], [0, 0, 1, 1], [], []>} : vector<8x128xf32>, vector<128x512xf32>, vector<8x512xf32> -> vector<8x512xf32>
    %357 = arith.addf %355, %356 : vector<8x512xf32>
    %358 = vector.extract_strided_slice %357 {offsets = [0, 0], sizes = [8, 128], strides = [1, 1]} : vector<8x512xf32> to vector<8x128xf32>
    %359 = arith.negf %358 : vector<8x128xf32>
    %360 = math.exp %359 : vector<8x128xf32>
    %cst_83 = arith.constant 1.000000e+00 : f32
    %361 = vector.broadcast %cst_83 : f32 to vector<8x128xf32>
    %362 = arith.addf %361, %360 : vector<8x128xf32>
    %363 = arith.divf %361, %362 : vector<8x128xf32>
    %364 = vector.extract_strided_slice %357 {offsets = [0, 128], sizes = [8, 128], strides = [1, 1]} : vector<8x512xf32> to vector<8x128xf32>
    %365 = arith.negf %364 : vector<8x128xf32>
    %366 = math.exp %365 : vector<8x128xf32>
    %cst_84 = arith.constant 1.000000e+00 : f32
    %367 = vector.broadcast %cst_84 : f32 to vector<8x128xf32>
    %368 = arith.addf %367, %366 : vector<8x128xf32>
    %369 = arith.divf %367, %368 : vector<8x128xf32>
    %370 = vector.extract_strided_slice %357 {offsets = [0, 256], sizes = [8, 128], strides = [1, 1]} : vector<8x512xf32> to vector<8x128xf32>
    %371 = math.tanh %370 : vector<8x128xf32>
    %372 = vector.extract_strided_slice %357 {offsets = [0, 384], sizes = [8, 128], strides = [1, 1]} : vector<8x512xf32> to vector<8x128xf32>
    %373 = arith.negf %372 : vector<8x128xf32>
    %374 = math.exp %373 : vector<8x128xf32>
    %cst_85 = arith.constant 1.000000e+00 : f32
    %375 = vector.broadcast %cst_85 : f32 to vector<8x128xf32>
    %376 = arith.addf %375, %374 : vector<8x128xf32>
    %377 = arith.divf %375, %376 : vector<8x128xf32>
    %378 = arith.mulf %369, %323 : vector<8x128xf32>
    %379 = arith.mulf %363, %371 : vector<8x128xf32>
    %380 = arith.addf %378, %379 : vector<8x128xf32>
    %381 = math.tanh %380 : vector<8x128xf32>
    %382 = arith.mulf %377, %381 : vector<8x128xf32>
    %383 = tpu.concatenate %382, %353 in 1 : vector<8x128xf32>, vector<8x128xf32> -> vector<8x256xf32>
    %cst_86 = arith.constant dense<0.000000e+00> : vector<8x512xf32>
    %384 = tpu.matmul %383, %8, %cst_86 {dimension_numbers = #tpu.dot_dimension_numbers<[1], [0], [0], [1], [0, 0, 1, 1], [], []>} : vector<8x256xf32>, vector<256x512xf32>, vector<8x512xf32> -> vector<8x512xf32>
    %385 = arith.addf %384, %11 : vector<8x512xf32>
    %386 = vector.extract_strided_slice %385 {offsets = [0, 0], sizes = [8, 128], strides = [1, 1]} : vector<8x512xf32> to vector<8x128xf32>
    %387 = arith.negf %386 : vector<8x128xf32>
    %388 = math.exp %387 : vector<8x128xf32>
    %cst_87 = arith.constant 1.000000e+00 : f32
    %389 = vector.broadcast %cst_87 : f32 to vector<8x128xf32>
    %390 = arith.addf %389, %388 : vector<8x128xf32>
    %391 = arith.divf %389, %390 : vector<8x128xf32>
    %392 = vector.extract_strided_slice %385 {offsets = [0, 128], sizes = [8, 128], strides = [1, 1]} : vector<8x512xf32> to vector<8x128xf32>
    %393 = arith.negf %392 : vector<8x128xf32>
    %394 = math.exp %393 : vector<8x128xf32>
    %cst_88 = arith.constant 1.000000e+00 : f32
    %395 = vector.broadcast %cst_88 : f32 to vector<8x128xf32>
    %396 = arith.addf %395, %394 : vector<8x128xf32>
    %397 = arith.divf %395, %396 : vector<8x128xf32>
    %398 = vector.extract_strided_slice %385 {offsets = [0, 256], sizes = [8, 128], strides = [1, 1]} : vector<8x512xf32> to vector<8x128xf32>
    %399 = math.tanh %398 : vector<8x128xf32>
    %400 = vector.extract_strided_slice %385 {offsets = [0, 384], sizes = [8, 128], strides = [1, 1]} : vector<8x512xf32> to vector<8x128xf32>
    %401 = arith.negf %400 : vector<8x128xf32>
    %402 = math.exp %401 : vector<8x128xf32>
    %cst_89 = arith.constant 1.000000e+00 : f32
    %403 = vector.broadcast %cst_89 : f32 to vector<8x128xf32>
    %404 = arith.addf %403, %402 : vector<8x128xf32>
    %405 = arith.divf %403, %404 : vector<8x128xf32>
    %406 = arith.mulf %397, %351 : vector<8x128xf32>
    %407 = arith.mulf %391, %399 : vector<8x128xf32>
    %408 = arith.addf %406, %407 : vector<8x128xf32>
    %409 = math.tanh %408 : vector<8x128xf32>
    %410 = arith.mulf %405, %409 : vector<8x128xf32>
    %c48_90 = arith.constant 48 : index
    %c0_91 = arith.constant 0 : index
    %411 = vector.load %arg10[%c48_90, %c0_91] : memref<64x128xf32, #tpu.memory_space<vmem>>, vector<8x128xf32>
    tpu.vector_store %arg10[%c48_90, %c0_91], %410 {strides = array<i32>} : memref<64x128xf32, #tpu.memory_space<vmem>>, vector<8x128xf32>,
    %c56 = arith.constant 56 : index
    %c0_92 = arith.constant 0 : index
    %412 = vector.load %arg9[%c56, %c0_92] : memref<64x512xf32, #tpu.memory_space<vmem>>, vector<8x512xf32>
    %cst_93 = arith.constant dense<0.000000e+00> : vector<8x512xf32>
    %413 = tpu.matmul %382, %7, %cst_93 {dimension_numbers = #tpu.dot_dimension_numbers<[1], [0], [0], [1], [0, 0, 1, 1], [], []>} : vector<8x128xf32>, vector<128x512xf32>, vector<8x512xf32> -> vector<8x512xf32>
    %414 = arith.addf %412, %413 : vector<8x512xf32>
    %415 = vector.extract_strided_slice %414 {offsets = [0, 0], sizes = [8, 128], strides = [1, 1]} : vector<8x512xf32> to vector<8x128xf32>
    %416 = arith.negf %415 : vector<8x128xf32>
    %417 = math.exp %416 : vector<8x128xf32>
    %cst_94 = arith.constant 1.000000e+00 : f32
    %418 = vector.broadcast %cst_94 : f32 to vector<8x128xf32>
    %419 = arith.addf %418, %417 : vector<8x128xf32>
    %420 = arith.divf %418, %419 : vector<8x128xf32>
    %421 = vector.extract_strided_slice %414 {offsets = [0, 128], sizes = [8, 128], strides = [1, 1]} : vector<8x512xf32> to vector<8x128xf32>
    %422 = arith.negf %421 : vector<8x128xf32>
    %423 = math.exp %422 : vector<8x128xf32>
    %cst_95 = arith.constant 1.000000e+00 : f32
    %424 = vector.broadcast %cst_95 : f32 to vector<8x128xf32>
    %425 = arith.addf %424, %423 : vector<8x128xf32>
    %426 = arith.divf %424, %425 : vector<8x128xf32>
    %427 = vector.extract_strided_slice %414 {offsets = [0, 256], sizes = [8, 128], strides = [1, 1]} : vector<8x512xf32> to vector<8x128xf32>
    %428 = math.tanh %427 : vector<8x128xf32>
    %429 = vector.extract_strided_slice %414 {offsets = [0, 384], sizes = [8, 128], strides = [1, 1]} : vector<8x512xf32> to vector<8x128xf32>
    %430 = arith.negf %429 : vector<8x128xf32>
    %431 = math.exp %430 : vector<8x128xf32>
    %cst_96 = arith.constant 1.000000e+00 : f32
    %432 = vector.broadcast %cst_96 : f32 to vector<8x128xf32>
    %433 = arith.addf %432, %431 : vector<8x128xf32>
    %434 = arith.divf %432, %433 : vector<8x128xf32>
    %435 = arith.mulf %426, %380 : vector<8x128xf32>
    %436 = arith.mulf %420, %428 : vector<8x128xf32>
    %437 = arith.addf %435, %436 : vector<8x128xf32>
    %438 = math.tanh %437 : vector<8x128xf32>
    %439 = arith.mulf %434, %438 : vector<8x128xf32>
    %440 = tpu.concatenate %439, %410 in 1 : vector<8x128xf32>, vector<8x128xf32> -> vector<8x256xf32>
    %cst_97 = arith.constant dense<0.000000e+00> : vector<8x512xf32>
    %441 = tpu.matmul %440, %8, %cst_97 {dimension_numbers = #tpu.dot_dimension_numbers<[1], [0], [0], [1], [0, 0, 1, 1], [], []>} : vector<8x256xf32>, vector<256x512xf32>, vector<8x512xf32> -> vector<8x512xf32>
    %442 = arith.addf %441, %11 : vector<8x512xf32>
    %443 = vector.extract_strided_slice %442 {offsets = [0, 0], sizes = [8, 128], strides = [1, 1]} : vector<8x512xf32> to vector<8x128xf32>
    %444 = arith.negf %443 : vector<8x128xf32>
    %445 = math.exp %444 : vector<8x128xf32>
    %cst_98 = arith.constant 1.000000e+00 : f32
    %446 = vector.broadcast %cst_98 : f32 to vector<8x128xf32>
    %447 = arith.addf %446, %445 : vector<8x128xf32>
    %448 = arith.divf %446, %447 : vector<8x128xf32>
    %449 = vector.extract_strided_slice %442 {offsets = [0, 128], sizes = [8, 128], strides = [1, 1]} : vector<8x512xf32> to vector<8x128xf32>
    %450 = arith.negf %449 : vector<8x128xf32>
    %451 = math.exp %450 : vector<8x128xf32>
    %cst_99 = arith.constant 1.000000e+00 : f32
    %452 = vector.broadcast %cst_99 : f32 to vector<8x128xf32>
    %453 = arith.addf %452, %451 : vector<8x128xf32>
    %454 = arith.divf %452, %453 : vector<8x128xf32>
    %455 = vector.extract_strided_slice %442 {offsets = [0, 256], sizes = [8, 128], strides = [1, 1]} : vector<8x512xf32> to vector<8x128xf32>
    %456 = math.tanh %455 : vector<8x128xf32>
    %457 = vector.extract_strided_slice %442 {offsets = [0, 384], sizes = [8, 128], strides = [1, 1]} : vector<8x512xf32> to vector<8x128xf32>
    %458 = arith.negf %457 : vector<8x128xf32>
    %459 = math.exp %458 : vector<8x128xf32>
    %cst_100 = arith.constant 1.000000e+00 : f32
    %460 = vector.broadcast %cst_100 : f32 to vector<8x128xf32>
    %461 = arith.addf %460, %459 : vector<8x128xf32>
    %462 = arith.divf %460, %461 : vector<8x128xf32>
    %463 = arith.mulf %454, %408 : vector<8x128xf32>
    %464 = arith.mulf %448, %456 : vector<8x128xf32>
    %465 = arith.addf %463, %464 : vector<8x128xf32>
    %466 = math.tanh %465 : vector<8x128xf32>
    %467 = arith.mulf %462, %466 : vector<8x128xf32>
    %c56_101 = arith.constant 56 : index
    %c0_102 = arith.constant 0 : index
    %468 = vector.load %arg10[%c56_101, %c0_102] : memref<64x128xf32, #tpu.memory_space<vmem>>, vector<8x128xf32>
    tpu.vector_store %arg10[%c56_101, %c0_102], %467 {strides = array<i32>} : memref<64x128xf32, #tpu.memory_space<vmem>>, vector<8x128xf32>,
    %c0_103 = arith.constant 0 : index
    %c0_104 = arith.constant 0 : index
    %469 = vector.load %arg10[%c0_103, %c0_104] : memref<64x128xf32, #tpu.memory_space<vmem>>, vector<64x128xf32>
    %c0_105 = arith.constant 0 : index
    %c0_106 = arith.constant 0 : index
    %470 = vector.load %arg6[%c0_105, %c0_106] : memref<128x128xf32, #tpu.memory_space<vmem>>, vector<128x128xf32>
    %cst_107 = arith.constant dense<0.000000e+00> : vector<64x128xf32>
    %471 = tpu.matmul %469, %470, %cst_107 {dimension_numbers = #tpu.dot_dimension_numbers<[1], [0], [0], [1], [0, 0, 1, 1], [], []>} : vector<64x128xf32>, vector<128x128xf32>, vector<64x128xf32> -> vector<64x128xf32>
    %c0_108 = arith.constant 0 : index
    %c0_109 = arith.constant 0 : index
    %472 = vector.load %arg7[%c0_108, %c0_109] : memref<1x128xf32, #tpu.memory_space<vmem>>, vector<1x128xf32>
    %473 = vector.broadcast %472 : vector<1x128xf32> to vector<64x128xf32>
    %474 = arith.addf %471, %473 : vector<64x128xf32>
    %c0_110 = arith.constant 0 : index
    %c0_111 = arith.constant 0 : index
    %475 = vector.load %arg8[%c0_110, %c0_111] : memref<64x128xf32, #tpu.memory_space<vmem>>, vector<64x128xf32>
    tpu.vector_store %arg8[%c0_110, %c0_111], %474 {strides = array<i32>} : memref<64x128xf32, #tpu.memory_space<vmem>>, vector<64x128xf32>,
    return
  }
}

</mosaic_0001>

<bundles_post_ra>
// kernel: tpu_custom_call.1
= control target key start
LH: loop header
LB: loop body
LE: loop exit
PB: predicated region body
PF: predicated region fallthrough
CT: control target
= control target key end

     0   :  { %13 = vsyncpa [#allocation5], 0  ;;  %s7177_s0 = inlined_call_operand.hbm [shape: f32[64,128], index: 0, kind: input, shape index: {}]   ;;  %s7178_s1 = inlined_call_operand.hbm [shape: f32[128,512], index: 1, kind: input, shape index: {}]   ;;  %s7179_s2 = inlined_call_operand.hbm [shape: f32[128,512], index: 2, kind: input, shape index: {}]   ;;  %s7180_s3 = inlined_call_operand.vmem [shape: f32[1,512], index: 3, kind: input, shape index: {}]   ;;  %s7181_s4 = inlined_call_operand.hbm [shape: f32[256,512], index: 4, kind: input, shape index: {}]   ;;  %s7182_s5 = inlined_call_operand.vmem [shape: f32[1,512], index: 5, kind: input, shape index: {}]   ;;  %s7183_s6 = inlined_call_operand.hbm [shape: f32[128,128], index: 6, kind: input, shape index: {}]   ;;  %s7184_s7 = inlined_call_operand.vmem [shape: f32[1,128], index: 7, kind: input, shape index: {}]   ;;  %s7185_s8 = inlined_call_operand.hbm [shape: f32[64,128], index: 8, kind: output, shape index: {}]  }
   0x1   :  { %14 = vsyncpa [#allocation8], 0 }
   0x2   :  { %15 = vsyncpa [#allocation11], 0 }
   0x3   :  { %16 = vsyncpa [#allocation6], 0  ;;  %s5775_s27 = smov [#allocation7]   ;;  %s5635_s9 = scalar_lea.hbm %s7178_s1, 8192 }
   0x4   :  { %s34_s28 = sshll.u32 %s5775_s27, 4  ;;  %p5636_p0 = scmp.ne.s32.totalorder %s7178_s1, %s5635_s9  ;;  %s35_s28 = int_to_ptr.vmem [resolvable:$true] %s34_s28 }
   0x5   :  { %p5639_p1 = scmp.lt.u32.totalorder %s5635_s9, %s7178_s1 }
   0x7   :  { %p5641_p2 = pnand %p5639_p1, %p5636_p0 }
   0x9   :  { %5644 = shalt.err (!%p5641_p2)
}
   0xa   :  { %s5645_s14 = scalar_lea.vmem %s35_s28, 8192  ;;  %p5650_p4 = scmp.lt.s32.totalorder %s35_s28, %s35_s28 }
   0xb   :  { %p5646_p3 = scmp.ne.s32.totalorder %s35_s28, %s5645_s14  ;;  %p5651_p5 = scmp.lt.s32.totalorder %s5645_s14, %s5645_s14 }
   0xd   :  { %p5652_p6 = por %p5651_p5, %p5650_p4 }
   0xf   :  { %p5653_p7 = pnand %p5652_p6, %p5646_p3 }
  0x11   :  { %5656 = shalt.err (!%p5653_p7)
}
  0x12   :  { %s5776_s15 = smov 512   ;;  %s5777_s16 = smov 32  }
  0x13   :  { %40 = dma.hbm_to_vmem [thread:$0]  %s7178_s1, 8192, %s35_s28, [#allocation8], %s5776_s15, %s5776_s15, %s5777_s16  }
  0x14   :  { %s5778_s19 = smov [#allocation10]   ;;  %s5779_s21 = smov [#allocation4]  }
  0x15   :  { %s60_s20 = sshll.u32 %s5778_s19, 4  ;;  %s22_s22 = sshll.u32 %s5779_s21, 4  ;;  %s61_s20 = int_to_ptr.vmem [resolvable:$true] %s60_s20  ;;  %s23_s22 = int_to_ptr.vmem [resolvable:$true] %s22_s22 }
  0x16   :  { %s5657_s25 = scalar_lea.hbm %s7181_s4, 16384 }
  0x17   :  { %p5658_p8 = scmp.ne.s32.totalorder %s7181_s4, %s5657_s25  ;;  %p5661_p9 = scmp.lt.u32.totalorder %s5657_s25, %s7181_s4 }
  0x19   :  { %p5663_p10 = pnand %p5661_p9, %p5658_p8 }
  0x1b   :  { %5666 = shalt.err (!%p5663_p10)
}
  0x1c   :  { %s5667_s1 = scalar_lea.vmem %s61_s20, 16384  ;;  %p5672_p12 = scmp.lt.s32.totalorder %s61_s20, %s61_s20 }
  0x1d   :  { %p5668_p11 = scmp.ne.s32.totalorder %s61_s20, %s5667_s1  ;;  %p5673_p13 = scmp.lt.s32.totalorder %s5667_s1, %s5667_s1 }
  0x1f   :  { %p5674_p0 = por %p5673_p13, %p5672_p12 }
  0x21   :  { %p5675_p1 = pnand %p5674_p0, %p5668_p11 }
  0x23   :  { %5678 = shalt.err (!%p5675_p1)
}
  0x24   :  { %66 = dma.hbm_to_vmem [thread:$0]  %s7181_s4, 16384, %s61_s20, [#allocation11], %s5776_s15, %s5776_s15, %s5777_s16  }
  0x25   :  { %s5679_s12 = scalar_lea.hbm %s7177_s0, 1024 }
  0x26   :  { %p5680_p2 = scmp.ne.s32.totalorder %s7177_s0, %s5679_s12  ;;  %p5683_p3 = scmp.lt.u32.totalorder %s5679_s12, %s7177_s0 }
  0x28   :  { %p5685_p4 = pnand %p5683_p3, %p5680_p2 }
  0x2a   :  { %5688 = shalt.err (!%p5685_p4)
}
  0x2b   :  { %s5689_s19 = scalar_lea.vmem %s23_s22, 1024  ;;  %p5694_p6 = scmp.lt.s32.totalorder %s23_s22, %s23_s22 }
  0x2c   :  { %p5690_p5 = scmp.ne.s32.totalorder %s23_s22, %s5689_s19  ;;  %p5695_p7 = scmp.lt.s32.totalorder %s5689_s19, %s5689_s19 }
  0x2e   :  { %p5696_p8 = por %p5695_p7, %p5694_p6 }
  0x30   :  { %p5697_p9 = pnand %p5696_p8, %p5690_p5 }
  0x32   :  { %5700 = shalt.err (!%p5697_p9)
}
  0x33   :  { %s5780_s4 = smov 128   ;;  %s5781_s20 = smov 8  }
  0x34   :  { %28 = dma.hbm_to_vmem [thread:$0]  %s7177_s0, 1024, %s23_s22, [#allocation5], %s5780_s4, %s5780_s4, %s5781_s20  }
  0x35   :  { %s5782_s24 = smov [#allocation9]   ;;  %s5783_s26 = smov [#allocation12]  }
  0x36   :  { %s46_s25 = sshll.u32 %s5782_s24, 4  ;;  %s74_s27 = sshll.u32 %s5783_s26, 4  ;;  %s47_s25 = int_to_ptr.vmem [resolvable:$true] %s46_s25  ;;  %s75_s27 = int_to_ptr.vmem [resolvable:$true] %s74_s27 }
  0x37   :  { %s5701_s1 = scalar_lea.hbm %s7179_s2, 8192 }
  0x38   :  { %p5702_p10 = scmp.ne.s32.totalorder %s7179_s2, %s5701_s1  ;;  %p5705_p11 = scmp.lt.u32.totalorder %s5701_s1, %s7179_s2 }
  0x3a   :  { %p5707_p12 = pnand %p5705_p11, %p5702_p10 }
  0x3c   :  { %5710 = shalt.err (!%p5707_p12)
}
  0x3d   :  { %s5711_s0 = scalar_lea.vmem %s47_s25, 8192  ;;  %p5716_p0 = scmp.lt.s32.totalorder %s47_s25, %s47_s25 }
  0x3e   :  { %p5712_p13 = scmp.ne.s32.totalorder %s47_s25, %s5711_s0  ;;  %p5717_p1 = scmp.lt.s32.totalorder %s5711_s0, %s5711_s0 }
  0x40   :  { %p5718_p2 = por %p5717_p1, %p5716_p0 }
  0x42   :  { %p5719_p3 = pnand %p5718_p2, %p5712_p13 }
  0x44   :  { %5722 = shalt.err (!%p5719_p3)
}
  0x45   :  { %52 = dma.hbm_to_vmem [thread:$0]  %s7179_s2, 8192, %s47_s25, [#allocation8], %s5776_s15, %s5776_s15, %s5777_s16  }
  0x46   :  { %s5723_s17 = scalar_lea.hbm %s7183_s6, 2048 }
  0x47   :  { %p5724_p4 = scmp.ne.s32.totalorder %s7183_s6, %s5723_s17  ;;  %p5727_p5 = scmp.lt.u32.totalorder %s5723_s17, %s7183_s6 }
  0x49   :  { %p5729_p6 = pnand %p5727_p5, %p5724_p4 }
  0x4b   :  { %5732 = shalt.err (!%p5729_p6)
}
  0x4c   :  { %s5733_s24 = scalar_lea.vmem %s75_s27, 2048  ;;  %p5738_p8 = scmp.lt.s32.totalorder %s75_s27, %s75_s27 }
  0x4d   :  { %p5734_p7 = scmp.ne.s32.totalorder %s75_s27, %s5733_s24  ;;  %p5739_p9 = scmp.lt.s32.totalorder %s5733_s24, %s5733_s24 }
  0x4f   :  { %p5740_p10 = por %p5739_p9, %p5738_p8 }
  0x51   :  { %p5741_p11 = pnand %p5740_p10, %p5734_p7 }
  0x53   :  { %5744 = shalt.err (!%p5741_p11)
}
  0x54   :  { %80 = dma.hbm_to_vmem [thread:$0]  %s7183_s6, 2048, %s75_s27, [#allocation11], %s5780_s4, %s5780_s4, %s5781_s20  }
  0x55   :  { %5767 = dma.done.wait [#allocation5], 1024  }
  0x56   :  { %5768 = vsyncadd [#allocation5], 4294966272 }
  0x57   :  { %5769 = dma.done.wait [#allocation8], 16384  }
  0x58   :  { %5770 = vsyncadd [#allocation8], 4294950912 }
  0x59   :  { %5771 = dma.done.wait [#allocation11], 18432  }
  0x5a   :  { %5772 = vsyncadd [#allocation11], 4294948864  ;;  %v7186_v0 = vmov 0.0   ;;  %v107_v1 = vld [vmem:[#allocation7 + $0x8] sm:$0xff]  ;;  %v106_v3 = vld [vmem:[#allocation7] sm:$0xff] }
  0x5b   :  { %256 = vmatprep.mubr.f32.mxu1 %v7186_v0  ;;  %732 = vmatprep.mubr.f32.mxu0 %v7186_v0  ;;  %v111_v2 = vld [vmem:[#allocation7 + $0x28] sm:$0xff]  ;;  %v110_v5 = vld [vmem:[#allocation7 + $0x20] sm:$0xff] }
  0x5c   :  { %v3672_v4 = vpack.c.bf16 %v111_v2, %v107_v1  ;;  %v451_v6 = vld [vmem:[#allocation9 + $0x8] sm:$0xff]  ;;  %v3674_v8 = vpack.c.bf16 %v110_v5, %v106_v3  ;;  %v450_v10 = vld [vmem:[#allocation9] sm:$0xff] }
  0x5d   :  { %v455_v7 = vld [vmem:[#allocation9 + $0x28] sm:$0xff]  ;;  %v454_v11 = vld [vmem:[#allocation9 + $0x20] sm:$0xff] }
  0x5e   :  { %v5908_v9 = vpack.c.bf16 %v455_v7, %v451_v6  ;;  %v115_v12 = vld [vmem:[#allocation7 + $0x48] sm:$0xff]  ;;  %3673 = vmatprep.subr.bf16.mxu1 %v3672_v4  ;;  %v5910_v13 = vpack.c.bf16 %v454_v11, %v450_v10  ;;  %v114_v15 = vld [vmem:[#allocation7 + $0x40] sm:$0xff] }
  0x5f   :  { %v119_v14 = vld [vmem:[#allocation7 + $0x68] sm:$0xff]  ;;  %v118_v16 = vld [vmem:[#allocation7 + $0x60] sm:$0xff]  ;;  %3675 = vmatpush1.bf16.msra.mxu1 %v3674_v8 }
  0x60   :  { %7317 = vst [vmem:[#allocation18_spill] sm:$0xff] %v5908_v9  ;;  %3737 = vmatprep.subr.bf16.mxu0 %v5908_v9  ;;  %v3676_v17 = vpack.c.bf16 %v119_v14, %v115_v12  ;;  %v3678_v18 = vpack.c.bf16 %v118_v16, %v114_v15  ;;  %v459_v19 = vld [vmem:[#allocation9 + $0x48] sm:$0xff]  ;;  %v458_v21 = vld [vmem:[#allocation9 + $0x40] sm:$0xff] }
  0x61   :  { %v463_v20 = vld [vmem:[#allocation9 + $0x68] sm:$0xff]  ;;  %3739 = vmatpush1.bf16.msra.mxu0 %v5910_v13  ;;  %v462_v23 = vld [vmem:[#allocation9 + $0x60] sm:$0xff] }
  0x62   :  { %v5914_v22 = vpack.c.bf16 %v463_v20, %v459_v19  ;;  %v123_v24 = vld [vmem:[#allocation7 + $0x88] sm:$0xff]  ;;  %3677 = vmatprep.subr.bf16.mxu1 %v3676_v17  ;;  %v5916_v26 = vpack.c.bf16 %v462_v23, %v458_v21  ;;  %v122_v28 = vld [vmem:[#allocation7 + $0x80] sm:$0xff] }
  0x63   :  { %v127_v25 = vld [vmem:[#allocation7 + $0xa8] sm:$0xff]  ;;  %v126_v29 = vld [vmem:[#allocation7 + $0xa0] sm:$0xff]  ;;  %3679 = vmatpush1.bf16.msra.mxu1 %v3678_v18 }
  0x64   :  { %v3680_v27 = vpack.c.bf16 %v127_v25, %v123_v24  ;;  %v467_v30 = vld [vmem:[#allocation9 + $0x88] sm:$0xff]  ;;  %3741 = vmatprep.subr.bf16.mxu0 %v5914_v22  ;;  %v466_v32 = vld [vmem:[#allocation9 + $0x80] sm:$0xff]  ;;  %v3682_v34 = vpack.c.bf16 %v126_v29, %v122_v28 }
  0x65   :  { %v471_v31 = vld [vmem:[#allocation9 + $0xa8] sm:$0xff]  ;;  %v470_v33 = vld [vmem:[#allocation9 + $0xa0] sm:$0xff]  ;;  %3743 = vmatpush1.bf16.msra.mxu0 %v5916_v26 }
  0x66   :  { %v5919_v35 = vpack.c.bf16 %v471_v31, %v467_v30  ;;  %v131_v36 = vld [vmem:[#allocation7 + $0xc8] sm:$0xff]  ;;  %v130_v38 = vld [vmem:[#allocation7 + $0xc0] sm:$0xff]  ;;  %3681 = vmatprep.subr.bf16.mxu1 %v3680_v27  ;;  %v5922_v39 = vpack.c.bf16 %v470_v33, %v466_v32 }
  0x67   :  { %v135_v37 = vld [vmem:[#allocation7 + $0xe8] sm:$0xff]  ;;  %v134_v41 = vld [vmem:[#allocation7 + $0xe0] sm:$0xff]  ;;  %3683 = vmatpush1.bf16.msra.mxu1 %v3682_v34 }
  0x68   :  { %v3684_v40 = vpack.c.bf16 %v135_v37, %v131_v36  ;;  %v475_v42 = vld [vmem:[#allocation9 + $0xc8] sm:$0xff]  ;;  %3745 = vmatprep.subr.bf16.mxu0 %v5919_v35  ;;  %v474_v45 = vld [vmem:[#allocation9 + $0xc0] sm:$0xff]  ;;  %v3686_v49 = vpack.c.bf16 %v134_v41, %v130_v38  ;;  %v109_v37 = vld [vmem:[#allocation7 + $0x18] sm:$0xff] }
  0x69   :  { %v479_v43 = vld [vmem:[#allocation9 + $0xe8] sm:$0xff]  ;;  %v478_v46 = vld [vmem:[#allocation9 + $0xe0] sm:$0xff]  ;;  %3747 = vmatpush1.bf16.msra.mxu0 %v5922_v39  ;;  %v113_v38 = vld [vmem:[#allocation7 + $0x38] sm:$0xff] }
  0x6a   :  { %v5925_v44 = vpack.c.bf16 %v479_v43, %v475_v42  ;;  %v139_v47 = vld [vmem:[#allocation7 + $0x108] sm:$0xff]  ;;  %3685 = vmatprep.subr.bf16.mxu1 %v3684_v40  ;;  %v5928_v52 = vpack.c.bf16 %v478_v46, %v474_v45  ;;  %v138_v54 = vld [vmem:[#allocation7 + $0x100] sm:$0xff]  ;;  %v3704_v42 = vpack.c.bf16 %v113_v38, %v109_v37  ;;  %v108_v43 = vld [vmem:[#allocation7 + $0x10] sm:$0xff] }
  0x6b   :  { %v143_v48 = vld [vmem:[#allocation7 + $0x128] sm:$0xff]  ;;  %v142_v55 = vld [vmem:[#allocation7 + $0x120] sm:$0xff]  ;;  %3687 = vmatpush1.bf16.msra.mxu1 %v3686_v49  ;;  %v112_v45 = vld [vmem:[#allocation7 + $0x30] sm:$0xff] }
  0x6c   :  { %v483_v50 = vld [vmem:[#allocation9 + $0x108] sm:$0xff]  ;;  %v3688_v53 = vpack.c.bf16 %v143_v48, %v139_v47  ;;  %v482_v56 = vld [vmem:[#allocation9 + $0x100] sm:$0xff]  ;;  %3749 = vmatprep.subr.bf16.mxu0 %v5925_v44  ;;  %v3690_v63 = vpack.c.bf16 %v142_v55, %v138_v54  ;;  %v117_v46 = vld [vmem:[#allocation7 + $0x58] sm:$0xff]  ;;  %v3706_v49 = vpack.c.bf16 %v112_v45, %v108_v43 }
  0x6d   :  { %v487_v51 = vld [vmem:[#allocation9 + $0x128] sm:$0xff]  ;;  %v486_v58 = vld [vmem:[#allocation9 + $0x120] sm:$0xff]  ;;  %3751 = vmatpush1.bf16.msra.mxu0 %v5928_v52  ;;  %v121_v47 = vld [vmem:[#allocation7 + $0x78] sm:$0xff] }
  0x6e   :  { %v5931_v57 = vpack.c.bf16 %v487_v51, %v483_v50  ;;  %v147_v59 = vld [vmem:[#allocation7 + $0x148] sm:$0xff]  ;;  %3689 = vmatprep.subr.bf16.mxu1 %v3688_v53  ;;  %v5934_v1 = vpack.c.bf16 %v486_v58, %v482_v56  ;;  %v146_v3 = vld [vmem:[#allocation7 + $0x140] sm:$0xff]  ;;  %v3708_v50 = vpack.c.bf16 %v121_v47, %v117_v46  ;;  %v116_v51 = vld [vmem:[#allocation7 + $0x50] sm:$0xff] }
  0x6f   :  { %v151_v60 = vld [vmem:[#allocation7 + $0x168] sm:$0xff]  ;;  %v150_v4 = vld [vmem:[#allocation7 + $0x160] sm:$0xff]  ;;  %3691 = vmatpush1.bf16.msra.mxu1 %v3690_v63  ;;  %v120_v53 = vld [vmem:[#allocation7 + $0x70] sm:$0xff] }
  0x70   :  { %v491_v61 = vld [vmem:[#allocation9 + $0x148] sm:$0xff]  ;;  %v3692_v2 = vpack.c.bf16 %v151_v60, %v147_v59  ;;  %v490_v5 = vld [vmem:[#allocation9 + $0x140] sm:$0xff]  ;;  %3753 = vmatprep.subr.bf16.mxu0 %v5931_v57  ;;  %v3694_v14 = vpack.c.bf16 %v150_v4, %v146_v3  ;;  %v125_v54 = vld [vmem:[#allocation7 + $0x98] sm:$0xff]  ;;  %v3710_v58 = vpack.c.bf16 %v120_v53, %v116_v51 }
  0x71   :  { %v495_v62 = vld [vmem:[#allocation9 + $0x168] sm:$0xff]  ;;  %v494_v7 = vld [vmem:[#allocation9 + $0x160] sm:$0xff]  ;;  %3755 = vmatpush1.bf16.msra.mxu0 %v5934_v1  ;;  %v129_v55 = vld [vmem:[#allocation7 + $0xb8] sm:$0xff] }
  0x72   :  { %v5937_v6 = vpack.c.bf16 %v495_v62, %v491_v61  ;;  %v155_v8 = vld [vmem:[#allocation7 + $0x188] sm:$0xff]  ;;  %3693 = vmatprep.subr.bf16.mxu1 %v3692_v2  ;;  %v5940_v15 = vpack.c.bf16 %v494_v7, %v490_v5  ;;  %v154_v17 = vld [vmem:[#allocation7 + $0x180] sm:$0xff]  ;;  %v3712_v59 = vpack.c.bf16 %v129_v55, %v125_v54  ;;  %v124_v60 = vld [vmem:[#allocation7 + $0x90] sm:$0xff] }
  0x73   :  { %v159_v10 = vld [vmem:[#allocation7 + $0x1a8] sm:$0xff]  ;;  %v158_v18 = vld [vmem:[#allocation7 + $0x1a0] sm:$0xff]  ;;  %3695 = vmatpush1.bf16.msra.mxu1 %v3694_v14  ;;  %v128_v61 = vld [vmem:[#allocation7 + $0xb0] sm:$0xff] }
  0x74   :  { %v499_v11 = vld [vmem:[#allocation9 + $0x188] sm:$0xff]  ;;  %v3696_v16 = vpack.c.bf16 %v159_v10, %v155_v8  ;;  %v498_v19 = vld [vmem:[#allocation9 + $0x180] sm:$0xff]  ;;  %3757 = vmatprep.subr.bf16.mxu0 %v5937_v6  ;;  %v3698_v28 = vpack.c.bf16 %v158_v18, %v154_v17  ;;  %v133_v62 = vld [vmem:[#allocation7 + $0xd8] sm:$0xff]  ;;  %v3714_v3 = vpack.c.bf16 %v128_v61, %v124_v60 }
  0x75   :  { %v503_v12 = vld [vmem:[#allocation9 + $0x1a8] sm:$0xff]  ;;  %v502_v21 = vld [vmem:[#allocation9 + $0x1a0] sm:$0xff]  ;;  %3759 = vmatpush1.bf16.msra.mxu0 %v5940_v15  ;;  %v137_v63 = vld [vmem:[#allocation7 + $0xf8] sm:$0xff] }
  0x76   :  { %v5943_v20 = vpack.c.bf16 %v503_v12, %v499_v11  ;;  %v163_v23 = vld [vmem:[#allocation7 + $0x1c8] sm:$0xff]  ;;  %3697 = vmatprep.subr.bf16.mxu1 %v3696_v16  ;;  %v5946_v29 = vpack.c.bf16 %v502_v21, %v498_v19  ;;  %v162_v31 = vld [vmem:[#allocation7 + $0x1c0] sm:$0xff]  ;;  %v5966_v2 = vld [vmem:[#allocation4 + $0x10] sm:$0xff]  ;;  %v3716_v4 = vpack.c.bf16 %v137_v63, %v133_v62 }
  0x77   :  { %v167_v24 = vld [vmem:[#allocation7 + $0x1e8] sm:$0xff]  ;;  %v166_v32 = vld [vmem:[#allocation7 + $0x1e0] sm:$0xff]  ;;  %3699 = vmatpush1.bf16.msra.mxu1 %v3698_v28  ;;  %v132_v5 = vld [vmem:[#allocation7 + $0xd0] sm:$0xff] }
  0x78   :  { %v507_v25 = vld [vmem:[#allocation9 + $0x1c8] sm:$0xff]  ;;  %v3700_v30 = vpack.c.bf16 %v167_v24, %v163_v23  ;;  %v506_v33 = vld [vmem:[#allocation9 + $0x1c0] sm:$0xff]  ;;  %3761 = vmatprep.subr.bf16.mxu0 %v5943_v20  ;;  %v3702_v40 = vpack.c.bf16 %v166_v32, %v162_v31  ;;  %v136_v7 = vld [vmem:[#allocation7 + $0xf0] sm:$0xff] }
  0x79   :  { %v511_v27 = vld [vmem:[#allocation9 + $0x1e8] sm:$0xff]  ;;  %v510_v36 = vld [vmem:[#allocation9 + $0x1e0] sm:$0xff]  ;;  %3763 = vmatpush1.bf16.msra.mxu0 %v5946_v29  ;;  %v141_v8 = vld [vmem:[#allocation7 + $0x118] sm:$0xff]  ;;  %v3718_v12 = vpack.c.bf16 %v136_v7, %v132_v5 }
  0x7a   :  { %v5949_v34 = vpack.c.bf16 %v511_v27, %v507_v25  ;;  %3701 = vmatprep.subr.bf16.mxu1 %v3700_v30  ;;  %v5952_v41 = vpack.c.bf16 %v510_v36, %v506_v33  ;;  %v5955_v48 = vld [vmem:[#allocation4] sm:$0xff]  ;;  %v5960_v56 = vld [vmem:[#allocation4 + $0x8] sm:$0xff]  ;;  %v145_v10 = vld [vmem:[#allocation7 + $0x138] sm:$0xff] }
  0x7b   :  { %3703 = vmatpush1.bf16.msra.mxu1 %v3702_v40  ;;  %v5970_v11 = vld [vmem:[#allocation4 + $0x18] sm:$0xff]  ;;  %v3720_v14 = vpack.c.bf16 %v145_v10, %v141_v8  ;;  %v140_v16 = vld [vmem:[#allocation7 + $0x110] sm:$0xff]  ;;  %v5974_v21 = vld [vmem:[#allocation4 + $0x20] sm:$0xff] }
  0x7c   :  { %3765 = vmatprep.subr.bf16.mxu0 %v5949_v34  ;;  %3705 = vmatprep.subr.bf16.mxu1 %v3704_v42  ;;  %v144_v17 = vld [vmem:[#allocation7 + $0x130] sm:$0xff]  ;;  %v149_v18 = vld [vmem:[#allocation7 + $0x158] sm:$0xff]  ;;  %v5978_v31 = vld [vmem:[#allocation4 + $0x28] sm:$0xff] }
  0x7d   :  { %3767 = vmatpush1.bf16.msra.mxu0 %v5952_v41  ;;  %v153_v19 = vld [vmem:[#allocation7 + $0x178] sm:$0xff]  ;;  %v3722_v23 = vpack.c.bf16 %v144_v17, %v140_v16  ;;  %v148_v25 = vld [vmem:[#allocation7 + $0x150] sm:$0xff] }
  0x7e   :  { %257 = vmatmul.mubr.f32.vlgmr.msra.gmra.mrb[0].mxu1 %v5955_v48  ;;  %v3724_v24 = vpack.c.bf16 %v153_v19, %v149_v18  ;;  %v152_v27 = vld [vmem:[#allocation7 + $0x170] sm:$0xff]  ;;  %v157_v28 = vld [vmem:[#allocation7 + $0x198] sm:$0xff] }
  0x7f   :  { %3707 = vmatpush1.bf16.msra.mxu1 %v3706_v49  ;;  %262 = vmatprep.mubr.f32.mxu1 %v7186_v0  ;;  %v161_v30 = vld [vmem:[#allocation7 + $0x1b8] sm:$0xff]  ;;  %v3726_v32 = vpack.c.bf16 %v152_v27, %v148_v25  ;;  %v156_v36 = vld [vmem:[#allocation7 + $0x190] sm:$0xff] }
  0x80   :  { %733 = vmatmul.mubr.f32.vlgmr.msra.gmra.mrb[0].mxu0 %v7186_v0  ;;  %3709 = vmatprep.subr.bf16.mxu1 %v3708_v50  ;;  %v3728_v33 = vpack.c.bf16 %v161_v30, %v157_v28  ;;  %v160_v37 = vld [vmem:[#allocation7 + $0x1b0] sm:$0xff]  ;;  %v165_v38 = vld [vmem:[#allocation7 + $0x1d8] sm:$0xff] }
  0x81   :  { %902 = vmatprep.mubr.f32.mxu0 %v7186_v0  ;;  %v169_v40 = vld [vmem:[#allocation7 + $0x1f8] sm:$0xff]  ;;  %v5982_v42 = vld [vmem:[#allocation4 + $0x30] sm:$0xff]  ;;  %v3730_v43 = vpack.c.bf16 %v160_v37, %v156_v36 }
  0x82   :  { %263 = vmatmul.mubr.f32.gmra.mrb[2].mxu1 %v5960_v56  ;;  %v3732_v45 = vpack.c.bf16 %v169_v40, %v165_v38  ;;  %v164_v46 = vld [vmem:[#allocation7 + $0x1d0] sm:$0xff]  ;;  %v453_v49 = vld [vmem:[#allocation9 + $0x18] sm:$0xff] }
  0x83   :  { %3711 = vmatpush1.bf16.msra.mxu1 %v3710_v58  ;;  %268 = vmatprep.mubr.f32.mxu1 %v7186_v0  ;;  %v168_v47 = vld [vmem:[#allocation7 + $0x1f0] sm:$0xff]  ;;  %v457_v50 = vld [vmem:[#allocation9 + $0x38] sm:$0xff] }
  0x84   :  { %3713 = vmatprep.subr.bf16.mxu1 %v3712_v59  ;;  %v5986_v51 = vld [vmem:[#allocation4 + $0x38] sm:$0xff]  ;;  %v3734_v53 = vpack.c.bf16 %v168_v47, %v164_v46  ;;  %v5988_v54 = vpack.c.bf16 %v457_v50, %v453_v49  ;;  %v452_v55 = vld [vmem:[#allocation9 + $0x10] sm:$0xff] }
  0x85   :  { %v456_v58 = vld [vmem:[#allocation9 + $0x30] sm:$0xff]  ;;  %v461_v59 = vld [vmem:[#allocation9 + $0x58] sm:$0xff] }
  0x86   :  { %269 = vmatmul.mubr.f32.gmra.mrb[4].mxu1 %v5966_v2  ;;  %7318 = vst [vmem:[#allocation19_spill] sm:$0xff] %v5988_v54  ;;  %v465_v60 = vld [vmem:[#allocation9 + $0x78] sm:$0xff]  ;;  %v5992_v61 = vpack.c.bf16 %v456_v58, %v452_v55  ;;  %v460_v63 = vld [vmem:[#allocation9 + $0x50] sm:$0xff] }
  0x87   :  { %3715 = vmatpush1.bf16.msra.mxu1 %v3714_v3  ;;  %274 = vmatprep.mubr.f32.mxu1 %v7186_v0  ;;  %v5995_v62 = vpack.c.bf16 %v465_v60, %v461_v59  ;;  %v464_v3 = vld [vmem:[#allocation9 + $0x70] sm:$0xff]  ;;  %v473_v5 = vld [vmem:[#allocation9 + $0xb8] sm:$0xff] }
  0x88   :  { %3717 = vmatprep.subr.bf16.mxu1 %v3716_v4  ;;  %v469_v4 = vld [vmem:[#allocation9 + $0x98] sm:$0xff]  ;;  %v6000_v7 = vpack.c.bf16 %v464_v3, %v460_v63  ;;  %v468_v10 = vld [vmem:[#allocation9 + $0x90] sm:$0xff]  ;;  %v514_v3 = vld [vmem:[#allocation10] sm:$0xff] }
  0x89   :  { %v6003_v8 = vpack.c.bf16 %v473_v5, %v469_v4  ;;  %v481_v16 = vld [vmem:[#allocation9 + $0xf8] sm:$0xff]  ;;  %v476_v18 = vld [vmem:[#allocation9 + $0xd0] sm:$0xff]  ;;  %v518_v4 = vld [vmem:[#allocation10 + $0x20] sm:$0xff] }
  0x8a   :  { %275 = vmatmul.mubr.f32.gmra.mrb[6].mxu1 %v5970_v11  ;;  %v480_v19 = vld [vmem:[#allocation9 + $0xf0] sm:$0xff]  ;;  %v493_v30 = vld [vmem:[#allocation9 + $0x158] sm:$0xff] }
  0x8b   :  { %3719 = vmatpush1.bf16.msra.mxu1 %v3718_v12  ;;  %280 = vmatprep.mubr.f32.mxu1 %v7186_v0  ;;  %v472_v12 = vld [vmem:[#allocation9 + $0xb0] sm:$0xff]  ;;  %v501_v38 = vld [vmem:[#allocation9 + $0x198] sm:$0xff] }
  0x8c   :  { %3721 = vmatprep.subr.bf16.mxu1 %v3720_v14  ;;  %v477_v14 = vld [vmem:[#allocation9 + $0xd8] sm:$0xff]  ;;  %v484_v27 = vld [vmem:[#allocation9 + $0x110] sm:$0xff] }
  0x8d   :  { %v6011_v17 = vpack.c.bf16 %v481_v16, %v477_v14  ;;  %v488_v28 = vld [vmem:[#allocation9 + $0x130] sm:$0xff]  ;;  %v505_v40 = vld [vmem:[#allocation9 + $0x1b8] sm:$0xff]  ;;  %v523_v16 = vld [vmem:[#allocation10 + $0x48] sm:$0xff] }
  0x8e   :  { %281 = vmatmul.mubr.f32.gmra.mrb[8].mxu1 %v5974_v21  ;;  %v492_v36 = vld [vmem:[#allocation9 + $0x150] sm:$0xff]  ;;  %v509_v47 = vld [vmem:[#allocation9 + $0x1d8] sm:$0xff] }
  0x8f   :  { %3723 = vmatpush1.bf16.msra.mxu1 %v3722_v23  ;;  %286 = vmatprep.mubr.f32.mxu1 %v7186_v0  ;;  %v485_v23 = vld [vmem:[#allocation9 + $0x118] sm:$0xff]  ;;  %v496_v37 = vld [vmem:[#allocation9 + $0x170] sm:$0xff] }
  0x90   :  { %3725 = vmatprep.subr.bf16.mxu1 %v3724_v24  ;;  %v489_v24 = vld [vmem:[#allocation9 + $0x138] sm:$0xff]  ;;  %v504_v46 = vld [vmem:[#allocation9 + $0x1b0] sm:$0xff] }
  0x91   :  { %v6019_v25 = vpack.c.bf16 %v489_v24, %v485_v23  ;;  %v513_v49 = vld [vmem:[#allocation9 + $0x1f8] sm:$0xff]  ;;  %v512_v55 = vld [vmem:[#allocation9 + $0x1f0] sm:$0xff] }
  0x92   :  { %287 = vmatmul.mubr.f32.gmra.mrb[10].mxu1 %v5978_v31  ;;  %v6043_v50 = vpack.c.bf16 %v513_v49, %v509_v47  ;;  %v517_v59 = vld [vmem:[#allocation10 + $0x18] sm:$0xff] }
  0x93   :  { %3727 = vmatpush1.bf16.msra.mxu1 %v3726_v32  ;;  %292 = vmatprep.mubr.f32.mxu1 %v7186_v0  ;;  %v497_v32 = vld [vmem:[#allocation9 + $0x178] sm:$0xff] }
  0x94   :  { %3729 = vmatprep.subr.bf16.mxu1 %v3728_v33  ;;  %v6027_v33 = vpack.c.bf16 %v497_v32, %v493_v30  ;;  %v521_v63 = vld [vmem:[#allocation10 + $0x38] sm:$0xff] }
  0x95   :  { %v6058_v5 = vpack.c.bf16 %v521_v63, %v517_v59  ;;  %v529_v24 = vld [vmem:[#allocation10 + $0x78] sm:$0xff]  ;;  %v536_v63 = vld [vmem:[#allocation10 + $0xb0] sm:$0xff] }
  0x96   :  { %293 = vmatmul.mubr.f32.gmra.mrb[12].mxu1 %v5982_v42  ;;  %v537_v47 = vld [vmem:[#allocation10 + $0xb8] sm:$0xff] }
  0x97   :  { %3731 = vmatpush1.bf16.msra.mxu1 %v3730_v43  ;;  %298 = vmatprep.mubr.f32.mxu1 %v7186_v0  ;;  %v6035_v43 = vpack.c.bf16 %v505_v40, %v501_v38  ;;  %v531_v38 = vld [vmem:[#allocation10 + $0x88] sm:$0xff] }
  0x98   :  { %3733 = vmatprep.subr.bf16.mxu1 %v3732_v45  ;;  %v500_v45 = vld [vmem:[#allocation9 + $0x190] sm:$0xff] }
  0x9a   :  { %299 = vmatmul.mubr.f32.gmra.mrb[14].mxu1 %v5986_v51 }
  0x9b   :  { %3735 = vmatpush1.bf16.msra.mxu1 %v3734_v53  ;;  %369 = vmatprep.mubr.f32.mxu1 %v7186_v0  ;;  %v508_v53 = vld [vmem:[#allocation9 + $0x1d0] sm:$0xff] }
  0x9c   :  { %3769 = vmatprep.subr.bf16.mxu1 %v5988_v54  ;;  %v6048_v58 = vpack.c.bf16 %v512_v55, %v508_v53  ;;  %v530_v55 = vld [vmem:[#allocation10 + $0x80] sm:$0xff] }
  0x9e   :  { %370 = vmatmul.mubr.f32.vlgmr.msra.gmra.mrb[16].mxu1 %v5955_v48  ;;  %v6008_v48 = vpack.c.bf16 %v472_v12, %v468_v10  ;;  %v6060_v10 = vpack.c.bf16 %v518_v4, %v514_v3  ;;  %v520_v12 = vld [vmem:[#allocation10 + $0x30] sm:$0xff]  ;;  %v539_v3 = vld [vmem:[#allocation10 + $0xc8] sm:$0xff] }
  0x9f   :  { %3771 = vmatpush1.bf16.msra.mxu1 %v5992_v61  ;;  %375 = vmatprep.mubr.f32.mxu1 %v7186_v0  ;;  %v543_v4 = vld [vmem:[#allocation10 + $0xe8] sm:$0xff] }
  0xa0   :  { %3773 = vmatprep.subr.bf16.mxu1 %v5995_v62 }
  0xa2   :  { %376 = vmatmul.mubr.f32.gmra.mrb[18].mxu1 %v5960_v56  ;;  %v6016_v56 = vpack.c.bf16 %v480_v19, %v476_v18  ;;  %v527_v18 = vld [vmem:[#allocation10 + $0x68] sm:$0xff]  ;;  %v525_v19 = vld [vmem:[#allocation10 + $0x58] sm:$0xff] }
  0xa3   :  { %3775 = vmatpush1.bf16.msra.mxu1 %v6000_v7  ;;  %381 = vmatprep.mubr.f32.mxu1 %v7186_v0  ;;  %v6068_v23 = vpack.c.bf16 %v527_v18, %v523_v16  ;;  %v6070_v30 = vpack.c.bf16 %v529_v24, %v525_v19  ;;  %v541_v16 = vld [vmem:[#allocation10 + $0xd8] sm:$0xff]  ;;  %v538_v19 = vld [vmem:[#allocation10 + $0xc0] sm:$0xff] }
  0xa4   :  { %3777 = vmatprep.subr.bf16.mxu1 %v6003_v8  ;;  %v545_v18 = vld [vmem:[#allocation10 + $0xf8] sm:$0xff] }
  0xa5   :  { %v6092_v24 = vpack.c.bf16 %v545_v18, %v541_v16  ;;  %v552_v16 = vld [vmem:[#allocation10 + $0x130] sm:$0xff]  ;;  %v555_v18 = vld [vmem:[#allocation10 + $0x148] sm:$0xff] }
  0xa6   :  { %382 = vmatmul.mubr.f32.gmra.mrb[20].mxu1 %v5966_v2  ;;  %v6024_v2 = vpack.c.bf16 %v488_v28, %v484_v27  ;;  %v522_v27 = vld [vmem:[#allocation10 + $0x40] sm:$0xff] }
  0xa7   :  { %3779 = vmatpush1.bf16.msra.mxu1 %v6008_v48  ;;  %387 = vmatprep.mubr.f32.mxu1 %v7186_v0  ;;  %v526_v28 = vld [vmem:[#allocation10 + $0x60] sm:$0xff]  ;;  %7323 = vst [vmem:[#allocation24_spill] sm:$0xff] %v6092_v24 }
  0xa8   :  { %3781 = vmatprep.subr.bf16.mxu1 %v6011_v17  ;;  %v6072_v32 = vpack.c.bf16 %v526_v28, %v522_v27  ;;  %v542_v27 = vld [vmem:[#allocation10 + $0xe0] sm:$0xff]  ;;  %v540_v28 = vld [vmem:[#allocation10 + $0xd0] sm:$0xff] }
  0xaa   :  { %388 = vmatmul.mubr.f32.gmra.mrb[22].mxu1 %v5970_v11  ;;  %v6032_v11 = vpack.c.bf16 %v496_v37, %v492_v36  ;;  %v524_v36 = vld [vmem:[#allocation10 + $0x50] sm:$0xff] }
  0xab   :  { %3783 = vmatpush1.bf16.msra.mxu1 %v6016_v56  ;;  %393 = vmatprep.mubr.f32.mxu1 %v7186_v0  ;;  %v528_v37 = vld [vmem:[#allocation10 + $0x70] sm:$0xff] }
  0xac   :  { %3785 = vmatprep.subr.bf16.mxu1 %v6019_v25  ;;  %v6075_v40 = vpack.c.bf16 %v528_v37, %v524_v36  ;;  %v544_v36 = vld [vmem:[#allocation10 + $0xf0] sm:$0xff]  ;;  %v6095_v37 = vpack.c.bf16 %v542_v27, %v538_v19  ;;  %v559_v19 = vld [vmem:[#allocation10 + $0x168] sm:$0xff]  ;;  %v557_v27 = vld [vmem:[#allocation10 + $0x158] sm:$0xff] }
  0xae   :  { %394 = vmatmul.mubr.f32.gmra.mrb[24].mxu1 %v5974_v21  ;;  %v6040_v21 = vpack.c.bf16 %v504_v46, %v500_v45  ;;  %v535_v45 = vld [vmem:[#allocation10 + $0xa8] sm:$0xff]  ;;  %v533_v46 = vld [vmem:[#allocation10 + $0x98] sm:$0xff]  ;;  %7324 = vst [vmem:[#allocation25_spill] sm:$0xff] %v6095_v37 }
  0xaf   :  { %3787 = vmatpush1.bf16.msra.mxu1 %v6024_v2  ;;  %399 = vmatprep.mubr.f32.mxu1 %v7186_v0  ;;  %v6079_v49 = vpack.c.bf16 %v535_v45, %v531_v38  ;;  %v6081_v53 = vpack.c.bf16 %v537_v47, %v533_v46  ;;  %v547_v38 = vld [vmem:[#allocation10 + $0x108] sm:$0xff]  ;;  %v549_v46 = vld [vmem:[#allocation10 + $0x118] sm:$0xff]  ;;  %v6099_v47 = vpack.c.bf16 %v544_v36, %v540_v28 }
  0xb0   :  { %3789 = vmatprep.subr.bf16.mxu1 %v6027_v33  ;;  %v551_v45 = vld [vmem:[#allocation10 + $0x128] sm:$0xff]  ;;  %v6113_v36 = vpack.c.bf16 %v559_v19, %v555_v18  ;;  %v562_v18 = vld [vmem:[#allocation10 + $0x180] sm:$0xff]  ;;  %v564_v19 = vld [vmem:[#allocation10 + $0x190] sm:$0xff] }
  0xb1   :  { %7319 = vst [vmem:[#allocation20_spill] sm:$0xff] %v6081_v53  ;;  %7325 = vst [vmem:[#allocation26_spill] sm:$0xff] %v6099_v47 }
  0xb2   :  { %400 = vmatmul.mubr.f32.gmra.mrb[26].mxu1 %v5978_v31  ;;  %v515_v31 = vld [vmem:[#allocation10 + $0x8] sm:$0xff]  ;;  %7330 = vst [vmem:[#allocation31_spill] sm:$0xff] %v6113_v36 }
  0xb3   :  { %3791 = vmatpush1.bf16.msra.mxu1 %v6032_v11  ;;  %405 = vmatprep.mubr.f32.mxu1 %v7186_v0 }
  0xb4   :  { %3793 = vmatprep.subr.bf16.mxu1 %v6035_v43 }
  0xb6   :  { %406 = vmatmul.mubr.f32.gmra.mrb[28].mxu1 %v5982_v42  ;;  %v519_v42 = vld [vmem:[#allocation10 + $0x28] sm:$0xff] }
  0xb7   :  { %3795 = vmatpush1.bf16.msra.mxu1 %v6040_v21  ;;  %411 = vmatprep.mubr.f32.mxu1 %v7186_v0  ;;  %v6056_v60 = vpack.c.bf16 %v519_v42, %v515_v31  ;;  %v534_v31 = vld [vmem:[#allocation10 + $0xa0] sm:$0xff]  ;;  %v532_v42 = vld [vmem:[#allocation10 + $0x90] sm:$0xff] }
  0xb8   :  { %3797 = vmatprep.subr.bf16.mxu1 %v6043_v50  ;;  %v6084_v59 = vpack.c.bf16 %v534_v31, %v530_v55  ;;  %v6101_v55 = vpack.c.bf16 %v551_v45, %v547_v38  ;;  %v553_v31 = vld [vmem:[#allocation10 + $0x138] sm:$0xff]  ;;  %v554_v38 = vld [vmem:[#allocation10 + $0x140] sm:$0xff] }
  0xb9   :  { %3801 = vmatprep.subr.bf16.mxu0 %v6056_v60  ;;  %v558_v45 = vld [vmem:[#allocation10 + $0x160] sm:$0xff] }
  0xba   :  { %412 = vmatmul.mubr.f32.gmra.mrb[30].mxu1 %v5986_v51  ;;  %v516_v51 = vld [vmem:[#allocation10 + $0x10] sm:$0xff]  ;;  %3803 = vmatpush1.bf16.msra.mxu0 %v6060_v10  ;;  %7320 = vst [vmem:[#allocation21_spill] sm:$0xff] %v6084_v59  ;;  %7326 = vst [vmem:[#allocation27_spill] sm:$0xff] %v6101_v55 }
  0xbb   :  { %3799 = vmatpush1.bf16.msra.mxu1 %v6048_v58  ;;  %803 = vmatprep.mubr.f32.mxu1 %v7186_v0  ;;  %v6063_v14 = vpack.c.bf16 %v520_v12, %v516_v51  ;;  %v6088_v51 = vpack.c.bf16 %v536_v63, %v532_v42  ;;  %v6090_v12 = vpack.c.bf16 %v543_v4, %v539_v3  ;;  %v546_v42 = vld [vmem:[#allocation10 + $0x100] sm:$0xff]  ;;  %v548_v4 = vld [vmem:[#allocation10 + $0x110] sm:$0xff] }
  0xbc   :  { %3865 = vmatprep.subr.bf16.mxu1 %v6058_v5  ;;  %3805 = vmatprep.subr.bf16.mxu0 %v6068_v23  ;;  %v550_v63 = vld [vmem:[#allocation10 + $0x120] sm:$0xff]  ;;  %v6104_v3 = vpack.c.bf16 %v553_v31, %v549_v46  ;;  %v6111_v28 = vpack.c.bf16 %v552_v16, %v548_v4  ;;  %v556_v46 = vld [vmem:[#allocation10 + $0x150] sm:$0xff] }
  0xbd   :  { %7321 = vst [vmem:[#allocation22_spill] sm:$0xff] %v6088_v51  ;;  %7322 = vst [vmem:[#allocation23_spill] sm:$0xff] %v6090_v12 }
  0xbe   :  { %804 = vmatmul.mubr.f32.vlgmr.msra.gmra.mrb[16].mxu1 %v7186_v0  ;;  %3807 = vmatpush1.bf16.msra.mxu0 %v6072_v32  ;;  %7327 = vst [vmem:[#allocation28_spill] sm:$0xff] %v6104_v3  ;;  %7329 = vst [vmem:[#allocation30_spill] sm:$0xff] %v6111_v28 }
  0xbf   :  { %973 = vmatprep.mubr.f32.mxu1 %v7186_v0  ;;  %3867 = vmatpush1.bf16.msra.mxu1 %v6063_v14  ;;  %v561_v0 = vld [vmem:[#allocation10 + $0x178] sm:$0xff] }
  0xc0   :  { %3869 = vmatprep.subr.bf16.mxu1 %v6070_v30  ;;  %3809 = vmatprep.subr.bf16.mxu0 %v6079_v49  ;;  %v6116_v31 = vpack.c.bf16 %v561_v0, %v557_v27  ;;  %v566_v0 = vld [vmem:[#allocation10 + $0x1a0] sm:$0xff] }
  0xc2   :  { %3811 = vmatpush1.bf16.msra.mxu0 %v6084_v59  ;;  %7331 = vst [vmem:[#allocation32_spill] sm:$0xff] %v6116_v31 }
  0xc3   :  { %3871 = vmatpush1.bf16.msra.mxu1 %v6075_v40  ;;  %3813 = vmatprep.subr.bf16.mxu0 %v6090_v12  ;;  %v6107_v12 = vpack.c.bf16 %v550_v63, %v546_v42  ;;  %v565_v42 = vld [vmem:[#allocation10 + $0x198] sm:$0xff] }
  0xc4   :  { %3873 = vmatprep.subr.bf16.mxu1 %v6081_v53  ;;  %v569_v63 = vld [vmem:[#allocation10 + $0x1b8] sm:$0xff] }
  0xc5   :  { %7328 = vst [vmem:[#allocation29_spill] sm:$0xff] %v6107_v12  ;;  %v6128_v27 = vpack.c.bf16 %v569_v63, %v565_v42  ;;  %v572_v42 = vld [vmem:[#allocation10 + $0x1d0] sm:$0xff] }
  0xc6   :  { %3815 = vmatpush1.bf16.msra.mxu0 %v6095_v37  ;;  %v567_v37 = vld [vmem:[#allocation10 + $0x1a8] sm:$0xff] }
  0xc7   :  { %3875 = vmatpush1.bf16.msra.mxu1 %v6088_v51  ;;  %3817 = vmatprep.subr.bf16.mxu0 %v6101_v55  ;;  %v563_v51 = vld [vmem:[#allocation10 + $0x188] sm:$0xff]  ;;  %7335 = vst [vmem:[#allocation36_spill] sm:$0xff] %v6128_v27 }
  0xc8   :  { %3877 = vmatprep.subr.bf16.mxu1 %v6092_v24  ;;  %v560_v24 = vld [vmem:[#allocation10 + $0x170] sm:$0xff]  ;;  %v6125_v16 = vpack.c.bf16 %v567_v37, %v563_v51  ;;  %v571_v55 = vld [vmem:[#allocation10 + $0x1c8] sm:$0xff]  ;;  %v570_v37 = vld [vmem:[#allocation10 + $0x1c0] sm:$0xff] }
  0xc9   :  { %v6123_v4 = vpack.c.bf16 %v560_v24, %v556_v46  ;;  %v574_v46 = vld [vmem:[#allocation10 + $0x1e0] sm:$0xff] }
  0xca   :  { %3819 = vmatpush1.bf16.msra.mxu0 %v6107_v12  ;;  %7334 = vst [vmem:[#allocation35_spill] sm:$0xff] %v6125_v16  ;;  %v575_v12 = vld [vmem:[#allocation10 + $0x1e8] sm:$0xff] }
  0xcb   :  { %3879 = vmatpush1.bf16.msra.mxu1 %v6099_v47  ;;  %v6119_v47 = vpack.c.bf16 %v558_v45, %v554_v38  ;;  %3821 = vmatprep.subr.bf16.mxu0 %v6113_v36  ;;  %7333 = vst [vmem:[#allocation34_spill] sm:$0xff] %v6123_v4  ;;  %v573_v38 = vld [vmem:[#allocation10 + $0x1d8] sm:$0xff]  ;;  %v6137_v24 = vpack.c.bf16 %v575_v12, %v571_v55  ;;  %v579_v36 = vld [vmem:[#allocation10 + $0x208] sm:$0xff] }
  0xcc   :  { %3881 = vmatprep.subr.bf16.mxu1 %v6104_v3  ;;  %v568_v3 = vld [vmem:[#allocation10 + $0x1b0] sm:$0xff]  ;;  %v577_v45 = vld [vmem:[#allocation10 + $0x1f8] sm:$0xff] }
  0xcd   :  { %7332 = vst [vmem:[#allocation33_spill] sm:$0xff] %v6119_v47  ;;  %v6135_v51 = vpack.c.bf16 %v568_v3, %v564_v19  ;;  %7338 = vst [vmem:[#allocation39_spill] sm:$0xff] %v6137_v24  ;;  %v6140_v63 = vpack.c.bf16 %v577_v45, %v573_v38  ;;  %v578_v19 = vld [vmem:[#allocation10 + $0x200] sm:$0xff]  ;;  %v580_v45 = vld [vmem:[#allocation10 + $0x210] sm:$0xff] }
  0xce   :  { %3823 = vmatpush1.bf16.msra.mxu0 %v6119_v47  ;;  %v583_v47 = vld [vmem:[#allocation10 + $0x228] sm:$0xff]  ;;  %v582_v38 = vld [vmem:[#allocation10 + $0x220] sm:$0xff] }
  0xcf   :  { %3883 = vmatpush1.bf16.msra.mxu1 %v6111_v28  ;;  %v6131_v28 = vpack.c.bf16 %v566_v0, %v562_v18  ;;  %3825 = vmatprep.subr.bf16.mxu0 %v6125_v16  ;;  %7337 = vst [vmem:[#allocation38_spill] sm:$0xff] %v6135_v51  ;;  %7339 = vst [vmem:[#allocation40_spill] sm:$0xff] %v6140_v63  ;;  %v581_v18 = vld [vmem:[#allocation10 + $0x218] sm:$0xff]  ;;  %v6149_v55 = vpack.c.bf16 %v583_v47, %v579_v36  ;;  %v587_v36 = vld [vmem:[#allocation10 + $0x248] sm:$0xff] }
  0xd0   :  { %3885 = vmatprep.subr.bf16.mxu1 %v6116_v31  ;;  %v576_v31 = vld [vmem:[#allocation10 + $0x1f0] sm:$0xff]  ;;  %v585_v0 = vld [vmem:[#allocation10 + $0x238] sm:$0xff] }
  0xd1   :  { %7336 = vst [vmem:[#allocation37_spill] sm:$0xff] %v6131_v28  ;;  %v6147_v12 = vpack.c.bf16 %v576_v31, %v572_v42  ;;  %7342 = vst [vmem:[#allocation43_spill] sm:$0xff] %v6149_v55  ;;  %v6152_v3 = vpack.c.bf16 %v585_v0, %v581_v18  ;;  %v584_v31 = vld [vmem:[#allocation10 + $0x230] sm:$0xff]  ;;  %v589_v42 = vld [vmem:[#allocation10 + $0x258] sm:$0xff] }
  0xd2   :  { %3827 = vmatpush1.bf16.msra.mxu0 %v6131_v28  ;;  %v6160_v47 = vpack.c.bf16 %v584_v31, %v580_v45  ;;  %v593_v0 = vld [vmem:[#allocation10 + $0x278] sm:$0xff]  ;;  %v595_v31 = vld [vmem:[#allocation10 + $0x288] sm:$0xff] }
  0xd3   :  { %3887 = vmatpush1.bf16.msra.mxu1 %v6123_v4  ;;  %v6143_v4 = vpack.c.bf16 %v574_v46, %v570_v37  ;;  %3829 = vmatprep.subr.bf16.mxu0 %v6137_v24  ;;  %7341 = vst [vmem:[#allocation42_spill] sm:$0xff] %v6147_v12  ;;  %7343 = vst [vmem:[#allocation44_spill] sm:$0xff] %v6152_v3  ;;  %v6158_v37 = vpack.c.bf16 %v582_v38, %v578_v19  ;;  %v591_v46 = vld [vmem:[#allocation10 + $0x268] sm:$0xff]  ;;  %v588_v19 = vld [vmem:[#allocation10 + $0x250] sm:$0xff] }
  0xd4   :  { %3889 = vmatprep.subr.bf16.mxu1 %v6128_v27  ;;  %7345 = vst [vmem:[#allocation46_spill] sm:$0xff] %v6160_v47  ;;  %v6164_v18 = vpack.c.bf16 %v591_v46, %v587_v36  ;;  %v592_v38 = vld [vmem:[#allocation10 + $0x270] sm:$0xff]  ;;  %v599_v36 = vld [vmem:[#allocation10 + $0x2a8] sm:$0xff]  ;;  %v597_v46 = vld [vmem:[#allocation10 + $0x298] sm:$0xff] }
  0xd5   :  { %7340 = vst [vmem:[#allocation41_spill] sm:$0xff] %v6143_v4  ;;  %7344 = vst [vmem:[#allocation45_spill] sm:$0xff] %v6158_v37  ;;  %v6171_v45 = vpack.c.bf16 %v592_v38, %v588_v19  ;;  %v596_v19 = vld [vmem:[#allocation10 + $0x290] sm:$0xff] }
  0xd6   :  { %3831 = vmatpush1.bf16.msra.mxu0 %v6143_v4  ;;  %7346 = vst [vmem:[#allocation47_spill] sm:$0xff] %v6164_v18  ;;  %v6166_v4 = vpack.c.bf16 %v593_v0, %v589_v42  ;;  %v601_v42 = vld [vmem:[#allocation10 + $0x2b8] sm:$0xff]  ;;  %v600_v38 = vld [vmem:[#allocation10 + $0x2b0] sm:$0xff] }
  0xd7   :  { %3891 = vmatpush1.bf16.msra.mxu1 %v6135_v51  ;;  %3833 = vmatprep.subr.bf16.mxu0 %v6149_v55  ;;  %v586_v55 = vld [vmem:[#allocation10 + $0x240] sm:$0xff]  ;;  %7349 = vst [vmem:[#allocation50_spill] sm:$0xff] %v6171_v45  ;;  %v6178_v0 = vpack.c.bf16 %v601_v42, %v597_v46  ;;  %v609_v46 = vld [vmem:[#allocation10 + $0x2f8] sm:$0xff] }
  0xd8   :  { %3893 = vmatprep.subr.bf16.mxu1 %v6140_v63  ;;  %7347 = vst [vmem:[#allocation48_spill] sm:$0xff] %v6166_v4  ;;  %v602_v42 = vld [vmem:[#allocation10 + $0x2c0] sm:$0xff]  ;;  %v629_v63 = vld [vmem:[#allocation10 + $0x398] sm:$0xff] }
  0xd9   :  { %7351 = vst [vmem:[#allocation52_spill] sm:$0xff] %v6178_v0 }
  0xda   :  { %3835 = vmatpush1.bf16.msra.mxu0 %v6158_v37 }
  0xdb   :  { %3895 = vmatpush1.bf16.msra.mxu1 %v6147_v12  ;;  %v590_v12 = vld [vmem:[#allocation10 + $0x260] sm:$0xff]  ;;  %3837 = vmatprep.subr.bf16.mxu0 %v6164_v18 }
  0xdc   :  { %3897 = vmatprep.subr.bf16.mxu1 %v6152_v3  ;;  %v6168_v3 = vpack.c.bf16 %v590_v12, %v586_v55  ;;  %v594_v12 = vld [vmem:[#allocation10 + $0x280] sm:$0xff] }
  0xdd   :  { %v598_v55 = vld [vmem:[#allocation10 + $0x2a0] sm:$0xff] }
  0xde   :  { %7348 = vst [vmem:[#allocation49_spill] sm:$0xff] %v6168_v3  ;;  %3839 = vmatpush1.bf16.msra.mxu0 %v6168_v3  ;;  %v6180_v37 = vpack.c.bf16 %v598_v55, %v594_v12  ;;  %v606_v12 = vld [vmem:[#allocation10 + $0x2e0] sm:$0xff] }
  0xdf   :  { %3899 = vmatpush1.bf16.msra.mxu1 %v6160_v47  ;;  %v6176_v47 = vpack.c.bf16 %v599_v36, %v595_v31  ;;  %v607_v31 = vld [vmem:[#allocation10 + $0x2e8] sm:$0xff]  ;;  %v605_v36 = vld [vmem:[#allocation10 + $0x2d8] sm:$0xff]  ;;  %v6192_v18 = vpack.c.bf16 %v606_v12, %v602_v42  ;;  %v614_v42 = vld [vmem:[#allocation10 + $0x320] sm:$0xff] }
  0xe0   :  { %3901 = vmatprep.subr.bf16.mxu1 %v6166_v4  ;;  %7352 = vst [vmem:[#allocation53_spill] sm:$0xff] %v6180_v37  ;;  %v6183_v4 = vpack.c.bf16 %v600_v38, %v596_v19  ;;  %v6190_v55 = vpack.c.bf16 %v609_v46, %v605_v36  ;;  %v604_v19 = vld [vmem:[#allocation10 + $0x2d0] sm:$0xff]  ;;  %v617_v36 = vld [vmem:[#allocation10 + $0x338] sm:$0xff]  ;;  %v610_v46 = vld [vmem:[#allocation10 + $0x300] sm:$0xff] }
  0xe1   :  { %7350 = vst [vmem:[#allocation51_spill] sm:$0xff] %v6176_v47  ;;  %3841 = vmatprep.subr.bf16.mxu0 %v6176_v47  ;;  %7356 = vst [vmem:[#allocation57_spill] sm:$0xff] %v6192_v18  ;;  %v608_v38 = vld [vmem:[#allocation10 + $0x2f0] sm:$0xff]  ;;  %v6204_v47 = vpack.c.bf16 %v614_v42, %v610_v46  ;;  %v622_v46 = vld [vmem:[#allocation10 + $0x360] sm:$0xff] }
  0xe2   :  { %7353 = vst [vmem:[#allocation54_spill] sm:$0xff] %v6183_v4  ;;  %3843 = vmatpush1.bf16.msra.mxu0 %v6180_v37  ;;  %7355 = vst [vmem:[#allocation56_spill] sm:$0xff] %v6190_v55 }
  0xe3   :  { %3903 = vmatpush1.bf16.msra.mxu1 %v6171_v45  ;;  %v603_v45 = vld [vmem:[#allocation10 + $0x2c8] sm:$0xff]  ;;  %7360 = vst [vmem:[#allocation61_spill] sm:$0xff] %v6204_v47 }
  0xe4   :  { %3905 = vmatprep.subr.bf16.mxu1 %v6178_v0  ;;  %v6188_v3 = vpack.c.bf16 %v607_v31, %v603_v45  ;;  %v6195_v0 = vpack.c.bf16 %v608_v38, %v604_v19  ;;  %v615_v45 = vld [vmem:[#allocation10 + $0x328] sm:$0xff]  ;;  %v613_v31 = vld [vmem:[#allocation10 + $0x318] sm:$0xff]  ;;  %v612_v19 = vld [vmem:[#allocation10 + $0x310] sm:$0xff] }
  0xe5   :  { %v6202_v12 = vpack.c.bf16 %v617_v36, %v613_v31  ;;  %v616_v38 = vld [vmem:[#allocation10 + $0x330] sm:$0xff]  ;;  %v625_v31 = vld [vmem:[#allocation10 + $0x378] sm:$0xff]  ;;  %v618_v36 = vld [vmem:[#allocation10 + $0x340] sm:$0xff] }
  0xe6   :  { %7354 = vst [vmem:[#allocation55_spill] sm:$0xff] %v6188_v3  ;;  %3845 = vmatprep.subr.bf16.mxu0 %v6188_v3  ;;  %7357 = vst [vmem:[#allocation58_spill] sm:$0xff] %v6195_v0  ;;  %v6216_v3 = vpack.c.bf16 %v622_v46, %v618_v36 }
  0xe7   :  { %3907 = vmatpush1.bf16.msra.mxu1 %v6183_v4  ;;  %3847 = vmatpush1.bf16.msra.mxu0 %v6192_v18  ;;  %v611_v4 = vld [vmem:[#allocation10 + $0x308] sm:$0xff]  ;;  %7359 = vst [vmem:[#allocation60_spill] sm:$0xff] %v6202_v12 }
  0xe8   :  { %3909 = vmatprep.subr.bf16.mxu1 %v6190_v55  ;;  %v6200_v37 = vpack.c.bf16 %v615_v45, %v611_v4  ;;  %v6207_v55 = vpack.c.bf16 %v616_v38, %v612_v19  ;;  %v623_v4 = vld [vmem:[#allocation10 + $0x368] sm:$0xff]  ;;  %v621_v45 = vld [vmem:[#allocation10 + $0x358] sm:$0xff]  ;;  %7364 = vst [vmem:[#allocation65_spill] sm:$0xff] %v6216_v3  ;;  %v620_v19 = vld [vmem:[#allocation10 + $0x350] sm:$0xff] }
  0xe9   :  { %v6214_v42 = vpack.c.bf16 %v625_v31, %v621_v45  ;;  %v624_v38 = vld [vmem:[#allocation10 + $0x370] sm:$0xff]  ;;  %v626_v45 = vld [vmem:[#allocation10 + $0x380] sm:$0xff] }
  0xea   :  { %7358 = vst [vmem:[#allocation59_spill] sm:$0xff] %v6200_v37  ;;  %3849 = vmatprep.subr.bf16.mxu0 %v6200_v37  ;;  %7361 = vst [vmem:[#allocation62_spill] sm:$0xff] %v6207_v55  ;;  %v631_v37 = vld [vmem:[#allocation10 + $0x3a8] sm:$0xff]  ;;  %v630_v31 = vld [vmem:[#allocation10 + $0x3a0] sm:$0xff] }
  0xeb   :  { %3911 = vmatpush1.bf16.msra.mxu1 %v6195_v0  ;;  %3851 = vmatpush1.bf16.msra.mxu0 %v6204_v47  ;;  %v619_v0 = vld [vmem:[#allocation10 + $0x348] sm:$0xff]  ;;  %7363 = vst [vmem:[#allocation64_spill] sm:$0xff] %v6214_v42  ;;  %v6228_v46 = vpack.c.bf16 %v630_v31, %v626_v45  ;;  %v636_v45 = vld [vmem:[#allocation10 + $0x3d0] sm:$0xff] }
  0xec   :  { %3913 = vmatprep.subr.bf16.mxu1 %v6202_v12  ;;  %v6212_v18 = vpack.c.bf16 %v623_v4, %v619_v0  ;;  %v6219_v12 = vpack.c.bf16 %v624_v38, %v620_v19  ;;  %v627_v47 = vld [vmem:[#allocation10 + $0x388] sm:$0xff]  ;;  %v633_v4 = vld [vmem:[#allocation10 + $0x3b8] sm:$0xff]  ;;  %v628_v19 = vld [vmem:[#allocation10 + $0x390] sm:$0xff] }
  0xed   :  { %v6223_v0 = vpack.c.bf16 %v631_v37, %v627_v47  ;;  %v6226_v36 = vpack.c.bf16 %v633_v4, %v629_v63  ;;  %7368 = vst [vmem:[#allocation69_spill] sm:$0xff] %v6228_v46  ;;  %v632_v38 = vld [vmem:[#allocation10 + $0x3b0] sm:$0xff]  ;;  %v641_v37 = vld [vmem:[#allocation10 + $0x3f8] sm:$0xff]  ;;  %v634_v63 = vld [vmem:[#allocation10 + $0x3c0] sm:$0xff] }
  0xee   :  { %7362 = vst [vmem:[#allocation63_spill] sm:$0xff] %v6212_v18  ;;  %3853 = vmatprep.subr.bf16.mxu0 %v6212_v18  ;;  %7365 = vst [vmem:[#allocation66_spill] sm:$0xff] %v6219_v12  ;;  %v635_v18 = vld [vmem:[#allocation10 + $0x3c8] sm:$0xff]  ;;  %v638_v4 = vld [vmem:[#allocation10 + $0x3e0] sm:$0xff] }
  0xef   :  { %3915 = vmatpush1.bf16.msra.mxu1 %v6207_v55  ;;  %3855 = vmatpush1.bf16.msra.mxu0 %v6216_v3  ;;  %7366 = vst [vmem:[#allocation67_spill] sm:$0xff] %v6223_v0  ;;  %7367 = vst [vmem:[#allocation68_spill] sm:$0xff] %v6226_v36  ;;  %v6231_v55 = vpack.c.bf16 %v632_v38, %v628_v19  ;;  %v637_v3 = vld [vmem:[#allocation10 + $0x3d8] sm:$0xff]  ;;  %v6239_v31 = vpack.c.bf16 %v638_v4, %v634_v63 }
  0xf0   :  { %3917 = vmatprep.subr.bf16.mxu1 %v6214_v42  ;;  %3857 = vmatprep.subr.bf16.mxu0 %v6223_v0  ;;  %v639_v42 = vld [vmem:[#allocation10 + $0x3e8] sm:$0xff]  ;;  %v6236_v24 = vpack.c.bf16 %v641_v37, %v637_v3  ;;  %v172_v3 = vlaneseq }
  0xf1   :  { %7369 = vst [vmem:[#allocation70_spill] sm:$0xff] %v6231_v55  ;;  %v6234_v47 = vpack.c.bf16 %v639_v42, %v635_v18  ;;  %7372 = vst [vmem:[#allocation73_spill] sm:$0xff] %v6239_v31 }
  0xf2   :  { %7371 = vst [vmem:[#allocation72_spill] sm:$0xff] %v6236_v24  ;;  %v6250_v18 = vshrl.u32 %v172_v3, 7 }
  0xf3   :  { %3919 = vmatpush1.bf16.msra.mxu1 %v6219_v12  ;;  %7370 = vst [vmem:[#allocation71_spill] sm:$0xff] %v6234_v47  ;;  %3859 = vmatpush1.bf16.msra.mxu0 %v6228_v46  ;;  %v640_v12 = vld [vmem:[#allocation10 + $0x3f0] sm:$0xff] }
  0xf4   :  { %3921 = vmatprep.subr.bf16.mxu1 %v6226_v36  ;;  %3861 = vmatprep.subr.bf16.mxu0 %v6234_v47  ;;  %v6243_v19 = vpack.c.bf16 %v640_v12, %v636_v45  ;;  %v7292_v42 = vsub.s32 0, %v6250_v18  ;;  %v170_v12 = vld [vmem:[%s7180_s3] sm:$0xf]  ;;  %v7295_v38 = vsub.s32 1, %v6250_v18 }
  0xf6   :  { %7373 = vst [vmem:[#allocation74_spill] sm:$0xff] %v6243_v19  ;;  %v175_v37 = vrot.slane %v170_v12, %v7292_v42  ;;  %v179_v63 = vrot.slane %v170_v12, %v7295_v38 }
  0xf7   :  { %3923 = vmatpush1.bf16.msra.mxu1 %v6231_v55  ;;  %3863 = vmatpush1.bf16.msra.mxu0 %v6239_v31 }
  0xf8   :  { %3925 = vmatprep.subr.bf16.mxu1 %v6236_v24  ;;  %3929 = vmatprep.subr.bf16.mxu0 %v5908_v9 }
  0xfb   :  { %3927 = vmatpush1.bf16.msra.mxu1 %v6243_v19 }
  0xfc   :  { %3961 = vmatprep.subr.bf16.mxu1 %v5988_v54 }
 0x151   :  { %v258_v4 = vpop.f32.mrb[0].mxu1 }
 0x152   :  { %v259_v45 = vadd.f32 %v258_v4, %v175_v37  ;;  %v260_v54 = vpop.f32.mrb[1].mxu1 }
 0x153   :  { %v734_v9 = vpop.f32.mrb[0].mxu0  ;;  %v261_v3 = vadd.f32 %v260_v54, %v179_v63 }
 0x154   :  { %v736_v19 = vpop.f32.mrb[1].mxu0  ;;  %v810_v31 = vadd.f32 %v734_v9, %v259_v45 }
 0x155   :  { %v811_v24 = vadd.f32 %v736_v19, %v261_v3  ;;  %v264_v47 = vpop.f32.mrb[2].mxu1 }
 0x156   :  { %v6261_v55 = vadd.f32 %v264_v47, %v175_v37  ;;  %v266_v46 = vpop.f32.mrb[3].mxu1 }
 0x157   :  { %v6263_v36 = vadd.f32 %v266_v46, %v179_v63 }
 0x159   :  { %v270_v0 = vpop.f32.mrb[4].mxu1 }
 0x15a   :  { %v6265_v51 = vadd.f32 %v270_v0, %v175_v37  ;;  %v272_v42 = vpop.f32.mrb[5].mxu1 }
 0x15b   :  { %v6267_v28 = vadd.f32 %v272_v42, %v179_v63 }
 0x15c   :  { %7374 = vst [vmem:[#allocation75_spill] sm:$0xff] %v6265_v51 }
 0x15d   :  { %7375 = vst [vmem:[#allocation76_spill] sm:$0xff] %v6267_v28  ;;  %v276_v38 = vpop.f32.mrb[6].mxu1 }
 0x15e   :  { %v6269_v4 = vadd.f32 %v276_v38, %v175_v37  ;;  %v278_v27 = vpop.f32.mrb[7].mxu1 }
 0x15f   :  { %v6271_v54 = vadd.f32 %v278_v27, %v179_v63 }
 0x160   :  { %7376 = vst [vmem:[#allocation77_spill] sm:$0xff] %v6269_v4 }
 0x161   :  { %7377 = vst [vmem:[#allocation78_spill] sm:$0xff] %v6271_v54  ;;  %v282_v9 = vpop.f32.mrb[8].mxu1 }
 0x162   :  { %v6273_v19 = vadd.f32 %v282_v9, %v175_v37  ;;  %v284_v47 = vpop.f32.mrb[9].mxu1 }
 0x163   :  { %v6275_v45 = vadd.f32 %v284_v47, %v179_v63  ;;  %v3556_v47 = vmul.f32 -1.442695, %v811_v24 }
 0x164   :  { %7378 = vst [vmem:[#allocation79_spill] sm:$0xff] %v6273_v19 }
 0x165   :  { %7379 = vst [vmem:[#allocation80_spill] sm:$0xff] %v6275_v45  ;;  %v288_v46 = vpop.f32.mrb[10].mxu1  ;;  %v3555_v45 = vmul.f32 -1.442695, %v810_v31  ;;  %5379 = vpow2.f32 %v3556_v47 }
 0x166   :  { %v6277_v3 = vadd.f32 %v288_v46, %v175_v37  ;;  %v290_v0 = vpop.f32.mrb[11].mxu1  ;;  %v7298_v46 = vsub.s32 2, %v6250_v18 }
 0x167   :  { %v6279_v51 = vadd.f32 %v290_v0, %v179_v63  ;;  %5381 = vpow2.f32 %v3555_v45 }
 0x168   :  { %7380 = vst [vmem:[#allocation81_spill] sm:$0xff] %v6277_v3  ;;  %v7401_v3 = vld [vmem:[#allocation37_spill] sm:$0xff] }
 0x169   :  { %7381 = vst [vmem:[#allocation82_spill] sm:$0xff] %v6279_v51  ;;  %v294_v42 = vpop.f32.mrb[12].mxu1  ;;  %v7299_v51 = vsub.s32 3, %v6250_v18 }
 0x16a   :  { %v6281_v28 = vadd.f32 %v294_v42, %v175_v37  ;;  %v296_v38 = vpop.f32.mrb[13].mxu1 }
 0x16b   :  { %v6283_v4 = vadd.f32 %v296_v38, %v179_v63  ;;  %v6293_v38 = vrot.slane %v170_v12, %v7298_v46 }
 0x16c   :  { %7382 = vst [vmem:[#allocation83_spill] sm:$0xff] %v6281_v28 }
 0x16d   :  { %7383 = vst [vmem:[#allocation84_spill] sm:$0xff] %v6283_v4  ;;  %v300_v27 = vpop.f32.mrb[14].mxu1 }
 0x16e   :  { %v6285_v54 = vadd.f32 %v300_v27, %v175_v37  ;;  %v302_v9 = vpop.f32.mrb[15].mxu1 }
 0x16f   :  { %v6287_v19 = vadd.f32 %v302_v9, %v179_v63  ;;  %v5380_v0 = vpop.eup %5379  ;;  %v6297_v63 = vrot.slane %v170_v12, %v7299_v51  ;;  %v7400_v51 = vld [vmem:[#allocation36_spill] sm:$0xff] }
 0x170   :  { %7384 = vst [vmem:[#allocation85_spill] sm:$0xff] %v6285_v54  ;;  %v823_v28 = vadd.f32 1.0, %v5380_v0 }
 0x171   :  { %7385 = vst [vmem:[#allocation86_spill] sm:$0xff] %v6287_v19  ;;  %v5382_v42 = vpop.eup %5381 }
 0x172   :  { %v817_v37 = vadd.f32 1.0, %v5382_v42  ;;  %5383 = vrcp.f32 %v823_v28 }
 0x174   :  { %5385 = vrcp.f32 %v817_v37 }
 0x17c   :  { %v5384_v47 = vpop.eup %5383 }
 0x17d   :  { %v833_v19 = vmul.f32 0.0, %v5384_v47  ;;  %v7393_v47 = vld [vmem:[#allocation28_spill] sm:$0xff] }
 0x17e   :  { %v5386_v0 = vpop.eup %5385 }
 0x191   :  { %v805_v24 = vpop.f32.mrb[16].mxu1 }
 0x192   :  { %v5336_v31 = vadd.f32 %v805_v24, %v6293_v38  ;;  %v807_v45 = vpop.f32.mrb[17].mxu1 }
 0x193   :  { %v5337_v27 = vadd.f32 %v807_v45, %v6297_v63  ;;  %v7390_v45 = vld [vmem:[#allocation25_spill] sm:$0xff] }
 0x194   :  { %5387 = vtanh.f32 %v5336_v31  ;;  %v7389_v31 = vld [vmem:[#allocation24_spill] sm:$0xff] }
 0x195   :  { %v3557_v9 = vmul.f32 -1.442695, %v5337_v27  ;;  %v7391_v27 = vld [vmem:[#allocation26_spill] sm:$0xff] }
 0x197   :  { %5389 = vpow2.f32 %v3557_v9  ;;  %v7392_v9 = vld [vmem:[#allocation27_spill] sm:$0xff] }
 0x19e   :  { %v5388_v46 = vpop.eup %5387 }
 0x19f   :  { %v834_v42 = vmul.f32 %v5388_v46, %v5386_v0  ;;  %v7386_v46 = vmov 0.0   ;;  %v7394_v0 = vld [vmem:[#allocation29_spill] sm:$0xff] }
 0x1a1   :  { %v5390_v54 = vpop.eup %5389  ;;  %v6301_v4 = vadd.f32 %v834_v42, %v833_v19  ;;  %v7388_v19 = vld [vmem:[#allocation23_spill] sm:$0xff]  ;;  %v7395_v42 = vld [vmem:[#allocation30_spill] sm:$0xff] }
 0x1a2   :  { %v830_v12 = vadd.f32 1.0, %v5390_v54  ;;  %v7387_v54 = vld [vmem:[#allocation22_spill] sm:$0xff] }
 0x1a3   :  { %5391 = vtanh.f32 %v6301_v4 }
 0x1a4   :  { %5393 = vrcp.f32 %v830_v12  ;;  %v7396_v12 = vld [vmem:[#allocation31_spill] sm:$0xff] }
 0x1ad   :  { %v5392_v28 = vpop.eup %5391 }
 0x1ae   :  { %v5394_v24 = vpop.eup %5393 }
 0x1af   :  { %v837_v37 = vmul.f32 %v5394_v24, %v5392_v28  ;;  %v7397_v28 = vld [vmem:[#allocation32_spill] sm:$0xff]  ;;  %v7398_v24 = vld [vmem:[#allocation33_spill] sm:$0xff] }
 0x1b1   :  { %903 = vmatmul.mubr.f32.vlgmr.msra.gmra.mrb[2].mxu0 %v837_v37  ;;  %974 = vmatmul.mubr.f32.vlgmr.msra.gmra.mrb[32].mxu1 %v837_v37 }
 0x1b2   :  { %3931 = vmatpush1.bf16.msra.mxu0 %v5910_v13  ;;  %3963 = vmatpush1.bf16.msra.mxu1 %v5992_v61 }
 0x1b3   :  { %3933 = vmatprep.subr.bf16.mxu0 %v5914_v22  ;;  %3965 = vmatprep.subr.bf16.mxu1 %v5995_v62 }
 0x1b4   :  { %1073 = vmatprep.mubr.f32.mxu0 %v7386_v46  ;;  %1144 = vmatprep.mubr.f32.mxu1 %v7386_v46 }
 0x1b6   :  { %3935 = vmatpush1.bf16.msra.mxu0 %v5916_v26  ;;  %3967 = vmatpush1.bf16.msra.mxu1 %v6000_v7 }
 0x1b7   :  { %3937 = vmatprep.subr.bf16.mxu0 %v5919_v35  ;;  %3969 = vmatprep.subr.bf16.mxu1 %v6003_v8 }
 0x1ba   :  { %3939 = vmatpush1.bf16.msra.mxu0 %v5922_v39  ;;  %3971 = vmatpush1.bf16.msra.mxu1 %v6008_v48 }
 0x1bb   :  { %3941 = vmatprep.subr.bf16.mxu0 %v5925_v44  ;;  %3973 = vmatprep.subr.bf16.mxu1 %v6011_v17 }
 0x1be   :  { %3943 = vmatpush1.bf16.msra.mxu0 %v5928_v52  ;;  %3975 = vmatpush1.bf16.msra.mxu1 %v6016_v56 }
 0x1bf   :  { %3945 = vmatprep.subr.bf16.mxu0 %v5931_v57  ;;  %3977 = vmatprep.subr.bf16.mxu1 %v6019_v25 }
 0x1c2   :  { %3947 = vmatpush1.bf16.msra.mxu0 %v5934_v1  ;;  %3979 = vmatpush1.bf16.msra.mxu1 %v6024_v2 }
 0x1c3   :  { %3949 = vmatprep.subr.bf16.mxu0 %v5937_v6  ;;  %3981 = vmatprep.subr.bf16.mxu1 %v6027_v33 }
 0x1c6   :  { %3951 = vmatpush1.bf16.msra.mxu0 %v5940_v15  ;;  %3983 = vmatpush1.bf16.msra.mxu1 %v6032_v11 }
 0x1c7   :  { %3953 = vmatprep.subr.bf16.mxu0 %v5943_v20  ;;  %3985 = vmatprep.subr.bf16.mxu1 %v6035_v43 }
 0x1ca   :  { %3955 = vmatpush1.bf16.msra.mxu0 %v5946_v29  ;;  %3987 = vmatpush1.bf16.msra.mxu1 %v6040_v21 }
 0x1cb   :  { %3957 = vmatprep.subr.bf16.mxu0 %v5949_v34  ;;  %3989 = vmatprep.subr.bf16.mxu1 %v6043_v50 }
 0x1ce   :  { %3959 = vmatpush1.bf16.msra.mxu0 %v5952_v41  ;;  %3991 = vmatpush1.bf16.msra.mxu1 %v6048_v58 }
 0x1cf   :  { %3993 = vmatprep.subr.bf16.mxu0 %v6056_v60  ;;  %4057 = vmatprep.subr.bf16.mxu1 %v6058_v5 }
 0x1d1   :  { %1074 = vmatmul.mubr.f32.vlgmr.msra.gmra.mrb[4].mxu0 %v837_v37  ;;  %1145 = vmatmul.mubr.f32.vlgmr.msra.gmra.mrb[18].mxu1 %v837_v37  ;;  %v7399_v37 = vld [vmem:[#allocation34_spill] sm:$0xff] }
 0x1d2   :  { %3995 = vmatpush1.bf16.msra.mxu0 %v6060_v10  ;;  %4059 = vmatpush1.bf16.msra.mxu1 %v6063_v14 }
 0x1d3   :  { %3997 = vmatprep.subr.bf16.mxu0 %v6068_v23  ;;  %4061 = vmatprep.subr.bf16.mxu1 %v6070_v30 }
 0x1d6   :  { %3999 = vmatpush1.bf16.msra.mxu0 %v6072_v32  ;;  %4063 = vmatpush1.bf16.msra.mxu1 %v6075_v40 }
 0x1d7   :  { %4001 = vmatprep.subr.bf16.mxu0 %v6079_v49  ;;  %4065 = vmatprep.subr.bf16.mxu1 %v6081_v53 }
 0x1da   :  { %4003 = vmatpush1.bf16.msra.mxu0 %v6084_v59  ;;  %4067 = vmatpush1.bf16.msra.mxu1 %v7387_v54 }
 0x1db   :  { %4005 = vmatprep.subr.bf16.mxu0 %v7388_v19  ;;  %4069 = vmatprep.subr.bf16.mxu1 %v7389_v31  ;;  %v7444_v31 = vsub.s32 3, %v6250_v18 }
 0x1de   :  { %4007 = vmatpush1.bf16.msra.mxu0 %v7390_v45  ;;  %4071 = vmatpush1.bf16.msra.mxu1 %v7391_v27 }
 0x1df   :  { %4009 = vmatprep.subr.bf16.mxu0 %v7392_v9  ;;  %4073 = vmatprep.subr.bf16.mxu1 %v7393_v47  ;;  %v7402_v9 = vld [vmem:[#allocation38_spill] sm:$0xff]  ;;  %v7403_v47 = vld [vmem:[#allocation39_spill] sm:$0xff] }
 0x1e2   :  { %4011 = vmatpush1.bf16.msra.mxu0 %v7394_v0  ;;  %4075 = vmatpush1.bf16.msra.mxu1 %v7395_v42  ;;  %v7404_v0 = vld [vmem:[#allocation40_spill] sm:$0xff]  ;;  %v7405_v42 = vld [vmem:[#allocation41_spill] sm:$0xff] }
 0x1e3   :  { %4013 = vmatprep.subr.bf16.mxu0 %v7396_v12  ;;  %4077 = vmatprep.subr.bf16.mxu1 %v7397_v28  ;;  %v7406_v12 = vld [vmem:[#allocation42_spill] sm:$0xff]  ;;  %v7407_v28 = vld [vmem:[#allocation43_spill] sm:$0xff] }
 0x1e6   :  { %4015 = vmatpush1.bf16.msra.mxu0 %v7398_v24  ;;  %4079 = vmatpush1.bf16.msra.mxu1 %v7399_v37  ;;  %v7408_v24 = vld [vmem:[#allocation44_spill] sm:$0xff]  ;;  %v7409_v37 = vld [vmem:[#allocation45_spill] sm:$0xff] }
 0x1e7   :  { %4017 = vmatprep.subr.bf16.mxu0 %v6125_v16  ;;  %4081 = vmatprep.subr.bf16.mxu1 %v7400_v51  ;;  %v7410_v16 = vld [vmem:[#allocation46_spill] sm:$0xff]  ;;  %v7411_v51 = vld [vmem:[#allocation47_spill] sm:$0xff] }
 0x1ea   :  { %4019 = vmatpush1.bf16.msra.mxu0 %v7401_v3  ;;  %4083 = vmatpush1.bf16.msra.mxu1 %v7402_v9  ;;  %v7412_v3 = vld [vmem:[#allocation48_spill] sm:$0xff]  ;;  %v7413_v9 = vld [vmem:[#allocation49_spill] sm:$0xff] }
 0x1eb   :  { %4021 = vmatprep.subr.bf16.mxu0 %v7403_v47  ;;  %4085 = vmatprep.subr.bf16.mxu1 %v7404_v0  ;;  %v7414_v47 = vld [vmem:[#allocation50_spill] sm:$0xff]  ;;  %v7415_v0 = vld [vmem:[#allocation51_spill] sm:$0xff] }
 0x1ee   :  { %4023 = vmatpush1.bf16.msra.mxu0 %v7405_v42  ;;  %4087 = vmatpush1.bf16.msra.mxu1 %v7406_v12  ;;  %v7416_v42 = vld [vmem:[#allocation52_spill] sm:$0xff]  ;;  %v7417_v12 = vld [vmem:[#allocation53_spill] sm:$0xff] }
 0x1ef   :  { %4025 = vmatprep.subr.bf16.mxu0 %v7407_v28  ;;  %4089 = vmatprep.subr.bf16.mxu1 %v7408_v24  ;;  %v7418_v28 = vld [vmem:[#allocation54_spill] sm:$0xff]  ;;  %v7419_v24 = vld [vmem:[#allocation55_spill] sm:$0xff] }
 0x1f2   :  { %4027 = vmatpush1.bf16.msra.mxu0 %v7409_v37  ;;  %4091 = vmatpush1.bf16.msra.mxu1 %v7410_v16  ;;  %v7420_v37 = vld [vmem:[#allocation56_spill] sm:$0xff]  ;;  %v7421_v16 = vld [vmem:[#allocation57_spill] sm:$0xff] }
 0x1f3   :  { %4029 = vmatprep.subr.bf16.mxu0 %v7411_v51  ;;  %4093 = vmatprep.subr.bf16.mxu1 %v7412_v3  ;;  %v7422_v51 = vld [vmem:[#allocation58_spill] sm:$0xff]  ;;  %v7423_v3 = vld [vmem:[#allocation59_spill] sm:$0xff] }
 0x1f6   :  { %4031 = vmatpush1.bf16.msra.mxu0 %v7413_v9  ;;  %4095 = vmatpush1.bf16.msra.mxu1 %v7414_v47  ;;  %v7424_v9 = vld [vmem:[#allocation60_spill] sm:$0xff]  ;;  %v7425_v47 = vld [vmem:[#allocation61_spill] sm:$0xff] }
 0x1f7   :  { %4033 = vmatprep.subr.bf16.mxu0 %v7415_v0  ;;  %4097 = vmatprep.subr.bf16.mxu1 %v7416_v42  ;;  %v7426_v0 = vld [vmem:[#allocation62_spill] sm:$0xff]  ;;  %v7427_v42 = vld [vmem:[#allocation63_spill] sm:$0xff] }
 0x1fa   :  { %4035 = vmatpush1.bf16.msra.mxu0 %v7417_v12  ;;  %4099 = vmatpush1.bf16.msra.mxu1 %v7418_v28  ;;  %v7428_v12 = vld [vmem:[#allocation64_spill] sm:$0xff]  ;;  %v7429_v28 = vld [vmem:[#allocation65_spill] sm:$0xff] }
 0x1fb   :  { %4037 = vmatprep.subr.bf16.mxu0 %v7419_v24  ;;  %4101 = vmatprep.subr.bf16.mxu1 %v7420_v37  ;;  %v7430_v24 = vld [vmem:[#allocation66_spill] sm:$0xff]  ;;  %v7431_v37 = vld [vmem:[#allocation67_spill] sm:$0xff] }
 0x1fe   :  { %4039 = vmatpush1.bf16.msra.mxu0 %v7421_v16  ;;  %4103 = vmatpush1.bf16.msra.mxu1 %v7422_v51  ;;  %v7432_v16 = vld [vmem:[#allocation68_spill] sm:$0xff]  ;;  %v7433_v51 = vld [vmem:[#allocation69_spill] sm:$0xff] }
 0x1ff   :  { %4041 = vmatprep.subr.bf16.mxu0 %v7423_v3  ;;  %4105 = vmatprep.subr.bf16.mxu1 %v7424_v9  ;;  %v7434_v3 = vld [vmem:[#allocation70_spill] sm:$0xff]  ;;  %v7435_v9 = vld [vmem:[#allocation71_spill] sm:$0xff] }
 0x202   :  { %4043 = vmatpush1.bf16.msra.mxu0 %v7425_v47  ;;  %4107 = vmatpush1.bf16.msra.mxu1 %v7426_v0  ;;  %v7436_v47 = vld [vmem:[#allocation72_spill] sm:$0xff]  ;;  %v7437_v0 = vld [vmem:[#allocation73_spill] sm:$0xff] }
 0x203   :  { %4045 = vmatprep.subr.bf16.mxu0 %v7427_v42  ;;  %4109 = vmatprep.subr.bf16.mxu1 %v7428_v12  ;;  %v7438_v42 = vld [vmem:[#allocation74_spill] sm:$0xff] }
 0x204   :  { %v7439_v12 = vld [vmem:[#allocation18_spill] sm:$0xff] }
 0x206   :  { %4047 = vmatpush1.bf16.msra.mxu0 %v7429_v28  ;;  %4111 = vmatpush1.bf16.msra.mxu1 %v7430_v24  ;;  %v7440_v28 = vld [vmem:[#allocation19_spill] sm:$0xff] }
 0x207   :  { %4049 = vmatprep.subr.bf16.mxu0 %v7431_v37  ;;  %4113 = vmatprep.subr.bf16.mxu1 %v7432_v16  ;;  %v642_v16 = vld [vmem:[%s7182_s5] sm:$0xf] }
 0x208   :  { %v6417_v19 = vrot.slane %v642_v16, %v7444_v31 }
 0x20a   :  { %4051 = vmatpush1.bf16.msra.mxu0 %v7433_v51  ;;  %4115 = vmatpush1.bf16.msra.mxu1 %v7434_v3  ;;  %v7441_v51 = vsub.s32 0, %v6250_v18  ;;  %7445 = vst [vmem:[#allocation88_spill] sm:$0xff] %v6417_v19 }
 0x20b   :  { %4053 = vmatprep.subr.bf16.mxu0 %v7435_v9  ;;  %4117 = vmatprep.subr.bf16.mxu1 %v7436_v47  ;;  %v7443_v9 = vsub.s32 1, %v6250_v18 }
 0x20c   :  { %v6407_v37 = vrot.slane %v642_v16, %v7441_v51 }
 0x20d   :  { %v6411_v3 = vrot.slane %v642_v16, %v7443_v9  ;;  %v7446_v9 = vsub.s32 2, %v6250_v18 }
 0x20e   :  { %4055 = vmatpush1.bf16.msra.mxu0 %v7437_v0  ;;  %4119 = vmatpush1.bf16.msra.mxu1 %v7438_v42  ;;  %7442 = vst [vmem:[#allocation87_spill] sm:$0xff] %v6407_v37 }
 0x20f   :  { %4121 = vmatprep.subr.bf16.mxu0 %v7439_v12  ;;  %4153 = vmatprep.subr.bf16.mxu1 %v7440_v28  ;;  %v6422_v54 = vrot.slane %v642_v16, %v7446_v9 }
 0x211   :  { %7447 = vst [vmem:[#allocation89_spill] sm:$0xff] %v6422_v54 }
 0x284   :  { %v904_v47 = vpop.f32.mrb[2].mxu0  ;;  %v975_v0 = vpop.f32.mrb[32].mxu1 }
 0x285   :  { %v905_v42 = vadd.f32 %v904_v47, %v6407_v37  ;;  %v906_v24 = vpop.f32.mrb[3].mxu0  ;;  %v977_v12 = vpop.f32.mrb[33].mxu1  ;;  %v976_v47 = vadd.f32 %v975_v0, %v6422_v54 }
 0x286   :  { %v907_v28 = vadd.f32 %v906_v24, %v6411_v3  ;;  %v978_v51 = vadd.f32 %v977_v12, %v6417_v19 }
 0x287   :  { %v3558_v27 = vmul.f32 -1.442695, %v905_v42 }
 0x288   :  { %v3559_v45 = vmul.f32 -1.442695, %v907_v28  ;;  %v3560_v59 = vmul.f32 -1.442695, %v978_v51 }
 0x289   :  { %5395 = vpow2.f32 %v3558_v27 }
 0x28a   :  { %5397 = vpow2.f32 %v3559_v45 }
 0x28b   :  { %5399 = vpow2.f32 %v3560_v59 }
 0x28c   :  { %5401 = vtanh.f32 %v976_v47 }
 0x293   :  { %v5396_v37 = vpop.eup %5395 }
 0x294   :  { %v5398_v53 = vpop.eup %5397  ;;  %v983_v24 = vadd.f32 1.0, %v5396_v37 }
 0x295   :  { %v989_v42 = vadd.f32 1.0, %v5398_v53  ;;  %v5400_v31 = vpop.eup %5399 }
 0x296   :  { %5403 = vrcp.f32 %v983_v24  ;;  %v5402_v27 = vpop.eup %5401  ;;  %v996_v19 = vadd.f32 1.0, %v5400_v31 }
 0x297   :  { %5405 = vrcp.f32 %v989_v42 }
 0x298   :  { %5407 = vrcp.f32 %v996_v19 }
 0x2a0   :  { %v5404_v45 = vpop.eup %5403 }
 0x2a1   :  { %v5406_v28 = vpop.eup %5405  ;;  %v1000_v12 = vmul.f32 %v5404_v45, %v5402_v27 }
 0x2a2   :  { %v999_v18 = vmul.f32 0.0, %v5406_v28  ;;  %v5408_v31 = vpop.eup %5407 }
 0x2a4   :  { %v6425_v16 = vadd.f32 %v1000_v12, %v999_v18  ;;  %v1075_v51 = vpop.f32.mrb[4].mxu0  ;;  %v1146_v9 = vpop.f32.mrb[18].mxu1 }
 0x2a5   :  { %v1151_v0 = vadd.f32 %v1075_v51, %v6261_v55  ;;  %v1077_v37 = vpop.f32.mrb[5].mxu0  ;;  %v1148_v59 = vpop.f32.mrb[19].mxu1  ;;  %v5338_v28 = vadd.f32 %v1146_v9, %v6293_v38 }
 0x2a6   :  { %5409 = vtanh.f32 %v6425_v16  ;;  %v1152_v53 = vadd.f32 %v1077_v37, %v6263_v36  ;;  %v5339_v42 = vadd.f32 %v1148_v59, %v6297_v63 }
 0x2a7   :  { %v3561_v47 = vmul.f32 -1.442695, %v1151_v0 }
 0x2a8   :  { %v3562_v24 = vmul.f32 -1.442695, %v1152_v53  ;;  %v3563_v45 = vmul.f32 -1.442695, %v5339_v42 }
 0x2a9   :  { %5411 = vpow2.f32 %v3561_v47 }
 0x2aa   :  { %5413 = vpow2.f32 %v3562_v24 }
 0x2ab   :  { %5415 = vpow2.f32 %v3563_v45  ;;  %v7450_v45 = vld [vmem:[#allocation21_spill] sm:$0xff] }
 0x2ac   :  { %5417 = vtanh.f32 %v5338_v28  ;;  %v7451_v28 = vld [vmem:[#allocation22_spill] sm:$0xff] }
 0x2b0   :  { %v5410_v27 = vpop.eup %5409 }
 0x2b1   :  { %v6432_v19 = vmul.f32 %v5410_v27, %v5408_v31 }
 0x2b3   :  { %7448 = vst [vmem:[#allocation90_spill] sm:$0xff] %v6432_v19  ;;  %v5412_v55 = vpop.eup %5411  ;;  %1243 = vmatprep.mubr.f32.mxu0 %v6432_v19  ;;  %1314 = vmatprep.mubr.f32.mxu1 %v6432_v19  ;;  %v7466_v19 = vld [vmem:[#allocation37_spill] sm:$0xff] }
 0x2b4   :  { %v5414_v12 = vpop.eup %5413  ;;  %v1158_v36 = vadd.f32 1.0, %v5412_v55  ;;  %v7452_v55 = vld [vmem:[#allocation23_spill] sm:$0xff] }
 0x2b5   :  { %v1164_v18 = vadd.f32 1.0, %v5414_v12  ;;  %v5416_v51 = vpop.eup %5415  ;;  %v7453_v12 = vld [vmem:[#allocation24_spill] sm:$0xff] }
 0x2b6   :  { %5419 = vrcp.f32 %v1158_v36  ;;  %v5418_v0 = vpop.eup %5417  ;;  %v1171_v9 = vadd.f32 1.0, %v5416_v51  ;;  %v7454_v36 = vld [vmem:[#allocation25_spill] sm:$0xff]  ;;  %v7456_v51 = vld [vmem:[#allocation27_spill] sm:$0xff] }
 0x2b7   :  { %5421 = vrcp.f32 %v1164_v18  ;;  %v7455_v18 = vld [vmem:[#allocation26_spill] sm:$0xff] }
 0x2b8   :  { %5423 = vrcp.f32 %v1171_v9  ;;  %v7461_v9 = vld [vmem:[#allocation32_spill] sm:$0xff] }
 0x2c0   :  { %v5420_v37 = vpop.eup %5419 }
 0x2c1   :  { %v5422_v59 = vpop.eup %5421  ;;  %v1175_v53 = vmul.f32 %v5420_v37, %v5418_v0  ;;  %v7457_v0 = vld [vmem:[#allocation28_spill] sm:$0xff]  ;;  %v7458_v37 = vld [vmem:[#allocation29_spill] sm:$0xff] }
 0x2c2   :  { %v1174_v47 = vmul.f32 %v5422_v59, %v6301_v4  ;;  %v5424_v42 = vpop.eup %5423  ;;  %v7449_v4 = vld [vmem:[#allocation20_spill] sm:$0xff]  ;;  %v7459_v59 = vld [vmem:[#allocation30_spill] sm:$0xff] }
 0x2c4   :  { %v6437_v24 = vadd.f32 %v1175_v53, %v1174_v47  ;;  %v7460_v53 = vld [vmem:[#allocation31_spill] sm:$0xff]  ;;  %v7462_v47 = vld [vmem:[#allocation33_spill] sm:$0xff] }
 0x2c6   :  { %5425 = vtanh.f32 %v6437_v24 }
 0x2d0   :  { %v5426_v31 = vpop.eup %5425 }
 0x2d1   :  { %v1178_v27 = vmul.f32 %v5426_v31, %v5424_v42  ;;  %v7463_v42 = vld [vmem:[#allocation34_spill] sm:$0xff]  ;;  %v7464_v31 = vld [vmem:[#allocation35_spill] sm:$0xff] }
 0x2d3   :  { %1244 = vmatmul.mubr.f32.vlgmr.msra.gmra.mrb[6].mxu0 %v1178_v27  ;;  %1315 = vmatmul.mubr.f32.vlgmr.msra.gmra.mrb[34].mxu1 %v1178_v27 }
 0x2d4   :  { %4123 = vmatpush1.bf16.msra.mxu0 %v5910_v13  ;;  %4155 = vmatpush1.bf16.msra.mxu1 %v5992_v61 }
 0x2d5   :  { %4125 = vmatprep.subr.bf16.mxu0 %v5914_v22  ;;  %4157 = vmatprep.subr.bf16.mxu1 %v5995_v62 }
 0x2d6   :  { %1414 = vmatprep.mubr.f32.mxu0 %v7386_v46  ;;  %1485 = vmatprep.mubr.f32.mxu1 %v7386_v46 }
 0x2d8   :  { %4127 = vmatpush1.bf16.msra.mxu0 %v5916_v26  ;;  %4159 = vmatpush1.bf16.msra.mxu1 %v6000_v7 }
 0x2d9   :  { %4129 = vmatprep.subr.bf16.mxu0 %v5919_v35  ;;  %4161 = vmatprep.subr.bf16.mxu1 %v6003_v8 }
 0x2dc   :  { %4131 = vmatpush1.bf16.msra.mxu0 %v5922_v39  ;;  %4163 = vmatpush1.bf16.msra.mxu1 %v6008_v48 }
 0x2dd   :  { %4133 = vmatprep.subr.bf16.mxu0 %v5925_v44  ;;  %4165 = vmatprep.subr.bf16.mxu1 %v6011_v17 }
 0x2e0   :  { %4135 = vmatpush1.bf16.msra.mxu0 %v5928_v52  ;;  %4167 = vmatpush1.bf16.msra.mxu1 %v6016_v56 }
 0x2e1   :  { %4137 = vmatprep.subr.bf16.mxu0 %v5931_v57  ;;  %4169 = vmatprep.subr.bf16.mxu1 %v6019_v25 }
 0x2e4   :  { %4139 = vmatpush1.bf16.msra.mxu0 %v5934_v1  ;;  %4171 = vmatpush1.bf16.msra.mxu1 %v6024_v2 }
 0x2e5   :  { %4141 = vmatprep.subr.bf16.mxu0 %v5937_v6  ;;  %4173 = vmatprep.subr.bf16.mxu1 %v6027_v33 }
 0x2e8   :  { %4143 = vmatpush1.bf16.msra.mxu0 %v5940_v15  ;;  %4175 = vmatpush1.bf16.msra.mxu1 %v6032_v11 }
 0x2e9   :  { %4145 = vmatprep.subr.bf16.mxu0 %v5943_v20  ;;  %4177 = vmatprep.subr.bf16.mxu1 %v6035_v43 }
 0x2ec   :  { %4147 = vmatpush1.bf16.msra.mxu0 %v5946_v29  ;;  %4179 = vmatpush1.bf16.msra.mxu1 %v6040_v21 }
 0x2ed   :  { %4149 = vmatprep.subr.bf16.mxu0 %v5949_v34  ;;  %4181 = vmatprep.subr.bf16.mxu1 %v6043_v50 }
 0x2f0   :  { %4151 = vmatpush1.bf16.msra.mxu0 %v5952_v41  ;;  %4183 = vmatpush1.bf16.msra.mxu1 %v6048_v58 }
 0x2f1   :  { %4185 = vmatprep.subr.bf16.mxu0 %v6056_v60  ;;  %4249 = vmatprep.subr.bf16.mxu1 %v6058_v5 }
 0x2f3   :  { %1415 = vmatmul.mubr.f32.vlgmr.msra.gmra.mrb[8].mxu0 %v1178_v27  ;;  %1486 = vmatmul.mubr.f32.vlgmr.msra.gmra.mrb[20].mxu1 %v1178_v27  ;;  %v7465_v27 = vld [vmem:[#allocation36_spill] sm:$0xff] }
 0x2f4   :  { %4187 = vmatpush1.bf16.msra.mxu0 %v6060_v10  ;;  %4251 = vmatpush1.bf16.msra.mxu1 %v6063_v14 }
 0x2f5   :  { %4189 = vmatprep.subr.bf16.mxu0 %v6068_v23  ;;  %4253 = vmatprep.subr.bf16.mxu1 %v6070_v30 }
 0x2f8   :  { %4191 = vmatpush1.bf16.msra.mxu0 %v6072_v32  ;;  %4255 = vmatpush1.bf16.msra.mxu1 %v6075_v40 }
 0x2f9   :  { %4193 = vmatprep.subr.bf16.mxu0 %v6079_v49  ;;  %4257 = vmatprep.subr.bf16.mxu1 %v7449_v4 }
 0x2fc   :  { %4195 = vmatpush1.bf16.msra.mxu0 %v7450_v45  ;;  %4259 = vmatpush1.bf16.msra.mxu1 %v7451_v28 }
 0x2fd   :  { %4197 = vmatprep.subr.bf16.mxu0 %v7452_v55  ;;  %4261 = vmatprep.subr.bf16.mxu1 %v7453_v12 }
 0x300   :  { %4199 = vmatpush1.bf16.msra.mxu0 %v7454_v36  ;;  %4263 = vmatpush1.bf16.msra.mxu1 %v7455_v18  ;;  %v7506_v18 = vld [vmem:[#allocation87_spill] sm:$0xff] }
 0x301   :  { %4201 = vmatprep.subr.bf16.mxu0 %v7456_v51  ;;  %4265 = vmatprep.subr.bf16.mxu1 %v7457_v0  ;;  %v7467_v51 = vld [vmem:[#allocation38_spill] sm:$0xff]  ;;  %v7468_v0 = vld [vmem:[#allocation39_spill] sm:$0xff] }
 0x304   :  { %4203 = vmatpush1.bf16.msra.mxu0 %v7458_v37  ;;  %4267 = vmatpush1.bf16.msra.mxu1 %v7459_v59  ;;  %v7469_v37 = vld [vmem:[#allocation40_spill] sm:$0xff]  ;;  %v7470_v59 = vld [vmem:[#allocation41_spill] sm:$0xff] }
 0x305   :  { %4205 = vmatprep.subr.bf16.mxu0 %v7460_v53  ;;  %4269 = vmatprep.subr.bf16.mxu1 %v7461_v9  ;;  %v7471_v53 = vld [vmem:[#allocation42_spill] sm:$0xff]  ;;  %v7472_v9 = vld [vmem:[#allocation43_spill] sm:$0xff] }
 0x308   :  { %4207 = vmatpush1.bf16.msra.mxu0 %v7462_v47  ;;  %4271 = vmatpush1.bf16.msra.mxu1 %v7463_v42  ;;  %v7473_v47 = vld [vmem:[#allocation44_spill] sm:$0xff]  ;;  %v7474_v42 = vld [vmem:[#allocation45_spill] sm:$0xff] }
 0x309   :  { %4209 = vmatprep.subr.bf16.mxu0 %v7464_v31  ;;  %4273 = vmatprep.subr.bf16.mxu1 %v7465_v27  ;;  %v7475_v31 = vld [vmem:[#allocation46_spill] sm:$0xff]  ;;  %v7476_v27 = vld [vmem:[#allocation47_spill] sm:$0xff] }
 0x30c   :  { %4211 = vmatpush1.bf16.msra.mxu0 %v7466_v19  ;;  %4275 = vmatpush1.bf16.msra.mxu1 %v7467_v51  ;;  %v7477_v19 = vld [vmem:[#allocation48_spill] sm:$0xff]  ;;  %v7478_v51 = vld [vmem:[#allocation49_spill] sm:$0xff] }
 0x30d   :  { %4213 = vmatprep.subr.bf16.mxu0 %v7468_v0  ;;  %4277 = vmatprep.subr.bf16.mxu1 %v7469_v37  ;;  %v7479_v0 = vld [vmem:[#allocation50_spill] sm:$0xff]  ;;  %v7480_v37 = vld [vmem:[#allocation51_spill] sm:$0xff] }
 0x310   :  { %4215 = vmatpush1.bf16.msra.mxu0 %v7470_v59  ;;  %4279 = vmatpush1.bf16.msra.mxu1 %v7471_v53  ;;  %v7481_v59 = vld [vmem:[#allocation52_spill] sm:$0xff]  ;;  %v7482_v53 = vld [vmem:[#allocation53_spill] sm:$0xff] }
 0x311   :  { %4217 = vmatprep.subr.bf16.mxu0 %v7472_v9  ;;  %4281 = vmatprep.subr.bf16.mxu1 %v7473_v47  ;;  %v7483_v9 = vld [vmem:[#allocation54_spill] sm:$0xff]  ;;  %v7484_v47 = vld [vmem:[#allocation55_spill] sm:$0xff] }
 0x314   :  { %4219 = vmatpush1.bf16.msra.mxu0 %v7474_v42  ;;  %4283 = vmatpush1.bf16.msra.mxu1 %v7475_v31  ;;  %v7485_v42 = vld [vmem:[#allocation56_spill] sm:$0xff]  ;;  %v7486_v31 = vld [vmem:[#allocation57_spill] sm:$0xff] }
 0x315   :  { %4221 = vmatprep.subr.bf16.mxu0 %v7476_v27  ;;  %4285 = vmatprep.subr.bf16.mxu1 %v7477_v19  ;;  %v7487_v27 = vld [vmem:[#allocation58_spill] sm:$0xff]  ;;  %v7488_v19 = vld [vmem:[#allocation59_spill] sm:$0xff] }
 0x318   :  { %4223 = vmatpush1.bf16.msra.mxu0 %v7478_v51  ;;  %4287 = vmatpush1.bf16.msra.mxu1 %v7479_v0  ;;  %v7489_v51 = vld [vmem:[#allocation60_spill] sm:$0xff]  ;;  %v7490_v0 = vld [vmem:[#allocation61_spill] sm:$0xff] }
 0x319   :  { %4225 = vmatprep.subr.bf16.mxu0 %v7480_v37  ;;  %4289 = vmatprep.subr.bf16.mxu1 %v7481_v59  ;;  %v7491_v37 = vld [vmem:[#allocation62_spill] sm:$0xff]  ;;  %v7492_v59 = vld [vmem:[#allocation63_spill] sm:$0xff] }
 0x31c   :  { %4227 = vmatpush1.bf16.msra.mxu0 %v7482_v53  ;;  %4291 = vmatpush1.bf16.msra.mxu1 %v7483_v9  ;;  %v7493_v53 = vld [vmem:[#allocation64_spill] sm:$0xff]  ;;  %v7494_v9 = vld [vmem:[#allocation65_spill] sm:$0xff] }
 0x31d   :  { %4229 = vmatprep.subr.bf16.mxu0 %v7484_v47  ;;  %4293 = vmatprep.subr.bf16.mxu1 %v7485_v42  ;;  %v7495_v47 = vld [vmem:[#allocation66_spill] sm:$0xff]  ;;  %v7496_v42 = vld [vmem:[#allocation67_spill] sm:$0xff] }
 0x320   :  { %4231 = vmatpush1.bf16.msra.mxu0 %v7486_v31  ;;  %4295 = vmatpush1.bf16.msra.mxu1 %v7487_v27  ;;  %v7497_v31 = vld [vmem:[#allocation68_spill] sm:$0xff]  ;;  %v7498_v27 = vld [vmem:[#allocation69_spill] sm:$0xff] }
 0x321   :  { %4233 = vmatprep.subr.bf16.mxu0 %v7488_v19  ;;  %4297 = vmatprep.subr.bf16.mxu1 %v7489_v51  ;;  %v7499_v19 = vld [vmem:[#allocation70_spill] sm:$0xff]  ;;  %v7500_v51 = vld [vmem:[#allocation71_spill] sm:$0xff] }
 0x324   :  { %4235 = vmatpush1.bf16.msra.mxu0 %v7490_v0  ;;  %4299 = vmatpush1.bf16.msra.mxu1 %v7491_v37  ;;  %v7501_v0 = vld [vmem:[#allocation72_spill] sm:$0xff]  ;;  %v7502_v37 = vld [vmem:[#allocation73_spill] sm:$0xff] }
 0x325   :  { %4237 = vmatprep.subr.bf16.mxu0 %v7492_v59  ;;  %4301 = vmatprep.subr.bf16.mxu1 %v7493_v53  ;;  %v7503_v59 = vld [vmem:[#allocation74_spill] sm:$0xff] }
 0x326   :  { %v7504_v53 = vld [vmem:[#allocation18_spill] sm:$0xff] }
 0x328   :  { %4239 = vmatpush1.bf16.msra.mxu0 %v7494_v9  ;;  %4303 = vmatpush1.bf16.msra.mxu1 %v7495_v47  ;;  %v7505_v9 = vld [vmem:[#allocation19_spill] sm:$0xff] }
 0x329   :  { %4241 = vmatprep.subr.bf16.mxu0 %v7496_v42  ;;  %4305 = vmatprep.subr.bf16.mxu1 %v7497_v31 }
 0x32c   :  { %4243 = vmatpush1.bf16.msra.mxu0 %v7498_v27  ;;  %4307 = vmatpush1.bf16.msra.mxu1 %v7499_v19 }
 0x32d   :  { %4245 = vmatprep.subr.bf16.mxu0 %v7500_v51  ;;  %4309 = vmatprep.subr.bf16.mxu1 %v7501_v0  ;;  %v7507_v0 = vld [vmem:[#allocation88_spill] sm:$0xff] }
 0x330   :  { %4247 = vmatpush1.bf16.msra.mxu0 %v7502_v37  ;;  %4311 = vmatpush1.bf16.msra.mxu1 %v7503_v59 }
 0x331   :  { %4313 = vmatprep.subr.bf16.mxu0 %v7504_v53  ;;  %4345 = vmatprep.subr.bf16.mxu1 %v7505_v9 }
 0x3a6   :  { %v1245_v47 = vpop.f32.mrb[6].mxu0  ;;  %v1316_v42 = vpop.f32.mrb[34].mxu1 }
 0x3a7   :  { %v1246_v31 = vadd.f32 %v1245_v47, %v7506_v18  ;;  %v1247_v36 = vpop.f32.mrb[7].mxu0  ;;  %v1318_v27 = vpop.f32.mrb[35].mxu1  ;;  %v1317_v59 = vadd.f32 %v1316_v42, %v6422_v54  ;;  %v7508_v42 = vld [vmem:[#allocation75_spill] sm:$0xff] }
 0x3a8   :  { %v1248_v19 = vadd.f32 %v1247_v36, %v6411_v3  ;;  %v1319_v37 = vadd.f32 %v1318_v27, %v7507_v0 }
 0x3a9   :  { %v3564_v12 = vmul.f32 -1.442695, %v1246_v31 }
 0x3aa   :  { %v3565_v51 = vmul.f32 -1.442695, %v1248_v19  ;;  %v3566_v55 = vmul.f32 -1.442695, %v1319_v37 }
 0x3ab   :  { %5427 = vpow2.f32 %v3564_v12 }
 0x3ac   :  { %5429 = vpow2.f32 %v3565_v51 }
 0x3ad   :  { %5431 = vpow2.f32 %v3566_v55 }
 0x3ae   :  { %5433 = vtanh.f32 %v1317_v59 }
 0x3b5   :  { %v5428_v53 = vpop.eup %5427 }
 0x3b6   :  { %v5430_v28 = vpop.eup %5429  ;;  %v1324_v9 = vadd.f32 1.0, %v5428_v53 }
 0x3b7   :  { %v1330_v45 = vadd.f32 1.0, %v5430_v28  ;;  %v5432_v47 = vpop.eup %5431  ;;  %v7509_v28 = vld [vmem:[#allocation76_spill] sm:$0xff] }
 0x3b8   :  { %5435 = vrcp.f32 %v1324_v9  ;;  %v5434_v18 = vpop.eup %5433  ;;  %v1337_v12 = vadd.f32 1.0, %v5432_v47 }
 0x3b9   :  { %5437 = vrcp.f32 %v1330_v45 }
 0x3ba   :  { %5439 = vrcp.f32 %v1337_v12 }
 0x3c2   :  { %v5436_v36 = vpop.eup %5435 }
 0x3c3   :  { %v5438_v31 = vpop.eup %5437  ;;  %v1341_v19 = vmul.f32 %v5436_v36, %v5434_v18 }
 0x3c4   :  { %v1340_v51 = vmul.f32 %v5438_v31, %v6425_v16  ;;  %v5440_v16 = vpop.eup %5439 }
 0x3c6   :  { %v1416_v27 = vpop.f32.mrb[8].mxu0  ;;  %v1487_v37 = vpop.f32.mrb[20].mxu1  ;;  %v6543_v0 = vadd.f32 %v1341_v19, %v1340_v51 }
 0x3c7   :  { %v1492_v53 = vadd.f32 %v1416_v27, %v7508_v42  ;;  %v1418_v55 = vpop.f32.mrb[9].mxu0  ;;  %v1489_v59 = vpop.f32.mrb[21].mxu1  ;;  %v5340_v31 = vadd.f32 %v1487_v37, %v6293_v38 }
 0x3c8   :  { %v1493_v9 = vadd.f32 %v1418_v55, %v7509_v28  ;;  %5441 = vtanh.f32 %v6543_v0  ;;  %v5341_v18 = vadd.f32 %v1489_v59, %v6297_v63 }
 0x3c9   :  { %v3567_v45 = vmul.f32 -1.442695, %v1492_v53 }
 0x3ca   :  { %v3568_v54 = vmul.f32 -1.442695, %v1493_v9  ;;  %v3569_v36 = vmul.f32 -1.442695, %v5341_v18 }
 0x3cb   :  { %5443 = vpow2.f32 %v3567_v45 }
 0x3cc   :  { %5445 = vpow2.f32 %v3568_v54 }
 0x3cd   :  { %5447 = vpow2.f32 %v3569_v36  ;;  %v7512_v36 = vld [vmem:[#allocation22_spill] sm:$0xff] }
 0x3ce   :  { %5449 = vtanh.f32 %v5340_v31  ;;  %v7513_v31 = vld [vmem:[#allocation23_spill] sm:$0xff] }
 0x3d2   :  { %v5442_v47 = vpop.eup %5441 }
 0x3d3   :  { %v6550_v19 = vmul.f32 %v5442_v47, %v5440_v16 }
 0x3d5   :  { %7510 = vst [vmem:[#allocation20_spill] sm:$0xff] %v6550_v19  ;;  %v5444_v12 = vpop.eup %5443  ;;  %1584 = vmatprep.mubr.f32.mxu0 %v6550_v19  ;;  %1655 = vmatprep.mubr.f32.mxu1 %v6550_v19  ;;  %v7528_v19 = vld [vmem:[#allocation38_spill] sm:$0xff] }
 0x3d6   :  { %v5446_v51 = vpop.eup %5445  ;;  %v1499_v27 = vadd.f32 1.0, %v5444_v12  ;;  %v7514_v12 = vld [vmem:[#allocation24_spill] sm:$0xff] }
 0x3d7   :  { %v1505_v42 = vadd.f32 1.0, %v5446_v51  ;;  %v5448_v54 = vpop.eup %5447  ;;  %v7515_v51 = vld [vmem:[#allocation25_spill] sm:$0xff] }
 0x3d8   :  { %5451 = vrcp.f32 %v1499_v27  ;;  %v5450_v53 = vpop.eup %5449  ;;  %v1512_v37 = vadd.f32 1.0, %v5448_v54  ;;  %v7516_v27 = vld [vmem:[#allocation26_spill] sm:$0xff]  ;;  %v7518_v54 = vld [vmem:[#allocation28_spill] sm:$0xff] }
 0x3d9   :  { %5453 = vrcp.f32 %v1505_v42  ;;  %v7517_v42 = vld [vmem:[#allocation27_spill] sm:$0xff] }
 0x3da   :  { %5455 = vrcp.f32 %v1512_v37  ;;  %v7523_v37 = vld [vmem:[#allocation33_spill] sm:$0xff] }
 0x3e2   :  { %v5452_v55 = vpop.eup %5451 }
 0x3e3   :  { %v5454_v59 = vpop.eup %5453  ;;  %v1516_v28 = vmul.f32 %v5452_v55, %v5450_v53  ;;  %v7519_v53 = vld [vmem:[#allocation29_spill] sm:$0xff]  ;;  %v7520_v55 = vld [vmem:[#allocation30_spill] sm:$0xff] }
 0x3e4   :  { %v1515_v9 = vmul.f32 %v5454_v59, %v6437_v24  ;;  %v5456_v18 = vpop.eup %5455  ;;  %v7511_v24 = vld [vmem:[#allocation21_spill] sm:$0xff]  ;;  %v7521_v59 = vld [vmem:[#allocation31_spill] sm:$0xff] }
 0x3e6   :  { %v6555_v45 = vadd.f32 %v1516_v28, %v1515_v9  ;;  %v7522_v28 = vld [vmem:[#allocation32_spill] sm:$0xff]  ;;  %v7524_v9 = vld [vmem:[#allocation34_spill] sm:$0xff] }
 0x3e8   :  { %5457 = vtanh.f32 %v6555_v45 }
 0x3f2   :  { %v5458_v16 = vpop.eup %5457 }
 0x3f3   :  { %v1519_v47 = vmul.f32 %v5458_v16, %v5456_v18  ;;  %v7525_v18 = vld [vmem:[#allocation35_spill] sm:$0xff]  ;;  %v7526_v16 = vld [vmem:[#allocation36_spill] sm:$0xff] }
 0x3f5   :  { %1585 = vmatmul.mubr.f32.vlgmr.msra.gmra.mrb[10].mxu0 %v1519_v47  ;;  %1656 = vmatmul.mubr.f32.vlgmr.msra.gmra.mrb[36].mxu1 %v1519_v47 }
 0x3f6   :  { %4315 = vmatpush1.bf16.msra.mxu0 %v5910_v13  ;;  %4347 = vmatpush1.bf16.msra.mxu1 %v5992_v61 }
 0x3f7   :  { %4317 = vmatprep.subr.bf16.mxu0 %v5914_v22  ;;  %4349 = vmatprep.subr.bf16.mxu1 %v5995_v62 }
 0x3f8   :  { %1755 = vmatprep.mubr.f32.mxu0 %v7386_v46  ;;  %1826 = vmatprep.mubr.f32.mxu1 %v7386_v46 }
 0x3fa   :  { %4319 = vmatpush1.bf16.msra.mxu0 %v5916_v26  ;;  %4351 = vmatpush1.bf16.msra.mxu1 %v6000_v7 }
 0x3fb   :  { %4321 = vmatprep.subr.bf16.mxu0 %v5919_v35  ;;  %4353 = vmatprep.subr.bf16.mxu1 %v6003_v8 }
 0x3fe   :  { %4323 = vmatpush1.bf16.msra.mxu0 %v5922_v39  ;;  %4355 = vmatpush1.bf16.msra.mxu1 %v6008_v48 }
 0x3ff   :  { %4325 = vmatprep.subr.bf16.mxu0 %v5925_v44  ;;  %4357 = vmatprep.subr.bf16.mxu1 %v6011_v17 }
 0x402   :  { %4327 = vmatpush1.bf16.msra.mxu0 %v5928_v52  ;;  %4359 = vmatpush1.bf16.msra.mxu1 %v6016_v56 }
 0x403   :  { %4329 = vmatprep.subr.bf16.mxu0 %v5931_v57  ;;  %4361 = vmatprep.subr.bf16.mxu1 %v6019_v25 }
 0x406   :  { %4331 = vmatpush1.bf16.msra.mxu0 %v5934_v1  ;;  %4363 = vmatpush1.bf16.msra.mxu1 %v6024_v2 }
 0x407   :  { %4333 = vmatprep.subr.bf16.mxu0 %v5937_v6  ;;  %4365 = vmatprep.subr.bf16.mxu1 %v6027_v33 }
 0x40a   :  { %4335 = vmatpush1.bf16.msra.mxu0 %v5940_v15  ;;  %4367 = vmatpush1.bf16.msra.mxu1 %v6032_v11 }
 0x40b   :  { %4337 = vmatprep.subr.bf16.mxu0 %v5943_v20  ;;  %4369 = vmatprep.subr.bf16.mxu1 %v6035_v43 }
 0x40e   :  { %4339 = vmatpush1.bf16.msra.mxu0 %v5946_v29  ;;  %4371 = vmatpush1.bf16.msra.mxu1 %v6040_v21 }
 0x40f   :  { %4341 = vmatprep.subr.bf16.mxu0 %v5949_v34  ;;  %4373 = vmatprep.subr.bf16.mxu1 %v6043_v50 }
 0x412   :  { %4343 = vmatpush1.bf16.msra.mxu0 %v5952_v41  ;;  %4375 = vmatpush1.bf16.msra.mxu1 %v6048_v58 }
 0x413   :  { %4377 = vmatprep.subr.bf16.mxu0 %v6056_v60  ;;  %4441 = vmatprep.subr.bf16.mxu1 %v6058_v5 }
 0x415   :  { %1756 = vmatmul.mubr.f32.vlgmr.msra.gmra.mrb[12].mxu0 %v1519_v47  ;;  %1827 = vmatmul.mubr.f32.vlgmr.msra.gmra.mrb[22].mxu1 %v1519_v47  ;;  %v7527_v47 = vld [vmem:[#allocation37_spill] sm:$0xff] }
 0x416   :  { %4379 = vmatpush1.bf16.msra.mxu0 %v6060_v10  ;;  %4443 = vmatpush1.bf16.msra.mxu1 %v6063_v14 }
 0x417   :  { %4381 = vmatprep.subr.bf16.mxu0 %v6068_v23  ;;  %4445 = vmatprep.subr.bf16.mxu1 %v6070_v30 }
 0x41a   :  { %4383 = vmatpush1.bf16.msra.mxu0 %v6072_v32  ;;  %4447 = vmatpush1.bf16.msra.mxu1 %v6075_v40 }
 0x41b   :  { %4385 = vmatprep.subr.bf16.mxu0 %v6079_v49  ;;  %4449 = vmatprep.subr.bf16.mxu1 %v7449_v4 }
 0x41e   :  { %4387 = vmatpush1.bf16.msra.mxu0 %v7511_v24  ;;  %4451 = vmatpush1.bf16.msra.mxu1 %v7512_v36 }
 0x41f   :  { %4389 = vmatprep.subr.bf16.mxu0 %v7513_v31  ;;  %4453 = vmatprep.subr.bf16.mxu1 %v7514_v12 }
 0x422   :  { %4391 = vmatpush1.bf16.msra.mxu0 %v7515_v51  ;;  %4455 = vmatpush1.bf16.msra.mxu1 %v7516_v27 }
 0x423   :  { %4393 = vmatprep.subr.bf16.mxu0 %v7517_v42  ;;  %4457 = vmatprep.subr.bf16.mxu1 %v7518_v54  ;;  %v7529_v54 = vld [vmem:[#allocation39_spill] sm:$0xff] }
 0x424   :  { %v7567_v42 = vld [vmem:[#allocation87_spill] sm:$0xff] }
 0x426   :  { %4395 = vmatpush1.bf16.msra.mxu0 %v7519_v53  ;;  %4459 = vmatpush1.bf16.msra.mxu1 %v7520_v55  ;;  %v7530_v53 = vld [vmem:[#allocation40_spill] sm:$0xff]  ;;  %v7531_v55 = vld [vmem:[#allocation41_spill] sm:$0xff] }
 0x427   :  { %4397 = vmatprep.subr.bf16.mxu0 %v7521_v59  ;;  %4461 = vmatprep.subr.bf16.mxu1 %v7522_v28  ;;  %v7532_v59 = vld [vmem:[#allocation42_spill] sm:$0xff]  ;;  %v7533_v28 = vld [vmem:[#allocation43_spill] sm:$0xff] }
 0x42a   :  { %4399 = vmatpush1.bf16.msra.mxu0 %v7523_v37  ;;  %4463 = vmatpush1.bf16.msra.mxu1 %v7524_v9  ;;  %v7534_v37 = vld [vmem:[#allocation44_spill] sm:$0xff]  ;;  %v7535_v9 = vld [vmem:[#allocation45_spill] sm:$0xff] }
 0x42b   :  { %4401 = vmatprep.subr.bf16.mxu0 %v7525_v18  ;;  %4465 = vmatprep.subr.bf16.mxu1 %v7526_v16  ;;  %v7536_v18 = vld [vmem:[#allocation46_spill] sm:$0xff]  ;;  %v7537_v16 = vld [vmem:[#allocation47_spill] sm:$0xff] }
 0x42e   :  { %4403 = vmatpush1.bf16.msra.mxu0 %v7527_v47  ;;  %4467 = vmatpush1.bf16.msra.mxu1 %v7528_v19  ;;  %v7538_v47 = vld [vmem:[#allocation48_spill] sm:$0xff]  ;;  %v7539_v19 = vld [vmem:[#allocation49_spill] sm:$0xff] }
 0x42f   :  { %4405 = vmatprep.subr.bf16.mxu0 %v7529_v54  ;;  %4469 = vmatprep.subr.bf16.mxu1 %v7530_v53  ;;  %v7540_v54 = vld [vmem:[#allocation50_spill] sm:$0xff]  ;;  %v7541_v53 = vld [vmem:[#allocation51_spill] sm:$0xff] }
 0x432   :  { %4407 = vmatpush1.bf16.msra.mxu0 %v7531_v55  ;;  %4471 = vmatpush1.bf16.msra.mxu1 %v7532_v59  ;;  %v7542_v55 = vld [vmem:[#allocation52_spill] sm:$0xff]  ;;  %v7543_v59 = vld [vmem:[#allocation53_spill] sm:$0xff] }
 0x433   :  { %4409 = vmatprep.subr.bf16.mxu0 %v7533_v28  ;;  %4473 = vmatprep.subr.bf16.mxu1 %v7534_v37  ;;  %v7544_v28 = vld [vmem:[#allocation54_spill] sm:$0xff]  ;;  %v7545_v37 = vld [vmem:[#allocation55_spill] sm:$0xff] }
 0x436   :  { %4411 = vmatpush1.bf16.msra.mxu0 %v7535_v9  ;;  %4475 = vmatpush1.bf16.msra.mxu1 %v7536_v18  ;;  %v7546_v9 = vld [vmem:[#allocation56_spill] sm:$0xff]  ;;  %v7547_v18 = vld [vmem:[#allocation57_spill] sm:$0xff] }
 0x437   :  { %4413 = vmatprep.subr.bf16.mxu0 %v7537_v16  ;;  %4477 = vmatprep.subr.bf16.mxu1 %v7538_v47  ;;  %v7548_v16 = vld [vmem:[#allocation58_spill] sm:$0xff]  ;;  %v7549_v47 = vld [vmem:[#allocation59_spill] sm:$0xff] }
 0x43a   :  { %4415 = vmatpush1.bf16.msra.mxu0 %v7539_v19  ;;  %4479 = vmatpush1.bf16.msra.mxu1 %v7540_v54  ;;  %v7550_v19 = vld [vmem:[#allocation60_spill] sm:$0xff]  ;;  %v7551_v54 = vld [vmem:[#allocation61_spill] sm:$0xff] }
 0x43b   :  { %4417 = vmatprep.subr.bf16.mxu0 %v7541_v53  ;;  %4481 = vmatprep.subr.bf16.mxu1 %v7542_v55  ;;  %v7552_v53 = vld [vmem:[#allocation62_spill] sm:$0xff]  ;;  %v7553_v55 = vld [vmem:[#allocation63_spill] sm:$0xff] }
 0x43e   :  { %4419 = vmatpush1.bf16.msra.mxu0 %v7543_v59  ;;  %4483 = vmatpush1.bf16.msra.mxu1 %v7544_v28  ;;  %v7554_v59 = vld [vmem:[#allocation64_spill] sm:$0xff]  ;;  %v7555_v28 = vld [vmem:[#allocation65_spill] sm:$0xff] }
 0x43f   :  { %4421 = vmatprep.subr.bf16.mxu0 %v7545_v37  ;;  %4485 = vmatprep.subr.bf16.mxu1 %v7546_v9  ;;  %v7556_v37 = vld [vmem:[#allocation66_spill] sm:$0xff]  ;;  %v7557_v9 = vld [vmem:[#allocation67_spill] sm:$0xff] }
 0x442   :  { %4423 = vmatpush1.bf16.msra.mxu0 %v7547_v18  ;;  %4487 = vmatpush1.bf16.msra.mxu1 %v7548_v16  ;;  %v7558_v18 = vld [vmem:[#allocation68_spill] sm:$0xff]  ;;  %v7559_v16 = vld [vmem:[#allocation69_spill] sm:$0xff] }
 0x443   :  { %4425 = vmatprep.subr.bf16.mxu0 %v7549_v47  ;;  %4489 = vmatprep.subr.bf16.mxu1 %v7550_v19  ;;  %v7560_v47 = vld [vmem:[#allocation70_spill] sm:$0xff]  ;;  %v7561_v19 = vld [vmem:[#allocation71_spill] sm:$0xff] }
 0x446   :  { %4427 = vmatpush1.bf16.msra.mxu0 %v7551_v54  ;;  %4491 = vmatpush1.bf16.msra.mxu1 %v7552_v53  ;;  %v7562_v54 = vld [vmem:[#allocation72_spill] sm:$0xff]  ;;  %v7563_v53 = vld [vmem:[#allocation73_spill] sm:$0xff] }
 0x447   :  { %4429 = vmatprep.subr.bf16.mxu0 %v7553_v55  ;;  %4493 = vmatprep.subr.bf16.mxu1 %v7554_v59  ;;  %v7564_v55 = vld [vmem:[#allocation74_spill] sm:$0xff] }
 0x448   :  { %v7565_v59 = vld [vmem:[#allocation18_spill] sm:$0xff] }
 0x44a   :  { %4431 = vmatpush1.bf16.msra.mxu0 %v7555_v28  ;;  %4495 = vmatpush1.bf16.msra.mxu1 %v7556_v37  ;;  %v7566_v28 = vld [vmem:[#allocation19_spill] sm:$0xff] }
 0x44b   :  { %4433 = vmatprep.subr.bf16.mxu0 %v7557_v9  ;;  %4497 = vmatprep.subr.bf16.mxu1 %v7558_v18 }
 0x44e   :  { %4435 = vmatpush1.bf16.msra.mxu0 %v7559_v16  ;;  %4499 = vmatpush1.bf16.msra.mxu1 %v7560_v47 }
 0x44f   :  { %4437 = vmatprep.subr.bf16.mxu0 %v7561_v19  ;;  %4501 = vmatprep.subr.bf16.mxu1 %v7562_v54  ;;  %v7568_v54 = vld [vmem:[#allocation88_spill] sm:$0xff] }
 0x452   :  { %4439 = vmatpush1.bf16.msra.mxu0 %v7563_v53  ;;  %4503 = vmatpush1.bf16.msra.mxu1 %v7564_v55  ;;  %v7569_v55 = vld [vmem:[#allocation89_spill] sm:$0xff] }
 0x453   :  { %4505 = vmatprep.subr.bf16.mxu0 %v7565_v59  ;;  %4537 = vmatprep.subr.bf16.mxu1 %v7566_v28 }
 0x4c8   :  { %v1586_v37 = vpop.f32.mrb[10].mxu0  ;;  %v1657_v9 = vpop.f32.mrb[36].mxu1 }
 0x4c9   :  { %v1587_v18 = vadd.f32 %v1586_v37, %v7567_v42  ;;  %v1588_v27 = vpop.f32.mrb[11].mxu0  ;;  %v1659_v16 = vpop.f32.mrb[37].mxu1  ;;  %v1658_v31 = vadd.f32 %v1657_v9, %v7569_v55  ;;  %v7570_v9 = vld [vmem:[#allocation77_spill] sm:$0xff] }
 0x4ca   :  { %v1589_v47 = vadd.f32 %v1588_v27, %v6411_v3  ;;  %v1660_v53 = vadd.f32 %v1659_v16, %v7568_v54 }
 0x4cb   :  { %v3570_v51 = vmul.f32 -1.442695, %v1587_v18 }
 0x4cc   :  { %v3571_v19 = vmul.f32 -1.442695, %v1589_v47  ;;  %v3572_v12 = vmul.f32 -1.442695, %v1660_v53 }
 0x4cd   :  { %5459 = vpow2.f32 %v3570_v51 }
 0x4ce   :  { %5461 = vpow2.f32 %v3571_v19 }
 0x4cf   :  { %5463 = vpow2.f32 %v3572_v12 }
 0x4d0   :  { %5465 = vtanh.f32 %v1658_v31 }
 0x4d7   :  { %v5460_v59 = vpop.eup %5459 }
 0x4d8   :  { %v5462_v36 = vpop.eup %5461  ;;  %v1665_v28 = vadd.f32 1.0, %v5460_v59 }
 0x4d9   :  { %v1671_v24 = vadd.f32 1.0, %v5462_v36  ;;  %v5464_v37 = vpop.eup %5463  ;;  %v7571_v36 = vld [vmem:[#allocation78_spill] sm:$0xff] }
 0x4da   :  { %5467 = vrcp.f32 %v1665_v28  ;;  %v5466_v42 = vpop.eup %5465  ;;  %v1678_v51 = vadd.f32 1.0, %v5464_v37 }
 0x4db   :  { %5469 = vrcp.f32 %v1671_v24 }
 0x4dc   :  { %5471 = vrcp.f32 %v1678_v51 }
 0x4e4   :  { %v5468_v27 = vpop.eup %5467 }
 0x4e5   :  { %v5470_v18 = vpop.eup %5469  ;;  %v1682_v47 = vmul.f32 %v5468_v27, %v5466_v42 }
 0x4e6   :  { %v1681_v19 = vmul.f32 %v5470_v18, %v6543_v0  ;;  %v5472_v0 = vpop.eup %5471 }
 0x4e8   :  { %v1757_v16 = vpop.f32.mrb[12].mxu0  ;;  %v1828_v53 = vpop.f32.mrb[22].mxu1  ;;  %v6661_v54 = vadd.f32 %v1682_v47, %v1681_v19 }
 0x4e9   :  { %v1833_v59 = vadd.f32 %v1757_v16, %v7570_v9  ;;  %v1759_v12 = vpop.f32.mrb[13].mxu0  ;;  %v1830_v31 = vpop.f32.mrb[23].mxu1  ;;  %v5342_v18 = vadd.f32 %v1828_v53, %v6293_v38 }
 0x4ea   :  { %v1834_v28 = vadd.f32 %v1759_v12, %v7571_v36  ;;  %5473 = vtanh.f32 %v6661_v54  ;;  %v5343_v42 = vadd.f32 %v1830_v31, %v6297_v63 }
 0x4eb   :  { %v3573_v24 = vmul.f32 -1.442695, %v1833_v59 }
 0x4ec   :  { %v3574_v55 = vmul.f32 -1.442695, %v1834_v28  ;;  %v3575_v27 = vmul.f32 -1.442695, %v5343_v42 }
 0x4ed   :  { %5475 = vpow2.f32 %v3573_v24 }
 0x4ee   :  { %5477 = vpow2.f32 %v3574_v55 }
 0x4ef   :  { %5479 = vpow2.f32 %v3575_v27  ;;  %v7574_v27 = vld [vmem:[#allocation22_spill] sm:$0xff] }
 0x4f0   :  { %5481 = vtanh.f32 %v5342_v18  ;;  %v7575_v18 = vld [vmem:[#allocation23_spill] sm:$0xff] }
 0x4f4   :  { %v5474_v37 = vpop.eup %5473 }
 0x4f5   :  { %v6668_v47 = vmul.f32 %v5474_v37, %v5472_v0 }
 0x4f7   :  { %7572 = vst [vmem:[#allocation75_spill] sm:$0xff] %v6668_v47  ;;  %v5476_v51 = vpop.eup %5475  ;;  %1925 = vmatprep.mubr.f32.mxu0 %v6668_v47  ;;  %1996 = vmatprep.mubr.f32.mxu1 %v6668_v47  ;;  %v7590_v47 = vld [vmem:[#allocation38_spill] sm:$0xff] }
 0x4f8   :  { %v5478_v19 = vpop.eup %5477  ;;  %v1840_v16 = vadd.f32 1.0, %v5476_v51  ;;  %v7576_v51 = vld [vmem:[#allocation24_spill] sm:$0xff] }
 0x4f9   :  { %v1846_v9 = vadd.f32 1.0, %v5478_v19  ;;  %v5480_v55 = vpop.eup %5479  ;;  %v7577_v19 = vld [vmem:[#allocation25_spill] sm:$0xff] }
 0x4fa   :  { %5483 = vrcp.f32 %v1840_v16  ;;  %v5482_v59 = vpop.eup %5481  ;;  %v1853_v53 = vadd.f32 1.0, %v5480_v55  ;;  %v7578_v16 = vld [vmem:[#allocation26_spill] sm:$0xff]  ;;  %v7580_v55 = vld [vmem:[#allocation28_spill] sm:$0xff] }
 0x4fb   :  { %5485 = vrcp.f32 %v1846_v9  ;;  %v7579_v9 = vld [vmem:[#allocation27_spill] sm:$0xff] }
 0x4fc   :  { %5487 = vrcp.f32 %v1853_v53  ;;  %v7585_v53 = vld [vmem:[#allocation33_spill] sm:$0xff] }
 0x504   :  { %v5484_v12 = vpop.eup %5483 }
 0x505   :  { %v5486_v31 = vpop.eup %5485  ;;  %v1857_v36 = vmul.f32 %v5484_v12, %v5482_v59  ;;  %v7581_v59 = vld [vmem:[#allocation29_spill] sm:$0xff]  ;;  %v7582_v12 = vld [vmem:[#allocation30_spill] sm:$0xff] }
 0x506   :  { %v1856_v28 = vmul.f32 %v5486_v31, %v6555_v45  ;;  %v5488_v42 = vpop.eup %5487  ;;  %v7573_v45 = vld [vmem:[#allocation21_spill] sm:$0xff]  ;;  %v7583_v31 = vld [vmem:[#allocation31_spill] sm:$0xff] }
 0x508   :  { %v6673_v24 = vadd.f32 %v1857_v36, %v1856_v28  ;;  %v7584_v36 = vld [vmem:[#allocation32_spill] sm:$0xff]  ;;  %v7586_v28 = vld [vmem:[#allocation34_spill] sm:$0xff] }
 0x50a   :  { %5489 = vtanh.f32 %v6673_v24 }
 0x514   :  { %v5490_v0 = vpop.eup %5489 }
 0x515   :  { %v1860_v37 = vmul.f32 %v5490_v0, %v5488_v42  ;;  %v7587_v42 = vld [vmem:[#allocation35_spill] sm:$0xff]  ;;  %v7588_v0 = vld [vmem:[#allocation36_spill] sm:$0xff] }
 0x517   :  { %1926 = vmatmul.mubr.f32.vlgmr.msra.gmra.mrb[14].mxu0 %v1860_v37  ;;  %1997 = vmatmul.mubr.f32.vlgmr.msra.gmra.mrb[38].mxu1 %v1860_v37 }
 0x518   :  { %4507 = vmatpush1.bf16.msra.mxu0 %v5910_v13  ;;  %4539 = vmatpush1.bf16.msra.mxu1 %v5992_v61 }
 0x519   :  { %4509 = vmatprep.subr.bf16.mxu0 %v5914_v22  ;;  %4541 = vmatprep.subr.bf16.mxu1 %v5995_v62 }
 0x51a   :  { %2096 = vmatprep.mubr.f32.mxu0 %v7386_v46  ;;  %2167 = vmatprep.mubr.f32.mxu1 %v7386_v46 }
 0x51c   :  { %4511 = vmatpush1.bf16.msra.mxu0 %v5916_v26  ;;  %4543 = vmatpush1.bf16.msra.mxu1 %v6000_v7 }
 0x51d   :  { %4513 = vmatprep.subr.bf16.mxu0 %v5919_v35  ;;  %4545 = vmatprep.subr.bf16.mxu1 %v6003_v8 }
 0x520   :  { %4515 = vmatpush1.bf16.msra.mxu0 %v5922_v39  ;;  %4547 = vmatpush1.bf16.msra.mxu1 %v6008_v48 }
 0x521   :  { %4517 = vmatprep.subr.bf16.mxu0 %v5925_v44  ;;  %4549 = vmatprep.subr.bf16.mxu1 %v6011_v17 }
 0x524   :  { %4519 = vmatpush1.bf16.msra.mxu0 %v5928_v52  ;;  %4551 = vmatpush1.bf16.msra.mxu1 %v6016_v56 }
 0x525   :  { %4521 = vmatprep.subr.bf16.mxu0 %v5931_v57  ;;  %4553 = vmatprep.subr.bf16.mxu1 %v6019_v25 }
 0x528   :  { %4523 = vmatpush1.bf16.msra.mxu0 %v5934_v1  ;;  %4555 = vmatpush1.bf16.msra.mxu1 %v6024_v2 }
 0x529   :  { %4525 = vmatprep.subr.bf16.mxu0 %v5937_v6  ;;  %4557 = vmatprep.subr.bf16.mxu1 %v6027_v33 }
 0x52c   :  { %4527 = vmatpush1.bf16.msra.mxu0 %v5940_v15  ;;  %4559 = vmatpush1.bf16.msra.mxu1 %v6032_v11 }
 0x52d   :  { %4529 = vmatprep.subr.bf16.mxu0 %v5943_v20  ;;  %4561 = vmatprep.subr.bf16.mxu1 %v6035_v43 }
 0x530   :  { %4531 = vmatpush1.bf16.msra.mxu0 %v5946_v29  ;;  %4563 = vmatpush1.bf16.msra.mxu1 %v6040_v21 }
 0x531   :  { %4533 = vmatprep.subr.bf16.mxu0 %v5949_v34  ;;  %4565 = vmatprep.subr.bf16.mxu1 %v6043_v50 }
 0x534   :  { %4535 = vmatpush1.bf16.msra.mxu0 %v5952_v41  ;;  %4567 = vmatpush1.bf16.msra.mxu1 %v6048_v58 }
 0x535   :  { %4569 = vmatprep.subr.bf16.mxu0 %v6056_v60  ;;  %4633 = vmatprep.subr.bf16.mxu1 %v6058_v5 }
 0x537   :  { %2097 = vmatmul.mubr.f32.vlgmr.msra.gmra.mrb[16].mxu0 %v1860_v37  ;;  %2168 = vmatmul.mubr.f32.vlgmr.msra.gmra.mrb[24].mxu1 %v1860_v37  ;;  %v7589_v37 = vld [vmem:[#allocation37_spill] sm:$0xff] }
 0x538   :  { %4571 = vmatpush1.bf16.msra.mxu0 %v6060_v10  ;;  %4635 = vmatpush1.bf16.msra.mxu1 %v6063_v14 }
 0x539   :  { %4573 = vmatprep.subr.bf16.mxu0 %v6068_v23  ;;  %4637 = vmatprep.subr.bf16.mxu1 %v6070_v30 }
 0x53c   :  { %4575 = vmatpush1.bf16.msra.mxu0 %v6072_v32  ;;  %4639 = vmatpush1.bf16.msra.mxu1 %v6075_v40 }
 0x53d   :  { %4577 = vmatprep.subr.bf16.mxu0 %v6079_v49  ;;  %4641 = vmatprep.subr.bf16.mxu1 %v7449_v4 }
 0x540   :  { %4579 = vmatpush1.bf16.msra.mxu0 %v7573_v45  ;;  %4643 = vmatpush1.bf16.msra.mxu1 %v7574_v27 }
 0x541   :  { %4581 = vmatprep.subr.bf16.mxu0 %v7575_v18  ;;  %4645 = vmatprep.subr.bf16.mxu1 %v7576_v51 }
 0x544   :  { %4583 = vmatpush1.bf16.msra.mxu0 %v7577_v19  ;;  %4647 = vmatpush1.bf16.msra.mxu1 %v7578_v16 }
 0x545   :  { %4585 = vmatprep.subr.bf16.mxu0 %v7579_v9  ;;  %4649 = vmatprep.subr.bf16.mxu1 %v7580_v55  ;;  %v7591_v55 = vld [vmem:[#allocation39_spill] sm:$0xff] }
 0x546   :  { %v7629_v9 = vld [vmem:[#allocation87_spill] sm:$0xff] }
 0x548   :  { %4587 = vmatpush1.bf16.msra.mxu0 %v7581_v59  ;;  %4651 = vmatpush1.bf16.msra.mxu1 %v7582_v12  ;;  %v7592_v59 = vld [vmem:[#allocation40_spill] sm:$0xff]  ;;  %v7593_v12 = vld [vmem:[#allocation41_spill] sm:$0xff] }
 0x549   :  { %4589 = vmatprep.subr.bf16.mxu0 %v7583_v31  ;;  %4653 = vmatprep.subr.bf16.mxu1 %v7584_v36  ;;  %v7594_v31 = vld [vmem:[#allocation42_spill] sm:$0xff]  ;;  %v7595_v36 = vld [vmem:[#allocation43_spill] sm:$0xff] }
 0x54c   :  { %4591 = vmatpush1.bf16.msra.mxu0 %v7585_v53  ;;  %4655 = vmatpush1.bf16.msra.mxu1 %v7586_v28  ;;  %v7596_v53 = vld [vmem:[#allocation44_spill] sm:$0xff]  ;;  %v7597_v28 = vld [vmem:[#allocation45_spill] sm:$0xff] }
 0x54d   :  { %4593 = vmatprep.subr.bf16.mxu0 %v7587_v42  ;;  %4657 = vmatprep.subr.bf16.mxu1 %v7588_v0  ;;  %v7598_v42 = vld [vmem:[#allocation46_spill] sm:$0xff]  ;;  %v7599_v0 = vld [vmem:[#allocation47_spill] sm:$0xff] }
 0x550   :  { %4595 = vmatpush1.bf16.msra.mxu0 %v7589_v37  ;;  %4659 = vmatpush1.bf16.msra.mxu1 %v7590_v47  ;;  %v7600_v37 = vld [vmem:[#allocation48_spill] sm:$0xff]  ;;  %v7601_v47 = vld [vmem:[#allocation49_spill] sm:$0xff] }
 0x551   :  { %4597 = vmatprep.subr.bf16.mxu0 %v7591_v55  ;;  %4661 = vmatprep.subr.bf16.mxu1 %v7592_v59  ;;  %v7602_v55 = vld [vmem:[#allocation50_spill] sm:$0xff]  ;;  %v7603_v59 = vld [vmem:[#allocation51_spill] sm:$0xff] }
 0x554   :  { %4599 = vmatpush1.bf16.msra.mxu0 %v7593_v12  ;;  %4663 = vmatpush1.bf16.msra.mxu1 %v7594_v31  ;;  %v7604_v12 = vld [vmem:[#allocation52_spill] sm:$0xff]  ;;  %v7605_v31 = vld [vmem:[#allocation53_spill] sm:$0xff] }
 0x555   :  { %4601 = vmatprep.subr.bf16.mxu0 %v7595_v36  ;;  %4665 = vmatprep.subr.bf16.mxu1 %v7596_v53  ;;  %v7606_v36 = vld [vmem:[#allocation54_spill] sm:$0xff]  ;;  %v7607_v53 = vld [vmem:[#allocation55_spill] sm:$0xff] }
 0x558   :  { %4603 = vmatpush1.bf16.msra.mxu0 %v7597_v28  ;;  %4667 = vmatpush1.bf16.msra.mxu1 %v7598_v42  ;;  %v7608_v28 = vld [vmem:[#allocation56_spill] sm:$0xff]  ;;  %v7609_v42 = vld [vmem:[#allocation57_spill] sm:$0xff] }
 0x559   :  { %4605 = vmatprep.subr.bf16.mxu0 %v7599_v0  ;;  %4669 = vmatprep.subr.bf16.mxu1 %v7600_v37  ;;  %v7610_v0 = vld [vmem:[#allocation58_spill] sm:$0xff]  ;;  %v7611_v37 = vld [vmem:[#allocation59_spill] sm:$0xff] }
 0x55c   :  { %4607 = vmatpush1.bf16.msra.mxu0 %v7601_v47  ;;  %4671 = vmatpush1.bf16.msra.mxu1 %v7602_v55  ;;  %v7612_v47 = vld [vmem:[#allocation60_spill] sm:$0xff]  ;;  %v7613_v55 = vld [vmem:[#allocation61_spill] sm:$0xff] }
 0x55d   :  { %4609 = vmatprep.subr.bf16.mxu0 %v7603_v59  ;;  %4673 = vmatprep.subr.bf16.mxu1 %v7604_v12  ;;  %v7614_v59 = vld [vmem:[#allocation62_spill] sm:$0xff]  ;;  %v7615_v12 = vld [vmem:[#allocation63_spill] sm:$0xff] }
 0x560   :  { %4611 = vmatpush1.bf16.msra.mxu0 %v7605_v31  ;;  %4675 = vmatpush1.bf16.msra.mxu1 %v7606_v36  ;;  %v7616_v31 = vld [vmem:[#allocation64_spill] sm:$0xff]  ;;  %v7617_v36 = vld [vmem:[#allocation65_spill] sm:$0xff] }
 0x561   :  { %4613 = vmatprep.subr.bf16.mxu0 %v7607_v53  ;;  %4677 = vmatprep.subr.bf16.mxu1 %v7608_v28  ;;  %v7618_v53 = vld [vmem:[#allocation66_spill] sm:$0xff]  ;;  %v7619_v28 = vld [vmem:[#allocation67_spill] sm:$0xff] }
 0x564   :  { %4615 = vmatpush1.bf16.msra.mxu0 %v7609_v42  ;;  %4679 = vmatpush1.bf16.msra.mxu1 %v7610_v0  ;;  %v7620_v42 = vld [vmem:[#allocation68_spill] sm:$0xff]  ;;  %v7621_v0 = vld [vmem:[#allocation69_spill] sm:$0xff] }
 0x565   :  { %4617 = vmatprep.subr.bf16.mxu0 %v7611_v37  ;;  %4681 = vmatprep.subr.bf16.mxu1 %v7612_v47  ;;  %v7622_v37 = vld [vmem:[#allocation70_spill] sm:$0xff]  ;;  %v7623_v47 = vld [vmem:[#allocation71_spill] sm:$0xff] }
 0x568   :  { %4619 = vmatpush1.bf16.msra.mxu0 %v7613_v55  ;;  %4683 = vmatpush1.bf16.msra.mxu1 %v7614_v59  ;;  %v7624_v55 = vld [vmem:[#allocation72_spill] sm:$0xff]  ;;  %v7625_v59 = vld [vmem:[#allocation73_spill] sm:$0xff] }
 0x569   :  { %4621 = vmatprep.subr.bf16.mxu0 %v7615_v12  ;;  %4685 = vmatprep.subr.bf16.mxu1 %v7616_v31  ;;  %v7626_v12 = vld [vmem:[#allocation74_spill] sm:$0xff] }
 0x56a   :  { %v7627_v31 = vld [vmem:[#allocation18_spill] sm:$0xff] }
 0x56c   :  { %4623 = vmatpush1.bf16.msra.mxu0 %v7617_v36  ;;  %4687 = vmatpush1.bf16.msra.mxu1 %v7618_v53  ;;  %v7628_v36 = vld [vmem:[#allocation19_spill] sm:$0xff] }
 0x56d   :  { %4625 = vmatprep.subr.bf16.mxu0 %v7619_v28  ;;  %4689 = vmatprep.subr.bf16.mxu1 %v7620_v42 }
 0x570   :  { %4627 = vmatpush1.bf16.msra.mxu0 %v7621_v0  ;;  %4691 = vmatpush1.bf16.msra.mxu1 %v7622_v37 }
 0x571   :  { %4629 = vmatprep.subr.bf16.mxu0 %v7623_v47  ;;  %4693 = vmatprep.subr.bf16.mxu1 %v7624_v55  ;;  %v7630_v55 = vld [vmem:[#allocation88_spill] sm:$0xff] }
 0x574   :  { %4631 = vmatpush1.bf16.msra.mxu0 %v7625_v59  ;;  %4695 = vmatpush1.bf16.msra.mxu1 %v7626_v12  ;;  %v7631_v12 = vld [vmem:[#allocation89_spill] sm:$0xff] }
 0x575   :  { %4697 = vmatprep.subr.bf16.mxu0 %v7627_v31  ;;  %4729 = vmatprep.subr.bf16.mxu1 %v7628_v36 }
 0x5ea   :  { %v1927_v53 = vpop.f32.mrb[14].mxu0  ;;  %v1998_v28 = vpop.f32.mrb[38].mxu1 }
 0x5eb   :  { %v1928_v42 = vadd.f32 %v1927_v53, %v7629_v9  ;;  %v1929_v16 = vpop.f32.mrb[15].mxu0  ;;  %v2000_v0 = vpop.f32.mrb[39].mxu1  ;;  %v1999_v18 = vadd.f32 %v1998_v28, %v7631_v12  ;;  %v7632_v28 = vld [vmem:[#allocation79_spill] sm:$0xff] }
 0x5ec   :  { %v1930_v37 = vadd.f32 %v1929_v16, %v6411_v3  ;;  %v2001_v59 = vadd.f32 %v2000_v0, %v7630_v55 }
 0x5ed   :  { %v3576_v19 = vmul.f32 -1.442695, %v1928_v42 }
 0x5ee   :  { %v3577_v47 = vmul.f32 -1.442695, %v1930_v37  ;;  %v3578_v51 = vmul.f32 -1.442695, %v2001_v59 }
 0x5ef   :  { %5491 = vpow2.f32 %v3576_v19 }
 0x5f0   :  { %5493 = vpow2.f32 %v3577_v47 }
 0x5f1   :  { %5495 = vpow2.f32 %v3578_v51 }
 0x5f2   :  { %5497 = vtanh.f32 %v1999_v18 }
 0x5f9   :  { %v5492_v31 = vpop.eup %5491 }
 0x5fa   :  { %v5494_v27 = vpop.eup %5493  ;;  %v2006_v36 = vadd.f32 1.0, %v5492_v31 }
 0x5fb   :  { %v2012_v45 = vadd.f32 1.0, %v5494_v27  ;;  %v5496_v53 = vpop.eup %5495  ;;  %v7633_v27 = vld [vmem:[#allocation80_spill] sm:$0xff] }
 0x5fc   :  { %5499 = vrcp.f32 %v2006_v36  ;;  %v5498_v9 = vpop.eup %5497  ;;  %v2019_v19 = vadd.f32 1.0, %v5496_v53 }
 0x5fd   :  { %5501 = vrcp.f32 %v2012_v45 }
 0x5fe   :  { %5503 = vrcp.f32 %v2019_v19 }
 0x606   :  { %v5500_v16 = vpop.eup %5499 }
 0x607   :  { %v5502_v42 = vpop.eup %5501  ;;  %v2023_v37 = vmul.f32 %v5500_v16, %v5498_v9 }
 0x608   :  { %v2022_v47 = vmul.f32 %v5502_v42, %v6661_v54  ;;  %v5504_v54 = vpop.eup %5503 }
 0x60a   :  { %v2098_v0 = vpop.f32.mrb[16].mxu0  ;;  %v2169_v59 = vpop.f32.mrb[24].mxu1  ;;  %v6779_v55 = vadd.f32 %v2023_v37, %v2022_v47 }
 0x60b   :  { %v2174_v31 = vadd.f32 %v2098_v0, %v7632_v28  ;;  %v2100_v51 = vpop.f32.mrb[17].mxu0  ;;  %v2171_v18 = vpop.f32.mrb[25].mxu1  ;;  %v5344_v42 = vadd.f32 %v2169_v59, %v6293_v38 }
 0x60c   :  { %v2175_v36 = vadd.f32 %v2100_v51, %v7633_v27  ;;  %5505 = vtanh.f32 %v6779_v55  ;;  %v5345_v9 = vadd.f32 %v2171_v18, %v6297_v63 }
 0x60d   :  { %v3579_v45 = vmul.f32 -1.442695, %v2174_v31 }
 0x60e   :  { %v3580_v12 = vmul.f32 -1.442695, %v2175_v36  ;;  %v3581_v16 = vmul.f32 -1.442695, %v5345_v9 }
 0x60f   :  { %5507 = vpow2.f32 %v3579_v45 }
 0x610   :  { %5509 = vpow2.f32 %v3580_v12 }
 0x611   :  { %5511 = vpow2.f32 %v3581_v16  ;;  %v7636_v16 = vld [vmem:[#allocation22_spill] sm:$0xff] }
 0x612   :  { %5513 = vtanh.f32 %v5344_v42  ;;  %v7637_v42 = vld [vmem:[#allocation23_spill] sm:$0xff] }
 0x616   :  { %v5506_v53 = vpop.eup %5505 }
 0x617   :  { %v6786_v37 = vmul.f32 %v5506_v53, %v5504_v54 }
 0x619   :  { %7634 = vst [vmem:[#allocation76_spill] sm:$0xff] %v6786_v37  ;;  %v5508_v19 = vpop.eup %5507  ;;  %2266 = vmatprep.mubr.f32.mxu0 %v6786_v37  ;;  %2337 = vmatprep.mubr.f32.mxu1 %v6786_v37  ;;  %v7652_v37 = vld [vmem:[#allocation38_spill] sm:$0xff] }
 0x61a   :  { %v5510_v47 = vpop.eup %5509  ;;  %v2181_v0 = vadd.f32 1.0, %v5508_v19  ;;  %v7638_v19 = vld [vmem:[#allocation24_spill] sm:$0xff] }
 0x61b   :  { %v2187_v28 = vadd.f32 1.0, %v5510_v47  ;;  %v5512_v12 = vpop.eup %5511  ;;  %v7639_v47 = vld [vmem:[#allocation25_spill] sm:$0xff] }
 0x61c   :  { %5515 = vrcp.f32 %v2181_v0  ;;  %v5514_v31 = vpop.eup %5513  ;;  %v2194_v59 = vadd.f32 1.0, %v5512_v12  ;;  %v7640_v0 = vld [vmem:[#allocation26_spill] sm:$0xff]  ;;  %v7642_v12 = vld [vmem:[#allocation28_spill] sm:$0xff] }
 0x61d   :  { %5517 = vrcp.f32 %v2187_v28  ;;  %v7641_v28 = vld [vmem:[#allocation27_spill] sm:$0xff] }
 0x61e   :  { %5519 = vrcp.f32 %v2194_v59  ;;  %v7647_v59 = vld [vmem:[#allocation33_spill] sm:$0xff] }
 0x626   :  { %v5516_v51 = vpop.eup %5515 }
 0x627   :  { %v5518_v18 = vpop.eup %5517  ;;  %v2198_v27 = vmul.f32 %v5516_v51, %v5514_v31  ;;  %v7643_v31 = vld [vmem:[#allocation29_spill] sm:$0xff]  ;;  %v7644_v51 = vld [vmem:[#allocation30_spill] sm:$0xff] }
 0x628   :  { %v2197_v36 = vmul.f32 %v5518_v18, %v6673_v24  ;;  %v5520_v9 = vpop.eup %5519  ;;  %v7635_v24 = vld [vmem:[#allocation21_spill] sm:$0xff]  ;;  %v7645_v18 = vld [vmem:[#allocation31_spill] sm:$0xff] }
 0x62a   :  { %v6791_v45 = vadd.f32 %v2198_v27, %v2197_v36  ;;  %v7646_v27 = vld [vmem:[#allocation32_spill] sm:$0xff]  ;;  %v7648_v36 = vld [vmem:[#allocation34_spill] sm:$0xff] }
 0x62c   :  { %5521 = vtanh.f32 %v6791_v45 }
 0x636   :  { %v5522_v54 = vpop.eup %5521 }
 0x637   :  { %v2201_v53 = vmul.f32 %v5522_v54, %v5520_v9  ;;  %v7649_v9 = vld [vmem:[#allocation35_spill] sm:$0xff]  ;;  %v7650_v54 = vld [vmem:[#allocation36_spill] sm:$0xff] }
 0x639   :  { %2267 = vmatmul.mubr.f32.vlgmr.msra.gmra.mrb[18].mxu0 %v2201_v53  ;;  %2338 = vmatmul.mubr.f32.vlgmr.msra.gmra.mrb[40].mxu1 %v2201_v53 }
 0x63a   :  { %4699 = vmatpush1.bf16.msra.mxu0 %v5910_v13  ;;  %4731 = vmatpush1.bf16.msra.mxu1 %v5992_v61 }
 0x63b   :  { %4701 = vmatprep.subr.bf16.mxu0 %v5914_v22  ;;  %4733 = vmatprep.subr.bf16.mxu1 %v5995_v62 }
 0x63c   :  { %2437 = vmatprep.mubr.f32.mxu0 %v7386_v46  ;;  %2508 = vmatprep.mubr.f32.mxu1 %v7386_v46 }
 0x63e   :  { %4703 = vmatpush1.bf16.msra.mxu0 %v5916_v26  ;;  %4735 = vmatpush1.bf16.msra.mxu1 %v6000_v7 }
 0x63f   :  { %4705 = vmatprep.subr.bf16.mxu0 %v5919_v35  ;;  %4737 = vmatprep.subr.bf16.mxu1 %v6003_v8 }
 0x642   :  { %4707 = vmatpush1.bf16.msra.mxu0 %v5922_v39  ;;  %4739 = vmatpush1.bf16.msra.mxu1 %v6008_v48 }
 0x643   :  { %4709 = vmatprep.subr.bf16.mxu0 %v5925_v44  ;;  %4741 = vmatprep.subr.bf16.mxu1 %v6011_v17 }
 0x646   :  { %4711 = vmatpush1.bf16.msra.mxu0 %v5928_v52  ;;  %4743 = vmatpush1.bf16.msra.mxu1 %v6016_v56 }
 0x647   :  { %4713 = vmatprep.subr.bf16.mxu0 %v5931_v57  ;;  %4745 = vmatprep.subr.bf16.mxu1 %v6019_v25 }
 0x64a   :  { %4715 = vmatpush1.bf16.msra.mxu0 %v5934_v1  ;;  %4747 = vmatpush1.bf16.msra.mxu1 %v6024_v2 }
 0x64b   :  { %4717 = vmatprep.subr.bf16.mxu0 %v5937_v6  ;;  %4749 = vmatprep.subr.bf16.mxu1 %v6027_v33 }
 0x64e   :  { %4719 = vmatpush1.bf16.msra.mxu0 %v5940_v15  ;;  %4751 = vmatpush1.bf16.msra.mxu1 %v6032_v11 }
 0x64f   :  { %4721 = vmatprep.subr.bf16.mxu0 %v5943_v20  ;;  %4753 = vmatprep.subr.bf16.mxu1 %v6035_v43 }
 0x652   :  { %4723 = vmatpush1.bf16.msra.mxu0 %v5946_v29  ;;  %4755 = vmatpush1.bf16.msra.mxu1 %v6040_v21 }
 0x653   :  { %4725 = vmatprep.subr.bf16.mxu0 %v5949_v34  ;;  %4757 = vmatprep.subr.bf16.mxu1 %v6043_v50 }
 0x656   :  { %4727 = vmatpush1.bf16.msra.mxu0 %v5952_v41  ;;  %4759 = vmatpush1.bf16.msra.mxu1 %v6048_v58 }
 0x657   :  { %4761 = vmatprep.subr.bf16.mxu0 %v6056_v60  ;;  %4825 = vmatprep.subr.bf16.mxu1 %v6058_v5 }
 0x659   :  { %2438 = vmatmul.mubr.f32.vlgmr.msra.gmra.mrb[20].mxu0 %v2201_v53  ;;  %2509 = vmatmul.mubr.f32.vlgmr.msra.gmra.mrb[26].mxu1 %v2201_v53  ;;  %v7651_v53 = vld [vmem:[#allocation37_spill] sm:$0xff] }
 0x65a   :  { %4763 = vmatpush1.bf16.msra.mxu0 %v6060_v10  ;;  %4827 = vmatpush1.bf16.msra.mxu1 %v6063_v14 }
 0x65b   :  { %4765 = vmatprep.subr.bf16.mxu0 %v6068_v23  ;;  %4829 = vmatprep.subr.bf16.mxu1 %v6070_v30 }
 0x65e   :  { %4767 = vmatpush1.bf16.msra.mxu0 %v6072_v32  ;;  %4831 = vmatpush1.bf16.msra.mxu1 %v6075_v40 }
 0x65f   :  { %4769 = vmatprep.subr.bf16.mxu0 %v6079_v49  ;;  %4833 = vmatprep.subr.bf16.mxu1 %v7449_v4 }
 0x662   :  { %4771 = vmatpush1.bf16.msra.mxu0 %v7635_v24  ;;  %4835 = vmatpush1.bf16.msra.mxu1 %v7636_v16 }
 0x663   :  { %4773 = vmatprep.subr.bf16.mxu0 %v7637_v42  ;;  %4837 = vmatprep.subr.bf16.mxu1 %v7638_v19 }
 0x666   :  { %4775 = vmatpush1.bf16.msra.mxu0 %v7639_v47  ;;  %4839 = vmatpush1.bf16.msra.mxu1 %v7640_v0 }
 0x667   :  { %4777 = vmatprep.subr.bf16.mxu0 %v7641_v28  ;;  %4841 = vmatprep.subr.bf16.mxu1 %v7642_v12  ;;  %v7653_v12 = vld [vmem:[#allocation39_spill] sm:$0xff] }
 0x668   :  { %v7691_v28 = vld [vmem:[#allocation87_spill] sm:$0xff] }
 0x66a   :  { %4779 = vmatpush1.bf16.msra.mxu0 %v7643_v31  ;;  %4843 = vmatpush1.bf16.msra.mxu1 %v7644_v51  ;;  %v7654_v31 = vld [vmem:[#allocation40_spill] sm:$0xff]  ;;  %v7655_v51 = vld [vmem:[#allocation41_spill] sm:$0xff] }
 0x66b   :  { %4781 = vmatprep.subr.bf16.mxu0 %v7645_v18  ;;  %4845 = vmatprep.subr.bf16.mxu1 %v7646_v27  ;;  %v7656_v18 = vld [vmem:[#allocation42_spill] sm:$0xff]  ;;  %v7657_v27 = vld [vmem:[#allocation43_spill] sm:$0xff] }
 0x66e   :  { %4783 = vmatpush1.bf16.msra.mxu0 %v7647_v59  ;;  %4847 = vmatpush1.bf16.msra.mxu1 %v7648_v36  ;;  %v7658_v59 = vld [vmem:[#allocation44_spill] sm:$0xff]  ;;  %v7659_v36 = vld [vmem:[#allocation45_spill] sm:$0xff] }
 0x66f   :  { %4785 = vmatprep.subr.bf16.mxu0 %v7649_v9  ;;  %4849 = vmatprep.subr.bf16.mxu1 %v7650_v54  ;;  %v7660_v9 = vld [vmem:[#allocation46_spill] sm:$0xff]  ;;  %v7661_v54 = vld [vmem:[#allocation47_spill] sm:$0xff] }
 0x672   :  { %4787 = vmatpush1.bf16.msra.mxu0 %v7651_v53  ;;  %4851 = vmatpush1.bf16.msra.mxu1 %v7652_v37  ;;  %v7662_v53 = vld [vmem:[#allocation48_spill] sm:$0xff]  ;;  %v7663_v37 = vld [vmem:[#allocation49_spill] sm:$0xff] }
 0x673   :  { %4789 = vmatprep.subr.bf16.mxu0 %v7653_v12  ;;  %4853 = vmatprep.subr.bf16.mxu1 %v7654_v31  ;;  %v7664_v12 = vld [vmem:[#allocation50_spill] sm:$0xff]  ;;  %v7665_v31 = vld [vmem:[#allocation51_spill] sm:$0xff] }
 0x676   :  { %4791 = vmatpush1.bf16.msra.mxu0 %v7655_v51  ;;  %4855 = vmatpush1.bf16.msra.mxu1 %v7656_v18  ;;  %v7666_v51 = vld [vmem:[#allocation52_spill] sm:$0xff]  ;;  %v7667_v18 = vld [vmem:[#allocation53_spill] sm:$0xff] }
 0x677   :  { %4793 = vmatprep.subr.bf16.mxu0 %v7657_v27  ;;  %4857 = vmatprep.subr.bf16.mxu1 %v7658_v59  ;;  %v7668_v27 = vld [vmem:[#allocation54_spill] sm:$0xff]  ;;  %v7669_v59 = vld [vmem:[#allocation55_spill] sm:$0xff] }
 0x67a   :  { %4795 = vmatpush1.bf16.msra.mxu0 %v7659_v36  ;;  %4859 = vmatpush1.bf16.msra.mxu1 %v7660_v9  ;;  %v7670_v36 = vld [vmem:[#allocation56_spill] sm:$0xff]  ;;  %v7671_v9 = vld [vmem:[#allocation57_spill] sm:$0xff] }
 0x67b   :  { %4797 = vmatprep.subr.bf16.mxu0 %v7661_v54  ;;  %4861 = vmatprep.subr.bf16.mxu1 %v7662_v53  ;;  %v7672_v54 = vld [vmem:[#allocation58_spill] sm:$0xff]  ;;  %v7673_v53 = vld [vmem:[#allocation59_spill] sm:$0xff] }
 0x67e   :  { %4799 = vmatpush1.bf16.msra.mxu0 %v7663_v37  ;;  %4863 = vmatpush1.bf16.msra.mxu1 %v7664_v12  ;;  %v7674_v37 = vld [vmem:[#allocation60_spill] sm:$0xff]  ;;  %v7675_v12 = vld [vmem:[#allocation61_spill] sm:$0xff] }
 0x67f   :  { %4801 = vmatprep.subr.bf16.mxu0 %v7665_v31  ;;  %4865 = vmatprep.subr.bf16.mxu1 %v7666_v51  ;;  %v7676_v31 = vld [vmem:[#allocation62_spill] sm:$0xff]  ;;  %v7677_v51 = vld [vmem:[#allocation63_spill] sm:$0xff] }
 0x682   :  { %4803 = vmatpush1.bf16.msra.mxu0 %v7667_v18  ;;  %4867 = vmatpush1.bf16.msra.mxu1 %v7668_v27  ;;  %v7678_v18 = vld [vmem:[#allocation64_spill] sm:$0xff]  ;;  %v7679_v27 = vld [vmem:[#allocation65_spill] sm:$0xff] }
 0x683   :  { %4805 = vmatprep.subr.bf16.mxu0 %v7669_v59  ;;  %4869 = vmatprep.subr.bf16.mxu1 %v7670_v36  ;;  %v7680_v59 = vld [vmem:[#allocation66_spill] sm:$0xff]  ;;  %v7681_v36 = vld [vmem:[#allocation67_spill] sm:$0xff] }
 0x686   :  { %4807 = vmatpush1.bf16.msra.mxu0 %v7671_v9  ;;  %4871 = vmatpush1.bf16.msra.mxu1 %v7672_v54  ;;  %v7682_v9 = vld [vmem:[#allocation68_spill] sm:$0xff]  ;;  %v7683_v54 = vld [vmem:[#allocation69_spill] sm:$0xff] }
 0x687   :  { %4809 = vmatprep.subr.bf16.mxu0 %v7673_v53  ;;  %4873 = vmatprep.subr.bf16.mxu1 %v7674_v37  ;;  %v7684_v53 = vld [vmem:[#allocation70_spill] sm:$0xff]  ;;  %v7685_v37 = vld [vmem:[#allocation71_spill] sm:$0xff] }
 0x68a   :  { %4811 = vmatpush1.bf16.msra.mxu0 %v7675_v12  ;;  %4875 = vmatpush1.bf16.msra.mxu1 %v7676_v31  ;;  %v7686_v12 = vld [vmem:[#allocation72_spill] sm:$0xff]  ;;  %v7687_v31 = vld [vmem:[#allocation73_spill] sm:$0xff] }
 0x68b   :  { %4813 = vmatprep.subr.bf16.mxu0 %v7677_v51  ;;  %4877 = vmatprep.subr.bf16.mxu1 %v7678_v18  ;;  %v7688_v51 = vld [vmem:[#allocation74_spill] sm:$0xff] }
 0x68c   :  { %v7689_v18 = vld [vmem:[#allocation18_spill] sm:$0xff] }
 0x68e   :  { %4815 = vmatpush1.bf16.msra.mxu0 %v7679_v27  ;;  %4879 = vmatpush1.bf16.msra.mxu1 %v7680_v59  ;;  %v7690_v27 = vld [vmem:[#allocation19_spill] sm:$0xff] }
 0x68f   :  { %4817 = vmatprep.subr.bf16.mxu0 %v7681_v36  ;;  %4881 = vmatprep.subr.bf16.mxu1 %v7682_v9 }
 0x692   :  { %4819 = vmatpush1.bf16.msra.mxu0 %v7683_v54  ;;  %4883 = vmatpush1.bf16.msra.mxu1 %v7684_v53 }
 0x693   :  { %4821 = vmatprep.subr.bf16.mxu0 %v7685_v37  ;;  %4885 = vmatprep.subr.bf16.mxu1 %v7686_v12  ;;  %v7692_v12 = vld [vmem:[#allocation88_spill] sm:$0xff] }
 0x696   :  { %4823 = vmatpush1.bf16.msra.mxu0 %v7687_v31  ;;  %4887 = vmatpush1.bf16.msra.mxu1 %v7688_v51  ;;  %v7693_v51 = vld [vmem:[#allocation89_spill] sm:$0xff] }
 0x697   :  { %4889 = vmatprep.subr.bf16.mxu0 %v7689_v18  ;;  %4921 = vmatprep.subr.bf16.mxu1 %v7690_v27 }
 0x70c   :  { %v2268_v59 = vpop.f32.mrb[18].mxu0  ;;  %v2339_v36 = vpop.f32.mrb[40].mxu1 }
 0x70d   :  { %v2269_v9 = vadd.f32 %v2268_v59, %v7691_v28  ;;  %v2270_v0 = vpop.f32.mrb[19].mxu0  ;;  %v2341_v54 = vpop.f32.mrb[41].mxu1  ;;  %v2340_v42 = vadd.f32 %v2339_v36, %v7693_v51  ;;  %v7694_v36 = vld [vmem:[#allocation81_spill] sm:$0xff] }
 0x70e   :  { %v2271_v53 = vadd.f32 %v2270_v0, %v6411_v3  ;;  %v2342_v31 = vadd.f32 %v2341_v54, %v7692_v12 }
 0x70f   :  { %v3582_v47 = vmul.f32 -1.442695, %v2269_v9 }
 0x710   :  { %v3583_v37 = vmul.f32 -1.442695, %v2271_v53  ;;  %v3584_v19 = vmul.f32 -1.442695, %v2342_v31 }
 0x711   :  { %5523 = vpow2.f32 %v3582_v47 }
 0x712   :  { %5525 = vpow2.f32 %v3583_v37 }
 0x713   :  { %5527 = vpow2.f32 %v3584_v19 }
 0x714   :  { %5529 = vtanh.f32 %v2340_v42 }
 0x71b   :  { %v5524_v18 = vpop.eup %5523 }
 0x71c   :  { %v5526_v16 = vpop.eup %5525  ;;  %v2347_v27 = vadd.f32 1.0, %v5524_v18 }
 0x71d   :  { %v2353_v24 = vadd.f32 1.0, %v5526_v16  ;;  %v5528_v59 = vpop.eup %5527  ;;  %v7695_v16 = vld [vmem:[#allocation82_spill] sm:$0xff] }
 0x71e   :  { %5531 = vrcp.f32 %v2347_v27  ;;  %v5530_v28 = vpop.eup %5529  ;;  %v2360_v47 = vadd.f32 1.0, %v5528_v59 }
 0x71f   :  { %5533 = vrcp.f32 %v2353_v24 }
 0x720   :  { %5535 = vrcp.f32 %v2360_v47 }
 0x728   :  { %v5532_v0 = vpop.eup %5531 }
 0x729   :  { %v5534_v9 = vpop.eup %5533  ;;  %v2364_v53 = vmul.f32 %v5532_v0, %v5530_v28 }
 0x72a   :  { %v2363_v37 = vmul.f32 %v5534_v9, %v6779_v55  ;;  %v5536_v55 = vpop.eup %5535 }
 0x72c   :  { %v2439_v54 = vpop.f32.mrb[20].mxu0  ;;  %v2510_v31 = vpop.f32.mrb[26].mxu1  ;;  %v6897_v12 = vadd.f32 %v2364_v53, %v2363_v37 }
 0x72d   :  { %v2515_v18 = vadd.f32 %v2439_v54, %v7694_v36  ;;  %v2441_v19 = vpop.f32.mrb[21].mxu0  ;;  %v2512_v42 = vpop.f32.mrb[27].mxu1  ;;  %v5346_v9 = vadd.f32 %v2510_v31, %v6293_v38 }
 0x72e   :  { %v2516_v27 = vadd.f32 %v2441_v19, %v7695_v16  ;;  %5537 = vtanh.f32 %v6897_v12  ;;  %v5347_v28 = vadd.f32 %v2512_v42, %v6297_v63 }
 0x72f   :  { %v3585_v24 = vmul.f32 -1.442695, %v2515_v18 }
 0x730   :  { %v3586_v51 = vmul.f32 -1.442695, %v2516_v27  ;;  %v3587_v0 = vmul.f32 -1.442695, %v5347_v28 }
 0x731   :  { %5539 = vpow2.f32 %v3585_v24 }
 0x732   :  { %5541 = vpow2.f32 %v3586_v51 }
 0x733   :  { %5543 = vpow2.f32 %v3587_v0  ;;  %v7698_v0 = vld [vmem:[#allocation22_spill] sm:$0xff] }
 0x734   :  { %5545 = vtanh.f32 %v5346_v9  ;;  %v7699_v9 = vld [vmem:[#allocation23_spill] sm:$0xff] }
 0x738   :  { %v5538_v59 = vpop.eup %5537 }
 0x739   :  { %v6904_v53 = vmul.f32 %v5538_v59, %v5536_v55 }
 0x73b   :  { %7696 = vst [vmem:[#allocation77_spill] sm:$0xff] %v6904_v53  ;;  %v5540_v47 = vpop.eup %5539  ;;  %2607 = vmatprep.mubr.f32.mxu0 %v6904_v53  ;;  %2678 = vmatprep.mubr.f32.mxu1 %v6904_v53  ;;  %v7714_v53 = vld [vmem:[#allocation38_spill] sm:$0xff] }
 0x73c   :  { %v5542_v37 = vpop.eup %5541  ;;  %v2522_v54 = vadd.f32 1.0, %v5540_v47  ;;  %v7700_v47 = vld [vmem:[#allocation24_spill] sm:$0xff] }
 0x73d   :  { %v2528_v36 = vadd.f32 1.0, %v5542_v37  ;;  %v5544_v51 = vpop.eup %5543  ;;  %v7701_v37 = vld [vmem:[#allocation25_spill] sm:$0xff] }
 0x73e   :  { %5547 = vrcp.f32 %v2522_v54  ;;  %v5546_v18 = vpop.eup %5545  ;;  %v2535_v31 = vadd.f32 1.0, %v5544_v51  ;;  %v7702_v54 = vld [vmem:[#allocation26_spill] sm:$0xff]  ;;  %v7704_v51 = vld [vmem:[#allocation28_spill] sm:$0xff] }
 0x73f   :  { %5549 = vrcp.f32 %v2528_v36  ;;  %v7703_v36 = vld [vmem:[#allocation27_spill] sm:$0xff] }
 0x740   :  { %5551 = vrcp.f32 %v2535_v31  ;;  %v7709_v31 = vld [vmem:[#allocation33_spill] sm:$0xff] }
 0x748   :  { %v5548_v19 = vpop.eup %5547 }
 0x749   :  { %v5550_v42 = vpop.eup %5549  ;;  %v2539_v16 = vmul.f32 %v5548_v19, %v5546_v18  ;;  %v7705_v18 = vld [vmem:[#allocation29_spill] sm:$0xff]  ;;  %v7706_v19 = vld [vmem:[#allocation30_spill] sm:$0xff] }
 0x74a   :  { %v2538_v27 = vmul.f32 %v5550_v42, %v6791_v45  ;;  %v5552_v28 = vpop.eup %5551  ;;  %v7697_v45 = vld [vmem:[#allocation21_spill] sm:$0xff]  ;;  %v7707_v42 = vld [vmem:[#allocation31_spill] sm:$0xff] }
 0x74c   :  { %v6909_v24 = vadd.f32 %v2539_v16, %v2538_v27  ;;  %v7708_v16 = vld [vmem:[#allocation32_spill] sm:$0xff]  ;;  %v7710_v27 = vld [vmem:[#allocation34_spill] sm:$0xff] }
 0x74e   :  { %5553 = vtanh.f32 %v6909_v24 }
 0x758   :  { %v5554_v55 = vpop.eup %5553 }
 0x759   :  { %v2542_v59 = vmul.f32 %v5554_v55, %v5552_v28  ;;  %v7711_v28 = vld [vmem:[#allocation35_spill] sm:$0xff]  ;;  %v7712_v55 = vld [vmem:[#allocation36_spill] sm:$0xff] }
 0x75b   :  { %2608 = vmatmul.mubr.f32.vlgmr.msra.gmra.mrb[22].mxu0 %v2542_v59  ;;  %2679 = vmatmul.mubr.f32.vlgmr.msra.gmra.mrb[42].mxu1 %v2542_v59 }
 0x75c   :  { %4891 = vmatpush1.bf16.msra.mxu0 %v5910_v13  ;;  %4923 = vmatpush1.bf16.msra.mxu1 %v5992_v61 }
 0x75d   :  { %4893 = vmatprep.subr.bf16.mxu0 %v5914_v22  ;;  %4925 = vmatprep.subr.bf16.mxu1 %v5995_v62 }
 0x75e   :  { %2778 = vmatprep.mubr.f32.mxu0 %v7386_v46  ;;  %2849 = vmatprep.mubr.f32.mxu1 %v7386_v46 }
 0x760   :  { %4895 = vmatpush1.bf16.msra.mxu0 %v5916_v26  ;;  %4927 = vmatpush1.bf16.msra.mxu1 %v6000_v7 }
 0x761   :  { %4897 = vmatprep.subr.bf16.mxu0 %v5919_v35  ;;  %4929 = vmatprep.subr.bf16.mxu1 %v6003_v8 }
 0x764   :  { %4899 = vmatpush1.bf16.msra.mxu0 %v5922_v39  ;;  %4931 = vmatpush1.bf16.msra.mxu1 %v6008_v48 }
 0x765   :  { %4901 = vmatprep.subr.bf16.mxu0 %v5925_v44  ;;  %4933 = vmatprep.subr.bf16.mxu1 %v6011_v17 }
 0x768   :  { %4903 = vmatpush1.bf16.msra.mxu0 %v5928_v52  ;;  %4935 = vmatpush1.bf16.msra.mxu1 %v6016_v56 }
 0x769   :  { %4905 = vmatprep.subr.bf16.mxu0 %v5931_v57  ;;  %4937 = vmatprep.subr.bf16.mxu1 %v6019_v25 }
 0x76c   :  { %4907 = vmatpush1.bf16.msra.mxu0 %v5934_v1  ;;  %4939 = vmatpush1.bf16.msra.mxu1 %v6024_v2 }
 0x76d   :  { %4909 = vmatprep.subr.bf16.mxu0 %v5937_v6  ;;  %4941 = vmatprep.subr.bf16.mxu1 %v6027_v33 }
 0x770   :  { %4911 = vmatpush1.bf16.msra.mxu0 %v5940_v15  ;;  %4943 = vmatpush1.bf16.msra.mxu1 %v6032_v11 }
 0x771   :  { %4913 = vmatprep.subr.bf16.mxu0 %v5943_v20  ;;  %4945 = vmatprep.subr.bf16.mxu1 %v6035_v43 }
 0x774   :  { %4915 = vmatpush1.bf16.msra.mxu0 %v5946_v29  ;;  %4947 = vmatpush1.bf16.msra.mxu1 %v6040_v21 }
 0x775   :  { %4917 = vmatprep.subr.bf16.mxu0 %v5949_v34  ;;  %4949 = vmatprep.subr.bf16.mxu1 %v6043_v50 }
 0x778   :  { %4919 = vmatpush1.bf16.msra.mxu0 %v5952_v41  ;;  %4951 = vmatpush1.bf16.msra.mxu1 %v6048_v58 }
 0x779   :  { %4953 = vmatprep.subr.bf16.mxu0 %v6056_v60  ;;  %5017 = vmatprep.subr.bf16.mxu1 %v6058_v5 }
 0x77b   :  { %2779 = vmatmul.mubr.f32.vlgmr.msra.gmra.mrb[24].mxu0 %v2542_v59  ;;  %2850 = vmatmul.mubr.f32.vlgmr.msra.gmra.mrb[28].mxu1 %v2542_v59  ;;  %v7713_v59 = vld [vmem:[#allocation37_spill] sm:$0xff] }
 0x77c   :  { %4955 = vmatpush1.bf16.msra.mxu0 %v6060_v10  ;;  %5019 = vmatpush1.bf16.msra.mxu1 %v6063_v14 }
 0x77d   :  { %4957 = vmatprep.subr.bf16.mxu0 %v6068_v23  ;;  %5021 = vmatprep.subr.bf16.mxu1 %v6070_v30 }
 0x780   :  { %4959 = vmatpush1.bf16.msra.mxu0 %v6072_v32  ;;  %5023 = vmatpush1.bf16.msra.mxu1 %v6075_v40 }
 0x781   :  { %4961 = vmatprep.subr.bf16.mxu0 %v6079_v49  ;;  %5025 = vmatprep.subr.bf16.mxu1 %v7449_v4 }
 0x784   :  { %4963 = vmatpush1.bf16.msra.mxu0 %v7697_v45  ;;  %5027 = vmatpush1.bf16.msra.mxu1 %v7698_v0 }
 0x785   :  { %4965 = vmatprep.subr.bf16.mxu0 %v7699_v9  ;;  %5029 = vmatprep.subr.bf16.mxu1 %v7700_v47 }
 0x788   :  { %4967 = vmatpush1.bf16.msra.mxu0 %v7701_v37  ;;  %5031 = vmatpush1.bf16.msra.mxu1 %v7702_v54 }
 0x789   :  { %4969 = vmatprep.subr.bf16.mxu0 %v7703_v36  ;;  %5033 = vmatprep.subr.bf16.mxu1 %v7704_v51  ;;  %v7715_v51 = vld [vmem:[#allocation39_spill] sm:$0xff] }
 0x78a   :  { %v7753_v36 = vld [vmem:[#allocation87_spill] sm:$0xff] }
 0x78c   :  { %4971 = vmatpush1.bf16.msra.mxu0 %v7705_v18  ;;  %5035 = vmatpush1.bf16.msra.mxu1 %v7706_v19  ;;  %v7716_v18 = vld [vmem:[#allocation40_spill] sm:$0xff]  ;;  %v7717_v19 = vld [vmem:[#allocation41_spill] sm:$0xff] }
 0x78d   :  { %4973 = vmatprep.subr.bf16.mxu0 %v7707_v42  ;;  %5037 = vmatprep.subr.bf16.mxu1 %v7708_v16  ;;  %v7718_v42 = vld [vmem:[#allocation42_spill] sm:$0xff]  ;;  %v7719_v16 = vld [vmem:[#allocation43_spill] sm:$0xff] }
 0x790   :  { %4975 = vmatpush1.bf16.msra.mxu0 %v7709_v31  ;;  %5039 = vmatpush1.bf16.msra.mxu1 %v7710_v27  ;;  %v7720_v31 = vld [vmem:[#allocation44_spill] sm:$0xff]  ;;  %v7721_v27 = vld [vmem:[#allocation45_spill] sm:$0xff] }
 0x791   :  { %4977 = vmatprep.subr.bf16.mxu0 %v7711_v28  ;;  %5041 = vmatprep.subr.bf16.mxu1 %v7712_v55  ;;  %v7722_v28 = vld [vmem:[#allocation46_spill] sm:$0xff]  ;;  %v7723_v55 = vld [vmem:[#allocation47_spill] sm:$0xff] }
 0x794   :  { %4979 = vmatpush1.bf16.msra.mxu0 %v7713_v59  ;;  %5043 = vmatpush1.bf16.msra.mxu1 %v7714_v53  ;;  %v7724_v59 = vld [vmem:[#allocation48_spill] sm:$0xff]  ;;  %v7725_v53 = vld [vmem:[#allocation49_spill] sm:$0xff] }
 0x795   :  { %4981 = vmatprep.subr.bf16.mxu0 %v7715_v51  ;;  %5045 = vmatprep.subr.bf16.mxu1 %v7716_v18  ;;  %v7726_v51 = vld [vmem:[#allocation50_spill] sm:$0xff]  ;;  %v7727_v18 = vld [vmem:[#allocation51_spill] sm:$0xff] }
 0x798   :  { %4983 = vmatpush1.bf16.msra.mxu0 %v7717_v19  ;;  %5047 = vmatpush1.bf16.msra.mxu1 %v7718_v42  ;;  %v7728_v19 = vld [vmem:[#allocation52_spill] sm:$0xff]  ;;  %v7729_v42 = vld [vmem:[#allocation53_spill] sm:$0xff] }
 0x799   :  { %4985 = vmatprep.subr.bf16.mxu0 %v7719_v16  ;;  %5049 = vmatprep.subr.bf16.mxu1 %v7720_v31  ;;  %v7730_v16 = vld [vmem:[#allocation54_spill] sm:$0xff]  ;;  %v7731_v31 = vld [vmem:[#allocation55_spill] sm:$0xff] }
 0x79c   :  { %4987 = vmatpush1.bf16.msra.mxu0 %v7721_v27  ;;  %5051 = vmatpush1.bf16.msra.mxu1 %v7722_v28  ;;  %v7732_v27 = vld [vmem:[#allocation56_spill] sm:$0xff]  ;;  %v7733_v28 = vld [vmem:[#allocation57_spill] sm:$0xff] }
 0x79d   :  { %4989 = vmatprep.subr.bf16.mxu0 %v7723_v55  ;;  %5053 = vmatprep.subr.bf16.mxu1 %v7724_v59  ;;  %v7734_v55 = vld [vmem:[#allocation58_spill] sm:$0xff]  ;;  %v7735_v59 = vld [vmem:[#allocation59_spill] sm:$0xff] }
 0x7a0   :  { %4991 = vmatpush1.bf16.msra.mxu0 %v7725_v53  ;;  %5055 = vmatpush1.bf16.msra.mxu1 %v7726_v51  ;;  %v7736_v53 = vld [vmem:[#allocation60_spill] sm:$0xff]  ;;  %v7737_v51 = vld [vmem:[#allocation61_spill] sm:$0xff] }
 0x7a1   :  { %4993 = vmatprep.subr.bf16.mxu0 %v7727_v18  ;;  %5057 = vmatprep.subr.bf16.mxu1 %v7728_v19  ;;  %v7738_v18 = vld [vmem:[#allocation62_spill] sm:$0xff]  ;;  %v7739_v19 = vld [vmem:[#allocation63_spill] sm:$0xff] }
 0x7a4   :  { %4995 = vmatpush1.bf16.msra.mxu0 %v7729_v42  ;;  %5059 = vmatpush1.bf16.msra.mxu1 %v7730_v16  ;;  %v7740_v42 = vld [vmem:[#allocation64_spill] sm:$0xff]  ;;  %v7741_v16 = vld [vmem:[#allocation65_spill] sm:$0xff] }
 0x7a5   :  { %4997 = vmatprep.subr.bf16.mxu0 %v7731_v31  ;;  %5061 = vmatprep.subr.bf16.mxu1 %v7732_v27  ;;  %v7742_v31 = vld [vmem:[#allocation66_spill] sm:$0xff]  ;;  %v7743_v27 = vld [vmem:[#allocation67_spill] sm:$0xff] }
 0x7a8   :  { %4999 = vmatpush1.bf16.msra.mxu0 %v7733_v28  ;;  %5063 = vmatpush1.bf16.msra.mxu1 %v7734_v55  ;;  %v7744_v28 = vld [vmem:[#allocation68_spill] sm:$0xff]  ;;  %v7745_v55 = vld [vmem:[#allocation69_spill] sm:$0xff] }
 0x7a9   :  { %5001 = vmatprep.subr.bf16.mxu0 %v7735_v59  ;;  %5065 = vmatprep.subr.bf16.mxu1 %v7736_v53  ;;  %v7746_v59 = vld [vmem:[#allocation70_spill] sm:$0xff]  ;;  %v7747_v53 = vld [vmem:[#allocation71_spill] sm:$0xff] }
 0x7ac   :  { %5003 = vmatpush1.bf16.msra.mxu0 %v7737_v51  ;;  %5067 = vmatpush1.bf16.msra.mxu1 %v7738_v18  ;;  %v7748_v51 = vld [vmem:[#allocation72_spill] sm:$0xff]  ;;  %v7749_v18 = vld [vmem:[#allocation73_spill] sm:$0xff] }
 0x7ad   :  { %5005 = vmatprep.subr.bf16.mxu0 %v7739_v19  ;;  %5069 = vmatprep.subr.bf16.mxu1 %v7740_v42  ;;  %v7750_v19 = vld [vmem:[#allocation74_spill] sm:$0xff] }
 0x7ae   :  { %v7751_v42 = vld [vmem:[#allocation18_spill] sm:$0xff] }
 0x7b0   :  { %5007 = vmatpush1.bf16.msra.mxu0 %v7741_v16  ;;  %5071 = vmatpush1.bf16.msra.mxu1 %v7742_v31  ;;  %v7752_v16 = vld [vmem:[#allocation19_spill] sm:$0xff] }
 0x7b1   :  { %5009 = vmatprep.subr.bf16.mxu0 %v7743_v27  ;;  %5073 = vmatprep.subr.bf16.mxu1 %v7744_v28 }
 0x7b4   :  { %5011 = vmatpush1.bf16.msra.mxu0 %v7745_v55  ;;  %5075 = vmatpush1.bf16.msra.mxu1 %v7746_v59 }
 0x7b5   :  { %5013 = vmatprep.subr.bf16.mxu0 %v7747_v53  ;;  %5077 = vmatprep.subr.bf16.mxu1 %v7748_v51  ;;  %v7754_v51 = vld [vmem:[#allocation88_spill] sm:$0xff] }
 0x7b8   :  { %5015 = vmatpush1.bf16.msra.mxu0 %v7749_v18  ;;  %5079 = vmatpush1.bf16.msra.mxu1 %v7750_v19  ;;  %v7755_v19 = vld [vmem:[#allocation89_spill] sm:$0xff] }
 0x7b9   :  { %5081 = vmatprep.subr.bf16.mxu0 %v7751_v42  ;;  %5113 = vmatprep.subr.bf16.mxu1 %v7752_v16 }
 0x82e   :  { %v2609_v31 = vpop.f32.mrb[22].mxu0  ;;  %v2680_v27 = vpop.f32.mrb[42].mxu1 }
 0x82f   :  { %v2610_v28 = vadd.f32 %v2609_v31, %v7753_v36  ;;  %v2611_v54 = vpop.f32.mrb[23].mxu0  ;;  %v2682_v55 = vpop.f32.mrb[43].mxu1  ;;  %v2681_v9 = vadd.f32 %v2680_v27, %v7755_v19  ;;  %v7756_v27 = vld [vmem:[#allocation83_spill] sm:$0xff] }
 0x830   :  { %v2612_v59 = vadd.f32 %v2611_v54, %v6411_v3  ;;  %v2683_v18 = vadd.f32 %v2682_v55, %v7754_v51 }
 0x831   :  { %v3588_v37 = vmul.f32 -1.442695, %v2610_v28 }
 0x832   :  { %v3589_v53 = vmul.f32 -1.442695, %v2612_v59  ;;  %v3590_v47 = vmul.f32 -1.442695, %v2683_v18 }
 0x833   :  { %5555 = vpow2.f32 %v3588_v37 }
 0x834   :  { %5557 = vpow2.f32 %v3589_v53 }
 0x835   :  { %5559 = vpow2.f32 %v3590_v47 }
 0x836   :  { %5561 = vtanh.f32 %v2681_v9 }
 0x83d   :  { %v5556_v42 = vpop.eup %5555 }
 0x83e   :  { %v5558_v0 = vpop.eup %5557  ;;  %v2688_v16 = vadd.f32 1.0, %v5556_v42 }
 0x83f   :  { %v2694_v45 = vadd.f32 1.0, %v5558_v0  ;;  %v5560_v31 = vpop.eup %5559  ;;  %v7757_v0 = vld [vmem:[#allocation84_spill] sm:$0xff] }
 0x840   :  { %5563 = vrcp.f32 %v2688_v16  ;;  %v5562_v36 = vpop.eup %5561  ;;  %v2701_v37 = vadd.f32 1.0, %v5560_v31 }
 0x841   :  { %5565 = vrcp.f32 %v2694_v45 }
 0x842   :  { %5567 = vrcp.f32 %v2701_v37 }
 0x84a   :  { %v5564_v54 = vpop.eup %5563 }
 0x84b   :  { %v5566_v28 = vpop.eup %5565  ;;  %v2705_v59 = vmul.f32 %v5564_v54, %v5562_v36 }
 0x84c   :  { %v2704_v53 = vmul.f32 %v5566_v28, %v6897_v12  ;;  %v5568_v12 = vpop.eup %5567 }
 0x84e   :  { %v2780_v55 = vpop.f32.mrb[24].mxu0  ;;  %v2851_v18 = vpop.f32.mrb[28].mxu1  ;;  %v7015_v51 = vadd.f32 %v2705_v59, %v2704_v53 }
 0x84f   :  { %v2856_v42 = vadd.f32 %v2780_v55, %v7756_v27  ;;  %v2782_v47 = vpop.f32.mrb[25].mxu0  ;;  %v2853_v9 = vpop.f32.mrb[29].mxu1  ;;  %v5348_v28 = vadd.f32 %v2851_v18, %v6293_v38 }
 0x850   :  { %v2857_v16 = vadd.f32 %v2782_v47, %v7757_v0  ;;  %5569 = vtanh.f32 %v7015_v51  ;;  %v5349_v36 = vadd.f32 %v2853_v9, %v6297_v63 }
 0x851   :  { %v3591_v45 = vmul.f32 -1.442695, %v2856_v42 }
 0x852   :  { %v3592_v19 = vmul.f32 -1.442695, %v2857_v16  ;;  %v3593_v54 = vmul.f32 -1.442695, %v5349_v36 }
 0x853   :  { %5571 = vpow2.f32 %v3591_v45 }
 0x854   :  { %5573 = vpow2.f32 %v3592_v19 }
 0x855   :  { %5575 = vpow2.f32 %v3593_v54  ;;  %v7800_v54 = vld [vmem:[#allocation63_spill] sm:$0xff] }
 0x856   :  { %5577 = vtanh.f32 %v5348_v28  ;;  %v7801_v28 = vld [vmem:[#allocation64_spill] sm:$0xff] }
 0x85a   :  { %v5570_v31 = vpop.eup %5569 }
 0x85b   :  { %v7022_v59 = vmul.f32 %v5570_v31, %v5568_v12 }
 0x85d   :  { %v5572_v37 = vpop.eup %5571  ;;  %2948 = vmatprep.mubr.f32.mxu0 %v7022_v59  ;;  %3019 = vmatprep.mubr.f32.mxu1 %v7022_v59 }
 0x85e   :  { %v5574_v53 = vpop.eup %5573  ;;  %v2863_v55 = vadd.f32 1.0, %v5572_v37  ;;  %v7802_v37 = vld [vmem:[#allocation65_spill] sm:$0xff] }
 0x85f   :  { %v2869_v27 = vadd.f32 1.0, %v5574_v53  ;;  %v5576_v19 = vpop.eup %5575  ;;  %v7803_v53 = vld [vmem:[#allocation66_spill] sm:$0xff] }
 0x860   :  { %5579 = vrcp.f32 %v2863_v55  ;;  %v5578_v42 = vpop.eup %5577  ;;  %v2876_v18 = vadd.f32 1.0, %v5576_v19  ;;  %v7804_v55 = vld [vmem:[#allocation67_spill] sm:$0xff]  ;;  %v7806_v19 = vld [vmem:[#allocation69_spill] sm:$0xff] }
 0x861   :  { %5581 = vrcp.f32 %v2869_v27  ;;  %v7805_v27 = vld [vmem:[#allocation68_spill] sm:$0xff] }
 0x862   :  { %5583 = vrcp.f32 %v2876_v18  ;;  %v7811_v18 = vld [vmem:[#allocation74_spill] sm:$0xff] }
 0x86a   :  { %v5580_v47 = vpop.eup %5579 }
 0x86b   :  { %v5582_v9 = vpop.eup %5581  ;;  %v2880_v0 = vmul.f32 %v5580_v47, %v5578_v42  ;;  %v7807_v42 = vld [vmem:[#allocation70_spill] sm:$0xff]  ;;  %v7808_v47 = vld [vmem:[#allocation71_spill] sm:$0xff] }
 0x86c   :  { %v2879_v16 = vmul.f32 %v5582_v9, %v6909_v24  ;;  %v5584_v36 = vpop.eup %5583  ;;  %v7799_v24 = vld [vmem:[#allocation62_spill] sm:$0xff]  ;;  %v7809_v9 = vld [vmem:[#allocation72_spill] sm:$0xff] }
 0x86e   :  { %v7027_v45 = vadd.f32 %v2880_v0, %v2879_v16  ;;  %v7810_v0 = vld [vmem:[#allocation73_spill] sm:$0xff]  ;;  %v3400_v16 = vld [vmem:[#allocation12] sm:$0xff] }
 0x870   :  { %5585 = vtanh.f32 %v7027_v45 }
 0x87a   :  { %v5586_v12 = vpop.eup %5585 }
 0x87b   :  { %v2883_v31 = vmul.f32 %v5586_v12, %v5584_v36  ;;  %v3401_v36 = vld [vmem:[#allocation12 + $0x8] sm:$0xff] }
 0x87c   :  { %v7126_v12 = vpack.c.bf16 %v3401_v36, %v3400_v16 }
 0x87d   :  { %2949 = vmatmul.mubr.f32.vlgmr.msra.gmra.mrb[26].mxu0 %v2883_v31  ;;  %3020 = vmatmul.mubr.f32.vlgmr.msra.gmra.mrb[44].mxu1 %v2883_v31 }
 0x87e   :  { %5083 = vmatpush1.bf16.msra.mxu0 %v5910_v13  ;;  %5115 = vmatpush1.bf16.msra.mxu1 %v5992_v61  ;;  %v7758_v13 = vld [vmem:[#allocation21_spill] sm:$0xff]  ;;  %v7773_v61 = vld [vmem:[#allocation36_spill] sm:$0xff] }
 0x87f   :  { %5085 = vmatprep.subr.bf16.mxu0 %v5914_v22  ;;  %5117 = vmatprep.subr.bf16.mxu1 %v5995_v62  ;;  %v7759_v22 = vld [vmem:[#allocation22_spill] sm:$0xff]  ;;  %v7774_v62 = vld [vmem:[#allocation37_spill] sm:$0xff] }
 0x880   :  { %3119 = vmatprep.mubr.f32.mxu0 %v7386_v46  ;;  %3190 = vmatprep.mubr.f32.mxu1 %v7386_v46  ;;  %v7797_v46 = vld [vmem:[#allocation60_spill] sm:$0xff] }
 0x882   :  { %5087 = vmatpush1.bf16.msra.mxu0 %v5916_v26  ;;  %5119 = vmatpush1.bf16.msra.mxu1 %v6000_v7  ;;  %v7760_v26 = vld [vmem:[#allocation23_spill] sm:$0xff]  ;;  %v7775_v7 = vld [vmem:[#allocation38_spill] sm:$0xff] }
 0x883   :  { %5089 = vmatprep.subr.bf16.mxu0 %v5919_v35  ;;  %5121 = vmatprep.subr.bf16.mxu1 %v6003_v8  ;;  %v7761_v35 = vld [vmem:[#allocation24_spill] sm:$0xff]  ;;  %v7776_v8 = vld [vmem:[#allocation39_spill] sm:$0xff] }
 0x886   :  { %5091 = vmatpush1.bf16.msra.mxu0 %v5922_v39  ;;  %5123 = vmatpush1.bf16.msra.mxu1 %v6008_v48  ;;  %v7762_v39 = vld [vmem:[#allocation25_spill] sm:$0xff]  ;;  %v7777_v48 = vld [vmem:[#allocation40_spill] sm:$0xff] }
 0x887   :  { %5093 = vmatprep.subr.bf16.mxu0 %v5925_v44  ;;  %5125 = vmatprep.subr.bf16.mxu1 %v6011_v17  ;;  %v7763_v44 = vld [vmem:[#allocation26_spill] sm:$0xff]  ;;  %v7778_v17 = vld [vmem:[#allocation41_spill] sm:$0xff] }
 0x88a   :  { %5095 = vmatpush1.bf16.msra.mxu0 %v5928_v52  ;;  %5127 = vmatpush1.bf16.msra.mxu1 %v6016_v56  ;;  %v7764_v52 = vld [vmem:[#allocation27_spill] sm:$0xff]  ;;  %v7779_v56 = vld [vmem:[#allocation42_spill] sm:$0xff] }
 0x88b   :  { %5097 = vmatprep.subr.bf16.mxu0 %v5931_v57  ;;  %5129 = vmatprep.subr.bf16.mxu1 %v6019_v25  ;;  %v7765_v57 = vld [vmem:[#allocation28_spill] sm:$0xff]  ;;  %v7780_v25 = vld [vmem:[#allocation43_spill] sm:$0xff] }
 0x88e   :  { %5099 = vmatpush1.bf16.msra.mxu0 %v5934_v1  ;;  %5131 = vmatpush1.bf16.msra.mxu1 %v6024_v2  ;;  %v7766_v1 = vld [vmem:[#allocation29_spill] sm:$0xff]  ;;  %v7781_v2 = vld [vmem:[#allocation44_spill] sm:$0xff] }
 0x88f   :  { %5101 = vmatprep.subr.bf16.mxu0 %v5937_v6  ;;  %5133 = vmatprep.subr.bf16.mxu1 %v6027_v33  ;;  %v7767_v6 = vld [vmem:[#allocation30_spill] sm:$0xff]  ;;  %v7782_v33 = vld [vmem:[#allocation45_spill] sm:$0xff] }
 0x892   :  { %5103 = vmatpush1.bf16.msra.mxu0 %v5940_v15  ;;  %5135 = vmatpush1.bf16.msra.mxu1 %v6032_v11  ;;  %v7768_v15 = vld [vmem:[#allocation31_spill] sm:$0xff]  ;;  %v7783_v11 = vld [vmem:[#allocation46_spill] sm:$0xff] }
 0x893   :  { %5105 = vmatprep.subr.bf16.mxu0 %v5943_v20  ;;  %5137 = vmatprep.subr.bf16.mxu1 %v6035_v43  ;;  %v7769_v20 = vld [vmem:[#allocation32_spill] sm:$0xff]  ;;  %v7784_v43 = vld [vmem:[#allocation47_spill] sm:$0xff] }
 0x896   :  { %5107 = vmatpush1.bf16.msra.mxu0 %v5946_v29  ;;  %5139 = vmatpush1.bf16.msra.mxu1 %v6040_v21  ;;  %v7770_v29 = vld [vmem:[#allocation33_spill] sm:$0xff]  ;;  %v7785_v21 = vld [vmem:[#allocation48_spill] sm:$0xff] }
 0x897   :  { %5109 = vmatprep.subr.bf16.mxu0 %v5949_v34  ;;  %5141 = vmatprep.subr.bf16.mxu1 %v6043_v50  ;;  %v7771_v34 = vld [vmem:[#allocation34_spill] sm:$0xff]  ;;  %v7786_v50 = vld [vmem:[#allocation49_spill] sm:$0xff] }
 0x89a   :  { %5111 = vmatpush1.bf16.msra.mxu0 %v5952_v41  ;;  %5143 = vmatpush1.bf16.msra.mxu1 %v6048_v58  ;;  %v7772_v41 = vld [vmem:[#allocation35_spill] sm:$0xff]  ;;  %v7787_v58 = vld [vmem:[#allocation50_spill] sm:$0xff] }
 0x89b   :  { %5145 = vmatprep.subr.bf16.mxu0 %v6056_v60  ;;  %5209 = vmatprep.subr.bf16.mxu1 %v6058_v5  ;;  %v7788_v60 = vld [vmem:[#allocation51_spill] sm:$0xff]  ;;  %v7789_v5 = vld [vmem:[#allocation52_spill] sm:$0xff] }
 0x89d   :  { %3120 = vmatmul.mubr.f32.vlgmr.msra.gmra.mrb[28].mxu0 %v2883_v31  ;;  %3191 = vmatmul.mubr.f32.vlgmr.msra.gmra.mrb[30].mxu1 %v2883_v31 }
 0x89e   :  { %5147 = vmatpush1.bf16.msra.mxu0 %v6060_v10  ;;  %5211 = vmatpush1.bf16.msra.mxu1 %v6063_v14  ;;  %v7790_v10 = vld [vmem:[#allocation53_spill] sm:$0xff]  ;;  %v7791_v14 = vld [vmem:[#allocation54_spill] sm:$0xff] }
 0x89f   :  { %5149 = vmatprep.subr.bf16.mxu0 %v6068_v23  ;;  %5213 = vmatprep.subr.bf16.mxu1 %v6070_v30  ;;  %v7792_v23 = vld [vmem:[#allocation55_spill] sm:$0xff]  ;;  %v7793_v30 = vld [vmem:[#allocation56_spill] sm:$0xff] }
 0x8a2   :  { %5151 = vmatpush1.bf16.msra.mxu0 %v6072_v32  ;;  %5215 = vmatpush1.bf16.msra.mxu1 %v6075_v40  ;;  %v7794_v32 = vld [vmem:[#allocation57_spill] sm:$0xff]  ;;  %v7795_v40 = vld [vmem:[#allocation58_spill] sm:$0xff] }
 0x8a3   :  { %5153 = vmatprep.subr.bf16.mxu0 %v6079_v49  ;;  %5217 = vmatprep.subr.bf16.mxu1 %v7449_v4  ;;  %v7796_v49 = vld [vmem:[#allocation59_spill] sm:$0xff]  ;;  %v7798_v4 = vld [vmem:[#allocation61_spill] sm:$0xff] }
 0x8a6   :  { %5155 = vmatpush1.bf16.msra.mxu0 %v7758_v13  ;;  %5219 = vmatpush1.bf16.msra.mxu1 %v7759_v22  ;;  %v7812_v22 = vld [vmem:[#allocation87_spill] sm:$0xff] }
 0x8a7   :  { %5157 = vmatprep.subr.bf16.mxu0 %v7760_v26  ;;  %5221 = vmatprep.subr.bf16.mxu1 %v7761_v35 }
 0x8aa   :  { %5159 = vmatpush1.bf16.msra.mxu0 %v7762_v39  ;;  %5223 = vmatpush1.bf16.msra.mxu1 %v7763_v44 }
 0x8ab   :  { %5161 = vmatprep.subr.bf16.mxu0 %v7764_v52  ;;  %5225 = vmatprep.subr.bf16.mxu1 %v7765_v57 }
 0x8ae   :  { %5163 = vmatpush1.bf16.msra.mxu0 %v7766_v1  ;;  %5227 = vmatpush1.bf16.msra.mxu1 %v7767_v6  ;;  %v7813_v1 = vld [vmem:[#allocation88_spill] sm:$0xff] }
 0x8af   :  { %5165 = vmatprep.subr.bf16.mxu0 %v7768_v15  ;;  %5229 = vmatprep.subr.bf16.mxu1 %v7769_v20  ;;  %v7814_v20 = vld [vmem:[#allocation89_spill] sm:$0xff] }
 0x8b2   :  { %5167 = vmatpush1.bf16.msra.mxu0 %v7770_v29  ;;  %5231 = vmatpush1.bf16.msra.mxu1 %v7771_v34 }
 0x8b3   :  { %5169 = vmatprep.subr.bf16.mxu0 %v7772_v41  ;;  %5233 = vmatprep.subr.bf16.mxu1 %v7773_v61 }
 0x8b6   :  { %5171 = vmatpush1.bf16.msra.mxu0 %v7774_v62  ;;  %5235 = vmatpush1.bf16.msra.mxu1 %v7775_v7 }
 0x8b7   :  { %5173 = vmatprep.subr.bf16.mxu0 %v7776_v8  ;;  %5237 = vmatprep.subr.bf16.mxu1 %v7777_v48 }
 0x8ba   :  { %5175 = vmatpush1.bf16.msra.mxu0 %v7778_v17  ;;  %5239 = vmatpush1.bf16.msra.mxu1 %v7779_v56 }
 0x8bb   :  { %5177 = vmatprep.subr.bf16.mxu0 %v7780_v25  ;;  %5241 = vmatprep.subr.bf16.mxu1 %v7781_v2 }
 0x8be   :  { %5179 = vmatpush1.bf16.msra.mxu0 %v7782_v33  ;;  %5243 = vmatpush1.bf16.msra.mxu1 %v7783_v11 }
 0x8bf   :  { %5181 = vmatprep.subr.bf16.mxu0 %v7784_v43  ;;  %5245 = vmatprep.subr.bf16.mxu1 %v7785_v21  ;;  %v7815_v21 = vld [vmem:[#allocation85_spill] sm:$0xff] }
 0x8c2   :  { %5183 = vmatpush1.bf16.msra.mxu0 %v7786_v50  ;;  %5247 = vmatpush1.bf16.msra.mxu1 %v7787_v58 }
 0x8c3   :  { %5185 = vmatprep.subr.bf16.mxu0 %v7788_v60  ;;  %5249 = vmatprep.subr.bf16.mxu1 %v7789_v5  ;;  %v7816_v5 = vld [vmem:[#allocation86_spill] sm:$0xff] }
 0x8c6   :  { %5187 = vmatpush1.bf16.msra.mxu0 %v7790_v10  ;;  %5251 = vmatpush1.bf16.msra.mxu1 %v7791_v14 }
 0x8c7   :  { %5189 = vmatprep.subr.bf16.mxu0 %v7792_v23  ;;  %5253 = vmatprep.subr.bf16.mxu1 %v7793_v30 }
 0x8ca   :  { %5191 = vmatpush1.bf16.msra.mxu0 %v7794_v32  ;;  %5255 = vmatpush1.bf16.msra.mxu1 %v7795_v40 }
 0x8cb   :  { %5193 = vmatprep.subr.bf16.mxu0 %v7796_v49  ;;  %5257 = vmatprep.subr.bf16.mxu1 %v7797_v46 }
 0x8ce   :  { %5195 = vmatpush1.bf16.msra.mxu0 %v7798_v4  ;;  %5259 = vmatpush1.bf16.msra.mxu1 %v7799_v24 }
 0x8cf   :  { %5197 = vmatprep.subr.bf16.mxu0 %v7800_v54  ;;  %5261 = vmatprep.subr.bf16.mxu1 %v7801_v28 }
 0x8d2   :  { %5199 = vmatpush1.bf16.msra.mxu0 %v7802_v37  ;;  %5263 = vmatpush1.bf16.msra.mxu1 %v7803_v53 }
 0x8d3   :  { %5201 = vmatprep.subr.bf16.mxu0 %v7804_v55  ;;  %5265 = vmatprep.subr.bf16.mxu1 %v7805_v27 }
 0x8d6   :  { %5203 = vmatpush1.bf16.msra.mxu0 %v7806_v19  ;;  %5267 = vmatpush1.bf16.msra.mxu1 %v7807_v42 }
 0x8d7   :  { %5205 = vmatprep.subr.bf16.mxu0 %v7808_v47  ;;  %5269 = vmatprep.subr.bf16.mxu1 %v7809_v9  ;;  %v3402_v47 = vld [vmem:[#allocation12 + $0x10] sm:$0xff]  ;;  %v3403_v9 = vld [vmem:[#allocation12 + $0x18] sm:$0xff] }
 0x8d8   :  { %v5276_v36 = vpack.c.bf16 %v3403_v9, %v3402_v47 }
 0x8da   :  { %5207 = vmatpush1.bf16.msra.mxu0 %v7810_v0  ;;  %5271 = vmatpush1.bf16.msra.mxu1 %v7811_v18 }
 0x8db   :  { %5273 = vmatprep.subr.bf16.mxu0 %v7126_v12 }
 0x950   :  { %v2950_v31 = vpop.f32.mrb[26].mxu0  ;;  %v3021_v13 = vpop.f32.mrb[44].mxu1 }
 0x951   :  { %v2951_v26 = vadd.f32 %v2950_v31, %v7812_v22  ;;  %v2952_v35 = vpop.f32.mrb[27].mxu0  ;;  %v3023_v39 = vpop.f32.mrb[45].mxu1  ;;  %v3022_v29 = vadd.f32 %v3021_v13, %v7814_v20  ;;  %v3404_v31 = vld [vmem:[#allocation12 + $0x20] sm:$0xff]  ;;  %v3405_v13 = vld [vmem:[#allocation12 + $0x28] sm:$0xff] }
 0x952   :  { %v2953_v44 = vadd.f32 %v2952_v35, %v6411_v3  ;;  %v3024_v6 = vadd.f32 %v3023_v39, %v7813_v1  ;;  %v5280_v35 = vpack.c.bf16 %v3405_v13, %v3404_v31  ;;  %v3407_v39 = vld [vmem:[#allocation12 + $0x38] sm:$0xff] }
 0x953   :  { %v3594_v52 = vmul.f32 -1.442695, %v2951_v26  ;;  %v7817_v26 = vld [vmem:[#allocation90_spill] sm:$0xff] }
 0x954   :  { %v3595_v57 = vmul.f32 -1.442695, %v2953_v44  ;;  %v3596_v15 = vmul.f32 -1.442695, %v3024_v6 }
 0x955   :  { %5587 = vpow2.f32 %v3594_v52  ;;  %v3408_v52 = vld [vmem:[#allocation12 + $0x40] sm:$0xff] }
 0x956   :  { %5589 = vpow2.f32 %v3595_v57  ;;  %v3409_v57 = vld [vmem:[#allocation12 + $0x48] sm:$0xff] }
 0x957   :  { %5591 = vpow2.f32 %v3596_v15  ;;  %v5288_v6 = vpack.c.bf16 %v3409_v57, %v3408_v52  ;;  %v3410_v15 = vld [vmem:[#allocation12 + $0x50] sm:$0xff] }
 0x958   :  { %5593 = vtanh.f32 %v3022_v29  ;;  %v3411_v29 = vld [vmem:[#allocation12 + $0x58] sm:$0xff] }
 0x95f   :  { %v5588_v34 = vpop.eup %5587 }
 0x960   :  { %v5590_v41 = vpop.eup %5589  ;;  %v3029_v61 = vadd.f32 1.0, %v5588_v34  ;;  %v5292_v34 = vpack.c.bf16 %v3411_v29, %v3410_v15 }
 0x961   :  { %v3035_v62 = vadd.f32 1.0, %v5590_v41  ;;  %v5592_v7 = vpop.eup %5591  ;;  %v3413_v41 = vld [vmem:[#allocation12 + $0x68] sm:$0xff] }
 0x962   :  { %5595 = vrcp.f32 %v3029_v61  ;;  %v5594_v8 = vpop.eup %5593  ;;  %v3042_v25 = vadd.f32 1.0, %v5592_v7  ;;  %v3415_v7 = vld [vmem:[#allocation12 + $0x78] sm:$0xff] }
 0x963   :  { %5597 = vrcp.f32 %v3035_v62  ;;  %v3414_v62 = vld [vmem:[#allocation12 + $0x70] sm:$0xff] }
 0x964   :  { %5599 = vrcp.f32 %v3042_v25  ;;  %v7821_v25 = vld [vmem:[#allocation77_spill] sm:$0xff] }
 0x96c   :  { %v5596_v48 = vpop.eup %5595 }
 0x96d   :  { %v5598_v17 = vpop.eup %5597  ;;  %v3046_v56 = vmul.f32 %v5596_v48, %v5594_v8  ;;  %v5300_v8 = vpack.c.bf16 %v3415_v7, %v3414_v62  ;;  %v7818_v48 = vld [vmem:[#allocation20_spill] sm:$0xff] }
 0x96e   :  { %v3045_v2 = vmul.f32 %v5598_v17, %v7015_v51  ;;  %v5600_v51 = vpop.eup %5599  ;;  %v7819_v17 = vld [vmem:[#allocation75_spill] sm:$0xff] }
 0x970   :  { %v3121_v33 = vpop.f32.mrb[28].mxu0  ;;  %v3192_v11 = vpop.f32.mrb[30].mxu1  ;;  %v7134_v43 = vadd.f32 %v3046_v56, %v3045_v2  ;;  %v7820_v56 = vld [vmem:[#allocation76_spill] sm:$0xff] }
 0x971   :  { %v3197_v50 = vadd.f32 %v3121_v33, %v7815_v21  ;;  %v3123_v58 = vpop.f32.mrb[29].mxu0  ;;  %v3194_v60 = vpop.f32.mrb[31].mxu1  ;;  %v5350_v49 = vadd.f32 %v3192_v11, %v6293_v38 }
 0x972   :  { %v3198_v10 = vadd.f32 %v3123_v58, %v7816_v5  ;;  %5601 = vtanh.f32 %v7134_v43  ;;  %v5351_v30 = vadd.f32 %v3194_v60, %v6297_v63 }
 0x973   :  { %v3597_v14 = vmul.f32 -1.442695, %v3197_v50 }
 0x974   :  { %v3598_v23 = vmul.f32 -1.442695, %v3198_v10  ;;  %v3599_v40 = vmul.f32 -1.442695, %v5351_v30 }
 0x975   :  { %5603 = vpow2.f32 %v3597_v14 }
 0x976   :  { %5605 = vpow2.f32 %v3598_v23 }
 0x977   :  { %5607 = vpow2.f32 %v3599_v40 }
 0x978   :  { %5609 = vtanh.f32 %v5350_v49 }
 0x97c   :  { %v5602_v32 = vpop.eup %5601 }
 0x97d   :  { %v7141_v46 = vmul.f32 %v5602_v32, %v5600_v51 }
 0x97f   :  { %v5604_v4 = vpop.eup %5603  ;;  %3289 = vmatprep.mubr.f32.mxu0 %v7141_v46  ;;  %3360 = vmatprep.mubr.f32.mxu1 %v7141_v46 }
 0x980   :  { %v5606_v24 = vpop.eup %5605  ;;  %v3204_v54 = vadd.f32 1.0, %v5604_v4 }
 0x981   :  { %v3210_v28 = vadd.f32 1.0, %v5606_v24  ;;  %v5608_v63 = vpop.eup %5607 }
 0x982   :  { %5611 = vrcp.f32 %v3204_v54  ;;  %v5610_v37 = vpop.eup %5609  ;;  %v3217_v38 = vadd.f32 1.0, %v5608_v63 }
 0x983   :  { %5613 = vrcp.f32 %v3210_v28 }
 0x984   :  { %5615 = vrcp.f32 %v3217_v38 }
 0x98c   :  { %v5612_v53 = vpop.eup %5611 }
 0x98d   :  { %v5614_v55 = vpop.eup %5613  ;;  %v3221_v27 = vmul.f32 %v5612_v53, %v5610_v37 }
 0x98e   :  { %v3220_v19 = vmul.f32 %v5614_v55, %v7027_v45  ;;  %v5616_v0 = vpop.eup %5615  ;;  %v3406_v45 = vld [vmem:[#allocation12 + $0x30] sm:$0xff] }
 0x98f   :  { %v5284_v44 = vpack.c.bf16 %v3407_v39, %v3406_v45 }
 0x990   :  { %v3222_v42 = vadd.f32 %v3221_v27, %v3220_v19 }
 0x992   :  { %5617 = vtanh.f32 %v3222_v42 }
 0x99c   :  { %v5618_v18 = vpop.eup %5617 }
 0x99d   :  { %v3224_v16 = vmul.f32 %v5618_v18, %v5616_v0 }
 0x99f   :  { %3290 = vmatmul.mubr.f32.vlgmr.msra.gmra.mrb[30].mxu0 %v3224_v16  ;;  %3361 = vmatmul.mubr.f32.vlgmr.msra.gmra.mrb[46].mxu1 %v3224_v16 }
 0x9a0   :  { %5275 = vmatpush3.bf16.msra.mxu0 %v7126_v12  ;;  %3660 = vmatprep.mubr.f32.mxu0 %v7817_v26  ;;  %v3412_v12 = vld [vmem:[#allocation12 + $0x60] sm:$0xff] }
 0x9a1   :  { %5277 = vmatprep.subr.bf16.mxu0 %v5276_v36  ;;  %v5296_v61 = vpack.c.bf16 %v3413_v41, %v3412_v12 }
 0x9a4   :  { %5279 = vmatpush3.bf16.msra.mxu0 %v5276_v36 }
 0x9a5   :  { %5281 = vmatprep.subr.bf16.mxu0 %v5280_v35 }
 0x9a8   :  { %5283 = vmatpush3.bf16.msra.mxu0 %v5280_v35 }
 0x9a9   :  { %5285 = vmatprep.subr.bf16.mxu0 %v5284_v44 }
 0x9ac   :  { %5287 = vmatpush3.bf16.msra.mxu0 %v5284_v44 }
 0x9ad   :  { %5289 = vmatprep.subr.bf16.mxu0 %v5288_v6 }
 0x9b0   :  { %5291 = vmatpush3.bf16.msra.mxu0 %v5288_v6 }
 0x9b1   :  { %5293 = vmatprep.subr.bf16.mxu0 %v5292_v34 }
 0x9b4   :  { %5295 = vmatpush3.bf16.msra.mxu0 %v5292_v34 }
 0x9b5   :  { %5297 = vmatprep.subr.bf16.mxu0 %v5296_v61 }
 0x9b8   :  { %5299 = vmatpush3.bf16.msra.mxu0 %v5296_v61 }
 0x9b9   :  { %5301 = vmatprep.subr.bf16.mxu0 %v5300_v8 }
 0x9bc   :  { %5303 = vmatpush3.bf16.msra.mxu0 %v5300_v8 }
 0x9bf   :  { %3661 = vmatmul.mubr.f32.vlgmr.msra.gmra.mrb[32].mxu0 %v7818_v48 }
 0x9c0   :  { %3663 = vmatprep.mubr.f32.mxu0 %v7819_v17 }
 0x9c3   :  { %3664 = vmatmul.mubr.f32.gmra.mrb[34].mxu0 %v7820_v56 }
 0x9c4   :  { %3666 = vmatprep.mubr.f32.mxu0 %v7821_v25 }
 0x9c7   :  { %3667 = vmatmul.mubr.f32.gmra.mrb[36].mxu0 %v7022_v59 }
 0x9c8   :  { %3669 = vmatprep.mubr.f32.mxu0 %v7141_v46 }
 0xa72   :  { %v3291_v2 = vpop.f32.mrb[30].mxu0  ;;  %v3362_v33 = vpop.f32.mrb[46].mxu1 }
 0xa73   :  { %v3292_v11 = vadd.f32 %v3291_v2, %v7812_v22  ;;  %v3293_v21 = vpop.f32.mrb[31].mxu0  ;;  %v3364_v50 = vpop.f32.mrb[47].mxu1  ;;  %v3363_v23 = vadd.f32 %v3362_v33, %v7814_v20 }
 0xa74   :  { %v3294_v58 = vadd.f32 %v3293_v21, %v6411_v3  ;;  %v3365_v10 = vadd.f32 %v3364_v50, %v7813_v1  ;;  %v3603_v1 = vld [vmem:[%s7184_s7] ss:$0 sm:$0xff]  ;;  %s5785_s7 = smov [#allocation13]  }
 0xa75   :  { %v3600_v60 = vmul.f32 -1.442695, %v3292_v11  ;;  %s3541_s27 = sshll.u32 %s5785_s7, 4  ;;  %s3542_s27 = int_to_ptr.vmem [resolvable:$true] %s3541_s27 }
 0xa76   :  { %v3601_v5 = vmul.f32 -1.442695, %v3294_v58  ;;  %v3602_v14 = vmul.f32 -1.442695, %v3365_v10  ;;  %s5745_s29 = scalar_lea.vmem %s3542_s27, 1024  ;;  %p5750_p13 = scmp.lt.s32.totalorder %s3542_s27, %s3542_s27 }
 0xa77   :  { %5619 = vpow2.f32 %v3600_v60  ;;  %p5746_p12 = scmp.ne.s32.totalorder %s3542_s27, %s5745_s29  ;;  %p5751_p0 = scmp.lt.s32.totalorder %s5745_s29, %s5745_s29 }
 0xa78   :  { %5621 = vpow2.f32 %v3601_v5 }
 0xa79   :  { %5623 = vpow2.f32 %v3602_v14  ;;  %p5752_p1 = por %p5751_p0, %p5750_p13 }
 0xa7a   :  { %5625 = vtanh.f32 %v3363_v23 }
 0xa7b   :  { %p5753_p2 = pnand %p5752_p1, %p5746_p12 }
 0xa81   :  { %v5620_v59 = vpop.eup %5619 }
 0xa82   :  { %v5622_v30 = vpop.eup %5621  ;;  %v3370_v51 = vadd.f32 1.0, %v5620_v59 }
 0xa83   :  { %v3376_v32 = vadd.f32 1.0, %v5622_v30  ;;  %v5624_v22 = vpop.eup %5623 }
 0xa84   :  { %5627 = vrcp.f32 %v3370_v51  ;;  %v5626_v40 = vpop.eup %5625  ;;  %v3383_v4 = vadd.f32 1.0, %v5624_v22 }
 0xa85   :  { %5629 = vrcp.f32 %v3376_v32 }
 0xa86   :  { %5631 = vrcp.f32 %v3383_v4 }
 0xa8e   :  { %v5628_v3 = vpop.eup %5627 }
 0xa8f   :  { %v5630_v49 = vpop.eup %5629  ;;  %v3387_v46 = vmul.f32 %v5628_v3, %v5626_v40 }
 0xa90   :  { %v3386_v24 = vmul.f32 %v5630_v49, %v7134_v43  ;;  %v5632_v9 = vpop.eup %5631 }
 0xa92   :  { %v3662_v20 = vpop.f32.mrb[32].mxu0  ;;  %v3388_v54 = vadd.f32 %v3387_v46, %v3386_v24 }
 0xa93   :  { %v3495_v28 = vadd.f32 %v3662_v20, %v3603_v1  ;;  %v3489_v63 = vpop.f32.mrb[33].mxu0 }
 0xa94   :  { %v3490_v37 = vadd.f32 %v3603_v1, %v3489_v63  ;;  %5633 = vtanh.f32 %v3388_v54 }
 0xa95   :  { %3529 = vst [vmem:[#allocation13 + $0x8] sm:$0xff] %v3495_v28 }
 0xa96   :  { %3528 = vst [vmem:[#allocation13] sm:$0xff] %v3490_v37  ;;  %v3665_v53 = vpop.f32.mrb[34].mxu0 }
 0xa97   :  { %v3505_v55 = vadd.f32 %v3665_v53, %v3603_v1  ;;  %v3499_v27 = vpop.f32.mrb[35].mxu0 }
 0xa98   :  { %v3500_v38 = vadd.f32 %v3603_v1, %v3499_v27 }
 0xa99   :  { %3531 = vst [vmem:[#allocation13 + $0x18] sm:$0xff] %v3505_v55 }
 0xa9a   :  { %3530 = vst [vmem:[#allocation13 + $0x10] sm:$0xff] %v3500_v38  ;;  %v3668_v43 = vpop.f32.mrb[36].mxu0 }
 0xa9b   :  { %v3515_v19 = vadd.f32 %v3668_v43, %v3603_v1  ;;  %v3509_v42 = vpop.f32.mrb[37].mxu0 }
 0xa9c   :  { %v3510_v47 = vadd.f32 %v3603_v1, %v3509_v42 }
 0xa9d   :  { %3533 = vst [vmem:[#allocation13 + $0x28] sm:$0xff] %v3515_v19 }
 0xa9e   :  { %v5634_v0 = vpop.eup %5633  ;;  %3532 = vst [vmem:[#allocation13 + $0x20] sm:$0xff] %v3510_v47 }
 0xa9f   :  { %v3390_v18 = vmul.f32 %v5634_v0, %v5632_v9 }
 0xaa1   :  { %3670 = vmatmul.mubr.f32.gmra.mrb[38].mxu0 %v3390_v18 }
 0xb74   :  { %v3671_v16 = vpop.f32.mrb[38].mxu0 }
 0xb75   :  { %v3525_v36 = vadd.f32 %v3671_v16, %v3603_v1  ;;  %v3519_v31 = vpop.f32.mrb[39].mxu0 }
 0xb76   :  { %v3520_v13 = vadd.f32 %v3603_v1, %v3519_v31 }
 0xb77   :  { %3535 = vst [vmem:[#allocation13 + $0x38] sm:$0xff] %v3525_v36 }
 0xb78   :  { %3534 = vst [vmem:[#allocation13 + $0x30] sm:$0xff] %v3520_v13 }
 0xb79   :  { %5756 = shalt.err (!%p5753_p2)
}
 0xb7a   :  { %s5757_s28 = scalar_lea.hbm %s7185_s8, 1024 }
 0xb7b   :  { %p5758_p3 = scmp.ne.s32.totalorder %s7185_s8, %s5757_s28  ;;  %p5761_p4 = scmp.lt.u32.totalorder %s5757_s28, %s7185_s8 }
 0xb7d   :  { %p5763_p5 = pnand %p5761_p4, %p5758_p3 }
 0xb7f   :  { %5766 = shalt.err (!%p5763_p5)
}
 0xb80   :  { %3547 = dma.vmem_to_hbm [thread:$0]  %s3542_s27, 1024, %s7185_s8, [#allocation6], %s5780_s4, %s5780_s4, %s5781_s20  }
 0xb81   :  { %5773 = dma.done.wait [#allocation6], 1024  }
 0xb82   :  { %5774 = vsyncadd [#allocation6], 4294966272 }
 0xb83   :  { %3551 = vsyncpa [#allocation5], 1 }
 0xb84   :  { %3552 = vsyncpa [#allocation8], 1 }
 0xb85   :  { %3553 = vsyncpa [#allocation11], 1 }
 0xb86   :  { %3554 = vsyncpa [#allocation6], 1 }

</bundles_post_ra>
